<compile_context>
chip_gen: v5e
topology: v5e:2x2
jax: 0.10.0
libtpu: 0.0.40
codegen_flags: <defaults>
</compile_context>

<pallas_src>
import functools

import jax
import jax.numpy as jnp
from jax.experimental import pallas as pl
from jax.experimental.pallas import tpu as pltpu


def _round_up(x, m):
    return ((x + m - 1) // m) * m


# -----------------------------------------------------------------------------
# Kernel 1: fused conv-as-matmul + bias + 2x2 max-pool + ReLU
# -----------------------------------------------------------------------------
def _conv_bias_pool_relu_kernel(a_ref, w_ref, b_ref, o_ref, acc_ref, *, W, Wo, n_pairs):
    # a_ref:(TM,Kp) bf16 im2col rows | w_ref:(Kp,Cout) bf16 | b_ref:(1,Cout) f32
    # o_ref:(TM//4,Cout) bf16 pooled output | acc_ref:(TM,Cout) f32 scratch
    acc_ref[...] = (
        jnp.dot(a_ref[...], w_ref[...], preferred_element_type=jnp.float32)
        + b_ref[...]
    )

    # 2x2 max pool, stride 2.  Tile rows are (h, w) row-major and TM is a multiple
    # of 2*W, so the tile holds whole image-row pairs.  For row-pair p, the four
    # pool taps of its Wo pooled outputs are strided rows of the f32 scratch.
    # ReLU is applied after the max (identical result, 4x fewer VPU ops).
    for p in range(n_pairs):
        base = p * 2 * W
        t00 = acc_ref[pl.ds(base, Wo, stride=2), :]
        t01 = acc_ref[pl.ds(base + 1, Wo, stride=2), :]
        t10 = acc_ref[pl.ds(base + W, Wo, stride=2), :]
        t11 = acc_ref[pl.ds(base + W + 1, Wo, stride=2), :]
        m = jnp.maximum(jnp.maximum(t00, t01), jnp.maximum(t10, t11))
        o_ref[pl.ds(p * Wo, Wo), :] = jnp.maximum(m, 0.0).astype(o_ref.dtype)


def conv3x3_relu_pool(x, w, b, *, tile_m=1024):
    """x:(B,H,W,Cin) NHWC, w:(3,3,Cin,Cout), b:(Cout,).
    Returns maxpool2x2(relu(conv3x3_pad1(x))) as (B,H//2,W//2,Cout) bf16."""
    B, H, W, Cin = x.shape
    Cout = w.shape[-1]
    Ho, Wo = H // 2, W // 2
    K = 9 * Cin
    Kp = _round_up(K, 128)            # 128-aligned contraction dim
    M = B * H * W

    # im2col in bf16 (halves the materialised A and its DMA traffic).
    xb = x.astype(jnp.bfloat16)
    xp = jnp.pad(xb, ((0, 0), (1, 1), (1, 1), (0, 0)))
    patches = [xp[:, dy:dy + H, dx:dx + W, :] for dy in range(3) for dx in range(3)]
    if Kp > K:
        patches.append(jnp.zeros((B, H, W, Kp - K), jnp.bfloat16))
    a = jnp.concatenate(patches, axis=-1).reshape(M, Kp)

    wmat = jnp.pad(w.reshape(K, Cout).astype(jnp.bfloat16), ((0, Kp - K), (0, 0)))
    b2 = b.reshape(1, Cout).astype(jnp.float32)

    # One whole image per grid step when it fits (H*W rows); always a multiple of
    # 2*W and 8, and it divides B*H*W, so pooled tile rows map 1:1 to output rows.
    TM = min(tile_m, H * W)
    assert TM % (2 * W) == 0 and TM % 8 == 0 and M % TM == 0
    n_pairs = TM // (2 * W)
    grid = (M // TM,)

    kernel = functools.partial(_conv_bias_pool_relu_kernel, W=W, Wo=Wo, n_pairs=n_pairs)
    flops = 2 * M * Kp * Cout
    bytes_accessed = M * Kp * 2 + Kp * Cout * 2 + Cout * 4 + (M // 4) * Cout * 2

    out = pl.pallas_call(
        kernel,
        out_shape=jax.ShapeDtypeStruct((M // 4, Cout), jnp.bfloat16),
        grid=grid,
        in_specs=[
            pl.BlockSpec((TM, Kp), lambda i: (i, 0)),      # A tile (pipelined)
            pl.BlockSpec((Kp, Cout), lambda i: (0, 0)),    # weights resident
            pl.BlockSpec((1, Cout), lambda i: (0, 0)),     # bias resident
        ],
        out_specs=pl.BlockSpec((TM // 4, Cout), lambda i: (i, 0)),
        scratch_shapes=[pltpu.VMEM((TM, Cout), jnp.float32)],
        compiler_params=pltpu.CompilerParams(
            dimension_semantics=("parallel",),
            vmem_limit_bytes=32 * 1024 * 1024,
        ),
        cost_estimate=pl.CostEstimate(
            flops=int(flops), transcendentals=0, bytes_accessed=int(bytes_accessed)),
    )(a, wmat, b2)
    return out.reshape(B, Ho, Wo, Cout)


# -----------------------------------------------------------------------------
# Kernel 2: fused FC head  fc1 -> ReLU -> (dropout=id) -> fc2 -> ReLU -> fc3
# -----------------------------------------------------------------------------
def _fc_head_kernel(x_ref, w1_ref, b1_ref, w2_ref, b2_ref, w3_ref, b3_ref, o_ref):
    h = jnp.dot(x_ref[...], w1_ref[...], preferred_element_type=jnp.float32)
    h = jnp.maximum(h + b1_ref[...], 0.0)
    # TODO(synk): Dropout(0.5) is identity at inference (eval mode); no RNG kernel.
    h = jnp.dot(h.astype(jnp.bfloat16), w2_ref[...], preferred_element_type=jnp.float32)
    h = jnp.maximum(h + b2_ref[...], 0.0)
    h = jnp.dot(h.astype(jnp.bfloat16), w3_ref[...], preferred_element_type=jnp.float32)
    o_ref[...] = h + b3_ref[...]


def fc_head(x, w1, b1, w2, b2, w3, b3, *, num_classes=10):
    B, D = x.shape
    H1 = w1.shape[1]
    H2 = w2.shape[1]
    Np = _round_up(num_classes, 128)   # lane-dense fc3 output, sliced below

    xb = x.astype(jnp.bfloat16)
    w1b = w1.astype(jnp.bfloat16)
    w2b = w2.astype(jnp.bfloat16)
    w3b = jnp.pad(w3.astype(jnp.bfloat16), ((0, 0), (0, Np - num_classes)))
    b1r = b1.reshape(1, H1).astype(jnp.float32)
    b2r = b2.reshape(1, H2).astype(jnp.float32)
    b3r = jnp.pad(b3.astype(jnp.float32), (0, Np - num_classes)).reshape(1, Np)

    TB = B if B <= 512 else 512
    grid = (pl.cdiv(B, TB),)
    flops = 2 * B * (D * H1 + H1 * H2 + H2 * Np)
    bytes_accessed = (B * D * 2 + (D * H1 + H1 * H2 + H2 * Np) * 2
                      + (H1 + H2 + Np) * 4 + B * Np * 4)

    out = pl.pallas_call(
        _fc_head_kernel,
        out_shape=jax.ShapeDtypeStruct((B, Np), jnp.float32),
        grid=grid,
        in_specs=[
            pl.BlockSpec((TB, D), lambda i: (i, 0)),
            pl.BlockSpec((D, H1), lambda i: (0, 0)),
            pl.BlockSpec((1, H1), lambda i: (0, 0)),
            pl.BlockSpec((H1, H2), lambda i: (0, 0)),
            pl.BlockSpec((1, H2), lambda i: (0, 0)),
            pl.BlockSpec((H2, Np), lambda i: (0, 0)),
            pl.BlockSpec((1, Np), lambda i: (0, 0)),
        ],
        out_specs=pl.BlockSpec((TB, Np), lambda i: (i, 0)),
        compiler_params=pltpu.CompilerParams(
            dimension_semantics=("parallel",),
            vmem_limit_bytes=32 * 1024 * 1024,
        ),
        cost_estimate=pl.CostEstimate(
            flops=int(flops), transcendentals=0, bytes_accessed=int(bytes_accessed)),
    )(xb, w1b, b1r, w2b, b2r, w3b, b3r)
    return out[:, :num_classes]


# -----------------------------------------------------------------------------
# Parameter init (deterministic, synthetic — no checkpoint load)
# -----------------------------------------------------------------------------
def init_params(key):
    def dense(k, fan_in, shape):
        return jax.random.normal(k, shape, jnp.float32) / jnp.sqrt(float(fan_in))

    ks = jax.random.split(key, 12)
    return {
        "conv1_w": dense(ks[0], 3 * 3 * 3, (3, 3, 3, 32)),
        "conv1_b": dense(ks[1], 3 * 3 * 3, (32,)),
        "conv2_w": dense(ks[2], 3 * 3 * 32, (3, 3, 32, 64)),
        "conv2_b": dense(ks[3], 3 * 3 * 32, (64,)),
        "conv3_w": dense(ks[4], 3 * 3 * 64, (3, 3, 64, 128)),
        "conv3_b": dense(ks[5], 3 * 3 * 64, (128,)),
        "fc1_w": dense(ks[6], 128 * 4 * 4, (128 * 4 * 4, 256)),
        "fc1_b": dense(ks[7], 128 * 4 * 4, (256,)),
        "fc2_w": dense(ks[8], 256, (256, 128)),
        "fc2_b": dense(ks[9], 256, (128,)),
        "fc3_w": dense(ks[10], 128, (128, 10)),
        "fc3_b": dense(ks[11], 128, (10,)),
    }


# -----------------------------------------------------------------------------
# Forward pass (mirrors SimpleCNN.forward, eval mode)
# -----------------------------------------------------------------------------
def simple_cnn_forward(params, x_nchw):
    x = jnp.transpose(x_nchw, (0, 2, 3, 1)).astype(jnp.float32)      # NCHW -> NHWC

    x = conv3x3_relu_pool(x, params["conv1_w"], params["conv1_b"])   # (B,16,16, 32)
    x = conv3x3_relu_pool(x, params["conv2_w"], params["conv2_b"])   # (B, 8, 8, 64)
    x = conv3x3_relu_pool(x, params["conv3_w"], params["conv3_b"])   # (B, 4, 4,128)

    B = x.shape[0]
    # torch's x.view(-1, 128*4*4) flattens NCHW (c, h, w).  Instead of transposing
    # the activations per call, permute fc1's weight rows once so the kernel can
    # consume the natural NHWC flatten (h, w, c) — numerically identical.
    x_flat = x.reshape(B, 4 * 4 * 128)
    w1 = params["fc1_w"].reshape(128, 4, 4, 256).transpose(1, 2, 0, 3).reshape(4 * 4 * 128, 256)

    return fc_head(x_flat, w1, params["fc1_b"],
                   params["fc2_w"], params["fc2_b"],
                   params["fc3_w"], params["fc3_b"], num_classes=10)


if __name__ == "__main__":
    root = jax.random.PRNGKey(0)
    key_in, key_p = jax.random.split(root)

    # The module's fc1 (128*4*4 inputs after three 2x2 pools) implies 32x32 images:
    # (B=2, C=3, H=32, W=32) NCHW.
    x = jax.random.normal(key_in, (2, 3, 32, 32), jnp.float32)
    params = init_params(key_p)

    logits = jax.jit(simple_cnn_forward)(params, x)
    jax.block_until_ready(logits)

    assert logits.shape == (2, 10), logits.shape
    assert logits.dtype == jnp.float32
    print("KERNEL_OK")
</pallas_src>

<mosaic_0001>
module attributes {stable_mosaic.version = 11 : i64} {
  func.func @_conv_bias_pool_relu_kernel(%arg0: i32, %arg1: memref<1024x128xbf16, #tpu.memory_space<vmem>>, %arg2: memref<128x32xbf16, #tpu.memory_space<vmem>>, %arg3: memref<1x32xf32, #tpu.memory_space<vmem>>, %arg4: memref<256x32xbf16, #tpu.memory_space<vmem>>, %arg5: memref<1024x32xf32, #tpu.memory_space<vmem>>) attributes {dimension_semantics = [#tpu.dimension_semantics<parallel>], iteration_bounds = array<i64: 2>, scalar_prefetch = 0 : i64, scratch_operands = 1 : i64, tpu.core_type = #tpu.core_type<tc>, window_params = [{transform_indices = @transform_0, window_bounds = array<i64: 1024, 128>}, {pipeline_mode = #tpu.pipeline_mode<synchronous>, transform_indices = @transform_1, window_bounds = array<i64: 128, 32>}, {pipeline_mode = #tpu.pipeline_mode<synchronous>, transform_indices = @transform_2, window_bounds = array<i64: 1, 32>}, {transform_indices = @transform_3, window_bounds = array<i64: 256, 32>}]} {
    %c0 = arith.constant 0 : index
    %c0_0 = arith.constant 0 : index
    %0 = vector.load %arg1[%c0, %c0_0] : memref<1024x128xbf16, #tpu.memory_space<vmem>>, vector<1024x128xbf16>
    %c0_1 = arith.constant 0 : index
    %c0_2 = arith.constant 0 : index
    %1 = vector.load %arg2[%c0_1, %c0_2] : memref<128x32xbf16, #tpu.memory_space<vmem>>, vector<128x32xbf16>
    %cst = arith.constant dense<0.000000e+00> : vector<1024x32xf32>
    %2 = tpu.matmul %0, %1, %cst {dimension_numbers = #tpu.dot_dimension_numbers<[1], [0], [0], [1], [0, 0, 1, 1], [], []>} : vector<1024x128xbf16>, vector<128x32xbf16>, vector<1024x32xf32> -> vector<1024x32xf32>
    %c0_3 = arith.constant 0 : index
    %c0_4 = arith.constant 0 : index
    %3 = vector.load %arg3[%c0_3, %c0_4] : memref<1x32xf32, #tpu.memory_space<vmem>>, vector<1x32xf32>
    %4 = vector.broadcast %3 : vector<1x32xf32> to vector<1024x32xf32>
    %5 = arith.addf %2, %4 : vector<1024x32xf32>
    %c0_5 = arith.constant 0 : index
    %c0_6 = arith.constant 0 : index
    %6 = vector.load %arg5[%c0_5, %c0_6] : memref<1024x32xf32, #tpu.memory_space<vmem>>, vector<1024x32xf32>
    tpu.vector_store %arg5[%c0_5, %c0_6], %5 {strides = array<i32>} : memref<1024x32xf32, #tpu.memory_space<vmem>>, vector<1024x32xf32>,
    %c0_7 = arith.constant 0 : index
    %c0_8 = arith.constant 0 : index
    %7 = tpu.strided_load %arg5[%c0_7, %c0_8] {strides = array<i32: 2, 1>} : memref<1024x32xf32, #tpu.memory_space<vmem>>, vector<16x32xf32>
    %c1 = arith.constant 1 : index
    %c0_9 = arith.constant 0 : index
    %8 = tpu.strided_load %arg5[%c1, %c0_9] {strides = array<i32: 2, 1>} : memref<1024x32xf32, #tpu.memory_space<vmem>>, vector<16x32xf32>
    %c32 = arith.constant 32 : index
    %c0_10 = arith.constant 0 : index
    %9 = tpu.strided_load %arg5[%c32, %c0_10] {strides = array<i32: 2, 1>} : memref<1024x32xf32, #tpu.memory_space<vmem>>, vector<16x32xf32>
    %c33 = arith.constant 33 : index
    %c0_11 = arith.constant 0 : index
    %10 = tpu.strided_load %arg5[%c33, %c0_11] {strides = array<i32: 2, 1>} : memref<1024x32xf32, #tpu.memory_space<vmem>>, vector<16x32xf32>
    %11 = arith.maximumf %7, %8 : vector<16x32xf32>
    %12 = arith.maximumf %9, %10 : vector<16x32xf32>
    %13 = arith.maximumf %11, %12 : vector<16x32xf32>
    %cst_12 = arith.constant 0.000000e+00 : f32
    %14 = vector.broadcast %cst_12 : f32 to vector<16x32xf32>
    %15 = arith.maximumf %13, %14 : vector<16x32xf32>
    %16 = arith.truncf %15 : vector<16x32xf32> to vector<16x32xbf16>
    %c0_13 = arith.constant 0 : index
    %c0_14 = arith.constant 0 : index
    %17 = vector.load %arg4[%c0_13, %c0_14] : memref<256x32xbf16, #tpu.memory_space<vmem>>, vector<16x32xbf16>
    tpu.vector_store %arg4[%c0_13, %c0_14], %16 {strides = array<i32>} : memref<256x32xbf16, #tpu.memory_space<vmem>>, vector<16x32xbf16>,
    %c64 = arith.constant 64 : index
    %c0_15 = arith.constant 0 : index
    %18 = tpu.strided_load %arg5[%c64, %c0_15] {strides = array<i32: 2, 1>} : memref<1024x32xf32, #tpu.memory_space<vmem>>, vector<16x32xf32>
    %c65 = arith.constant 65 : index
    %c0_16 = arith.constant 0 : index
    %19 = tpu.strided_load %arg5[%c65, %c0_16] {strides = array<i32: 2, 1>} : memref<1024x32xf32, #tpu.memory_space<vmem>>, vector<16x32xf32>
    %c96 = arith.constant 96 : index
    %c0_17 = arith.constant 0 : index
    %20 = tpu.strided_load %arg5[%c96, %c0_17] {strides = array<i32: 2, 1>} : memref<1024x32xf32, #tpu.memory_space<vmem>>, vector<16x32xf32>
    %c97 = arith.constant 97 : index
    %c0_18 = arith.constant 0 : index
    %21 = tpu.strided_load %arg5[%c97, %c0_18] {strides = array<i32: 2, 1>} : memref<1024x32xf32, #tpu.memory_space<vmem>>, vector<16x32xf32>
    %22 = arith.maximumf %18, %19 : vector<16x32xf32>
    %23 = arith.maximumf %20, %21 : vector<16x32xf32>
    %24 = arith.maximumf %22, %23 : vector<16x32xf32>
    %cst_19 = arith.constant 0.000000e+00 : f32
    %25 = vector.broadcast %cst_19 : f32 to vector<16x32xf32>
    %26 = arith.maximumf %24, %25 : vector<16x32xf32>
    %27 = arith.truncf %26 : vector<16x32xf32> to vector<16x32xbf16>
    %c16 = arith.constant 16 : index
    %c0_20 = arith.constant 0 : index
    %28 = vector.load %arg4[%c16, %c0_20] : memref<256x32xbf16, #tpu.memory_space<vmem>>, vector<16x32xbf16>
    tpu.vector_store %arg4[%c16, %c0_20], %27 {strides = array<i32>} : memref<256x32xbf16, #tpu.memory_space<vmem>>, vector<16x32xbf16>,
    %c128 = arith.constant 128 : index
    %c0_21 = arith.constant 0 : index
    %29 = tpu.strided_load %arg5[%c128, %c0_21] {strides = array<i32: 2, 1>} : memref<1024x32xf32, #tpu.memory_space<vmem>>, vector<16x32xf32>
    %c129 = arith.constant 129 : index
    %c0_22 = arith.constant 0 : index
    %30 = tpu.strided_load %arg5[%c129, %c0_22] {strides = array<i32: 2, 1>} : memref<1024x32xf32, #tpu.memory_space<vmem>>, vector<16x32xf32>
    %c160 = arith.constant 160 : index
    %c0_23 = arith.constant 0 : index
    %31 = tpu.strided_load %arg5[%c160, %c0_23] {strides = array<i32: 2, 1>} : memref<1024x32xf32, #tpu.memory_space<vmem>>, vector<16x32xf32>
    %c161 = arith.constant 161 : index
    %c0_24 = arith.constant 0 : index
    %32 = tpu.strided_load %arg5[%c161, %c0_24] {strides = array<i32: 2, 1>} : memref<1024x32xf32, #tpu.memory_space<vmem>>, vector<16x32xf32>
    %33 = arith.maximumf %29, %30 : vector<16x32xf32>
    %34 = arith.maximumf %31, %32 : vector<16x32xf32>
    %35 = arith.maximumf %33, %34 : vector<16x32xf32>
    %cst_25 = arith.constant 0.000000e+00 : f32
    %36 = vector.broadcast %cst_25 : f32 to vector<16x32xf32>
    %37 = arith.maximumf %35, %36 : vector<16x32xf32>
    %38 = arith.truncf %37 : vector<16x32xf32> to vector<16x32xbf16>
    %c32_26 = arith.constant 32 : index
    %c0_27 = arith.constant 0 : index
    %39 = vector.load %arg4[%c32_26, %c0_27] : memref<256x32xbf16, #tpu.memory_space<vmem>>, vector<16x32xbf16>
    tpu.vector_store %arg4[%c32_26, %c0_27], %38 {strides = array<i32>} : memref<256x32xbf16, #tpu.memory_space<vmem>>, vector<16x32xbf16>,
    %c192 = arith.constant 192 : index
    %c0_28 = arith.constant 0 : index
    %40 = tpu.strided_load %arg5[%c192, %c0_28] {strides = array<i32: 2, 1>} : memref<1024x32xf32, #tpu.memory_space<vmem>>, vector<16x32xf32>
    %c193 = arith.constant 193 : index
    %c0_29 = arith.constant 0 : index
    %41 = tpu.strided_load %arg5[%c193, %c0_29] {strides = array<i32: 2, 1>} : memref<1024x32xf32, #tpu.memory_space<vmem>>, vector<16x32xf32>
    %c224 = arith.constant 224 : index
    %c0_30 = arith.constant 0 : index
    %42 = tpu.strided_load %arg5[%c224, %c0_30] {strides = array<i32: 2, 1>} : memref<1024x32xf32, #tpu.memory_space<vmem>>, vector<16x32xf32>
    %c225 = arith.constant 225 : index
    %c0_31 = arith.constant 0 : index
    %43 = tpu.strided_load %arg5[%c225, %c0_31] {strides = array<i32: 2, 1>} : memref<1024x32xf32, #tpu.memory_space<vmem>>, vector<16x32xf32>
    %44 = arith.maximumf %40, %41 : vector<16x32xf32>
    %45 = arith.maximumf %42, %43 : vector<16x32xf32>
    %46 = arith.maximumf %44, %45 : vector<16x32xf32>
    %cst_32 = arith.constant 0.000000e+00 : f32
    %47 = vector.broadcast %cst_32 : f32 to vector<16x32xf32>
    %48 = arith.maximumf %46, %47 : vector<16x32xf32>
    %49 = arith.truncf %48 : vector<16x32xf32> to vector<16x32xbf16>
    %c48 = arith.constant 48 : index
    %c0_33 = arith.constant 0 : index
    %50 = vector.load %arg4[%c48, %c0_33] : memref<256x32xbf16, #tpu.memory_space<vmem>>, vector<16x32xbf16>
    tpu.vector_store %arg4[%c48, %c0_33], %49 {strides = array<i32>} : memref<256x32xbf16, #tpu.memory_space<vmem>>, vector<16x32xbf16>,
    %c256 = arith.constant 256 : index
    %c0_34 = arith.constant 0 : index
    %51 = tpu.strided_load %arg5[%c256, %c0_34] {strides = array<i32: 2, 1>} : memref<1024x32xf32, #tpu.memory_space<vmem>>, vector<16x32xf32>
    %c257 = arith.constant 257 : index
    %c0_35 = arith.constant 0 : index
    %52 = tpu.strided_load %arg5[%c257, %c0_35] {strides = array<i32: 2, 1>} : memref<1024x32xf32, #tpu.memory_space<vmem>>, vector<16x32xf32>
    %c288 = arith.constant 288 : index
    %c0_36 = arith.constant 0 : index
    %53 = tpu.strided_load %arg5[%c288, %c0_36] {strides = array<i32: 2, 1>} : memref<1024x32xf32, #tpu.memory_space<vmem>>, vector<16x32xf32>
    %c289 = arith.constant 289 : index
    %c0_37 = arith.constant 0 : index
    %54 = tpu.strided_load %arg5[%c289, %c0_37] {strides = array<i32: 2, 1>} : memref<1024x32xf32, #tpu.memory_space<vmem>>, vector<16x32xf32>
    %55 = arith.maximumf %51, %52 : vector<16x32xf32>
    %56 = arith.maximumf %53, %54 : vector<16x32xf32>
    %57 = arith.maximumf %55, %56 : vector<16x32xf32>
    %cst_38 = arith.constant 0.000000e+00 : f32
    %58 = vector.broadcast %cst_38 : f32 to vector<16x32xf32>
    %59 = arith.maximumf %57, %58 : vector<16x32xf32>
    %60 = arith.truncf %59 : vector<16x32xf32> to vector<16x32xbf16>
    %c64_39 = arith.constant 64 : index
    %c0_40 = arith.constant 0 : index
    %61 = vector.load %arg4[%c64_39, %c0_40] : memref<256x32xbf16, #tpu.memory_space<vmem>>, vector<16x32xbf16>
    tpu.vector_store %arg4[%c64_39, %c0_40], %60 {strides = array<i32>} : memref<256x32xbf16, #tpu.memory_space<vmem>>, vector<16x32xbf16>,
    %c320 = arith.constant 320 : index
    %c0_41 = arith.constant 0 : index
    %62 = tpu.strided_load %arg5[%c320, %c0_41] {strides = array<i32: 2, 1>} : memref<1024x32xf32, #tpu.memory_space<vmem>>, vector<16x32xf32>
    %c321 = arith.constant 321 : index
    %c0_42 = arith.constant 0 : index
    %63 = tpu.strided_load %arg5[%c321, %c0_42] {strides = array<i32: 2, 1>} : memref<1024x32xf32, #tpu.memory_space<vmem>>, vector<16x32xf32>
    %c352 = arith.constant 352 : index
    %c0_43 = arith.constant 0 : index
    %64 = tpu.strided_load %arg5[%c352, %c0_43] {strides = array<i32: 2, 1>} : memref<1024x32xf32, #tpu.memory_space<vmem>>, vector<16x32xf32>
    %c353 = arith.constant 353 : index
    %c0_44 = arith.constant 0 : index
    %65 = tpu.strided_load %arg5[%c353, %c0_44] {strides = array<i32: 2, 1>} : memref<1024x32xf32, #tpu.memory_space<vmem>>, vector<16x32xf32>
    %66 = arith.maximumf %62, %63 : vector<16x32xf32>
    %67 = arith.maximumf %64, %65 : vector<16x32xf32>
    %68 = arith.maximumf %66, %67 : vector<16x32xf32>
    %cst_45 = arith.constant 0.000000e+00 : f32
    %69 = vector.broadcast %cst_45 : f32 to vector<16x32xf32>
    %70 = arith.maximumf %68, %69 : vector<16x32xf32>
    %71 = arith.truncf %70 : vector<16x32xf32> to vector<16x32xbf16>
    %c80 = arith.constant 80 : index
    %c0_46 = arith.constant 0 : index
    %72 = vector.load %arg4[%c80, %c0_46] : memref<256x32xbf16, #tpu.memory_space<vmem>>, vector<16x32xbf16>
    tpu.vector_store %arg4[%c80, %c0_46], %71 {strides = array<i32>} : memref<256x32xbf16, #tpu.memory_space<vmem>>, vector<16x32xbf16>,
    %c384 = arith.constant 384 : index
    %c0_47 = arith.constant 0 : index
    %73 = tpu.strided_load %arg5[%c384, %c0_47] {strides = array<i32: 2, 1>} : memref<1024x32xf32, #tpu.memory_space<vmem>>, vector<16x32xf32>
    %c385 = arith.constant 385 : index
    %c0_48 = arith.constant 0 : index
    %74 = tpu.strided_load %arg5[%c385, %c0_48] {strides = array<i32: 2, 1>} : memref<1024x32xf32, #tpu.memory_space<vmem>>, vector<16x32xf32>
    %c416 = arith.constant 416 : index
    %c0_49 = arith.constant 0 : index
    %75 = tpu.strided_load %arg5[%c416, %c0_49] {strides = array<i32: 2, 1>} : memref<1024x32xf32, #tpu.memory_space<vmem>>, vector<16x32xf32>
    %c417 = arith.constant 417 : index
    %c0_50 = arith.constant 0 : index
    %76 = tpu.strided_load %arg5[%c417, %c0_50] {strides = array<i32: 2, 1>} : memref<1024x32xf32, #tpu.memory_space<vmem>>, vector<16x32xf32>
    %77 = arith.maximumf %73, %74 : vector<16x32xf32>
    %78 = arith.maximumf %75, %76 : vector<16x32xf32>
    %79 = arith.maximumf %77, %78 : vector<16x32xf32>
    %cst_51 = arith.constant 0.000000e+00 : f32
    %80 = vector.broadcast %cst_51 : f32 to vector<16x32xf32>
    %81 = arith.maximumf %79, %80 : vector<16x32xf32>
    %82 = arith.truncf %81 : vector<16x32xf32> to vector<16x32xbf16>
    %c96_52 = arith.constant 96 : index
    %c0_53 = arith.constant 0 : index
    %83 = vector.load %arg4[%c96_52, %c0_53] : memref<256x32xbf16, #tpu.memory_space<vmem>>, vector<16x32xbf16>
    tpu.vector_store %arg4[%c96_52, %c0_53], %82 {strides = array<i32>} : memref<256x32xbf16, #tpu.memory_space<vmem>>, vector<16x32xbf16>,
    %c448 = arith.constant 448 : index
    %c0_54 = arith.constant 0 : index
    %84 = tpu.strided_load %arg5[%c448, %c0_54] {strides = array<i32: 2, 1>} : memref<1024x32xf32, #tpu.memory_space<vmem>>, vector<16x32xf32>
    %c449 = arith.constant 449 : index
    %c0_55 = arith.constant 0 : index
    %85 = tpu.strided_load %arg5[%c449, %c0_55] {strides = array<i32: 2, 1>} : memref<1024x32xf32, #tpu.memory_space<vmem>>, vector<16x32xf32>
    %c480 = arith.constant 480 : index
    %c0_56 = arith.constant 0 : index
    %86 = tpu.strided_load %arg5[%c480, %c0_56] {strides = array<i32: 2, 1>} : memref<1024x32xf32, #tpu.memory_space<vmem>>, vector<16x32xf32>
    %c481 = arith.constant 481 : index
    %c0_57 = arith.constant 0 : index
    %87 = tpu.strided_load %arg5[%c481, %c0_57] {strides = array<i32: 2, 1>} : memref<1024x32xf32, #tpu.memory_space<vmem>>, vector<16x32xf32>
    %88 = arith.maximumf %84, %85 : vector<16x32xf32>
    %89 = arith.maximumf %86, %87 : vector<16x32xf32>
    %90 = arith.maximumf %88, %89 : vector<16x32xf32>
    %cst_58 = arith.constant 0.000000e+00 : f32
    %91 = vector.broadcast %cst_58 : f32 to vector<16x32xf32>
    %92 = arith.maximumf %90, %91 : vector<16x32xf32>
    %93 = arith.truncf %92 : vector<16x32xf32> to vector<16x32xbf16>
    %c112 = arith.constant 112 : index
    %c0_59 = arith.constant 0 : index
    %94 = vector.load %arg4[%c112, %c0_59] : memref<256x32xbf16, #tpu.memory_space<vmem>>, vector<16x32xbf16>
    tpu.vector_store %arg4[%c112, %c0_59], %93 {strides = array<i32>} : memref<256x32xbf16, #tpu.memory_space<vmem>>, vector<16x32xbf16>,
    %c512 = arith.constant 512 : index
    %c0_60 = arith.constant 0 : index
    %95 = tpu.strided_load %arg5[%c512, %c0_60] {strides = array<i32: 2, 1>} : memref<1024x32xf32, #tpu.memory_space<vmem>>, vector<16x32xf32>
    %c513 = arith.constant 513 : index
    %c0_61 = arith.constant 0 : index
    %96 = tpu.strided_load %arg5[%c513, %c0_61] {strides = array<i32: 2, 1>} : memref<1024x32xf32, #tpu.memory_space<vmem>>, vector<16x32xf32>
    %c544 = arith.constant 544 : index
    %c0_62 = arith.constant 0 : index
    %97 = tpu.strided_load %arg5[%c544, %c0_62] {strides = array<i32: 2, 1>} : memref<1024x32xf32, #tpu.memory_space<vmem>>, vector<16x32xf32>
    %c545 = arith.constant 545 : index
    %c0_63 = arith.constant 0 : index
    %98 = tpu.strided_load %arg5[%c545, %c0_63] {strides = array<i32: 2, 1>} : memref<1024x32xf32, #tpu.memory_space<vmem>>, vector<16x32xf32>
    %99 = arith.maximumf %95, %96 : vector<16x32xf32>
    %100 = arith.maximumf %97, %98 : vector<16x32xf32>
    %101 = arith.maximumf %99, %100 : vector<16x32xf32>
    %cst_64 = arith.constant 0.000000e+00 : f32
    %102 = vector.broadcast %cst_64 : f32 to vector<16x32xf32>
    %103 = arith.maximumf %101, %102 : vector<16x32xf32>
    %104 = arith.truncf %103 : vector<16x32xf32> to vector<16x32xbf16>
    %c128_65 = arith.constant 128 : index
    %c0_66 = arith.constant 0 : index
    %105 = vector.load %arg4[%c128_65, %c0_66] : memref<256x32xbf16, #tpu.memory_space<vmem>>, vector<16x32xbf16>
    tpu.vector_store %arg4[%c128_65, %c0_66], %104 {strides = array<i32>} : memref<256x32xbf16, #tpu.memory_space<vmem>>, vector<16x32xbf16>,
    %c576 = arith.constant 576 : index
    %c0_67 = arith.constant 0 : index
    %106 = tpu.strided_load %arg5[%c576, %c0_67] {strides = array<i32: 2, 1>} : memref<1024x32xf32, #tpu.memory_space<vmem>>, vector<16x32xf32>
    %c577 = arith.constant 577 : index
    %c0_68 = arith.constant 0 : index
    %107 = tpu.strided_load %arg5[%c577, %c0_68] {strides = array<i32: 2, 1>} : memref<1024x32xf32, #tpu.memory_space<vmem>>, vector<16x32xf32>
    %c608 = arith.constant 608 : index
    %c0_69 = arith.constant 0 : index
    %108 = tpu.strided_load %arg5[%c608, %c0_69] {strides = array<i32: 2, 1>} : memref<1024x32xf32, #tpu.memory_space<vmem>>, vector<16x32xf32>
    %c609 = arith.constant 609 : index
    %c0_70 = arith.constant 0 : index
    %109 = tpu.strided_load %arg5[%c609, %c0_70] {strides = array<i32: 2, 1>} : memref<1024x32xf32, #tpu.memory_space<vmem>>, vector<16x32xf32>
    %110 = arith.maximumf %106, %107 : vector<16x32xf32>
    %111 = arith.maximumf %108, %109 : vector<16x32xf32>
    %112 = arith.maximumf %110, %111 : vector<16x32xf32>
    %cst_71 = arith.constant 0.000000e+00 : f32
    %113 = vector.broadcast %cst_71 : f32 to vector<16x32xf32>
    %114 = arith.maximumf %112, %113 : vector<16x32xf32>
    %115 = arith.truncf %114 : vector<16x32xf32> to vector<16x32xbf16>
    %c144 = arith.constant 144 : index
    %c0_72 = arith.constant 0 : index
    %116 = vector.load %arg4[%c144, %c0_72] : memref<256x32xbf16, #tpu.memory_space<vmem>>, vector<16x32xbf16>
    tpu.vector_store %arg4[%c144, %c0_72], %115 {strides = array<i32>} : memref<256x32xbf16, #tpu.memory_space<vmem>>, vector<16x32xbf16>,
    %c640 = arith.constant 640 : index
    %c0_73 = arith.constant 0 : index
    %117 = tpu.strided_load %arg5[%c640, %c0_73] {strides = array<i32: 2, 1>} : memref<1024x32xf32, #tpu.memory_space<vmem>>, vector<16x32xf32>
    %c641 = arith.constant 641 : index
    %c0_74 = arith.constant 0 : index
    %118 = tpu.strided_load %arg5[%c641, %c0_74] {strides = array<i32: 2, 1>} : memref<1024x32xf32, #tpu.memory_space<vmem>>, vector<16x32xf32>
    %c672 = arith.constant 672 : index
    %c0_75 = arith.constant 0 : index
    %119 = tpu.strided_load %arg5[%c672, %c0_75] {strides = array<i32: 2, 1>} : memref<1024x32xf32, #tpu.memory_space<vmem>>, vector<16x32xf32>
    %c673 = arith.constant 673 : index
    %c0_76 = arith.constant 0 : index
    %120 = tpu.strided_load %arg5[%c673, %c0_76] {strides = array<i32: 2, 1>} : memref<1024x32xf32, #tpu.memory_space<vmem>>, vector<16x32xf32>
    %121 = arith.maximumf %117, %118 : vector<16x32xf32>
    %122 = arith.maximumf %119, %120 : vector<16x32xf32>
    %123 = arith.maximumf %121, %122 : vector<16x32xf32>
    %cst_77 = arith.constant 0.000000e+00 : f32
    %124 = vector.broadcast %cst_77 : f32 to vector<16x32xf32>
    %125 = arith.maximumf %123, %124 : vector<16x32xf32>
    %126 = arith.truncf %125 : vector<16x32xf32> to vector<16x32xbf16>
    %c160_78 = arith.constant 160 : index
    %c0_79 = arith.constant 0 : index
    %127 = vector.load %arg4[%c160_78, %c0_79] : memref<256x32xbf16, #tpu.memory_space<vmem>>, vector<16x32xbf16>
    tpu.vector_store %arg4[%c160_78, %c0_79], %126 {strides = array<i32>} : memref<256x32xbf16, #tpu.memory_space<vmem>>, vector<16x32xbf16>,
    %c704 = arith.constant 704 : index
    %c0_80 = arith.constant 0 : index
    %128 = tpu.strided_load %arg5[%c704, %c0_80] {strides = array<i32: 2, 1>} : memref<1024x32xf32, #tpu.memory_space<vmem>>, vector<16x32xf32>
    %c705 = arith.constant 705 : index
    %c0_81 = arith.constant 0 : index
    %129 = tpu.strided_load %arg5[%c705, %c0_81] {strides = array<i32: 2, 1>} : memref<1024x32xf32, #tpu.memory_space<vmem>>, vector<16x32xf32>
    %c736 = arith.constant 736 : index
    %c0_82 = arith.constant 0 : index
    %130 = tpu.strided_load %arg5[%c736, %c0_82] {strides = array<i32: 2, 1>} : memref<1024x32xf32, #tpu.memory_space<vmem>>, vector<16x32xf32>
    %c737 = arith.constant 737 : index
    %c0_83 = arith.constant 0 : index
    %131 = tpu.strided_load %arg5[%c737, %c0_83] {strides = array<i32: 2, 1>} : memref<1024x32xf32, #tpu.memory_space<vmem>>, vector<16x32xf32>
    %132 = arith.maximumf %128, %129 : vector<16x32xf32>
    %133 = arith.maximumf %130, %131 : vector<16x32xf32>
    %134 = arith.maximumf %132, %133 : vector<16x32xf32>
    %cst_84 = arith.constant 0.000000e+00 : f32
    %135 = vector.broadcast %cst_84 : f32 to vector<16x32xf32>
    %136 = arith.maximumf %134, %135 : vector<16x32xf32>
    %137 = arith.truncf %136 : vector<16x32xf32> to vector<16x32xbf16>
    %c176 = arith.constant 176 : index
    %c0_85 = arith.constant 0 : index
    %138 = vector.load %arg4[%c176, %c0_85] : memref<256x32xbf16, #tpu.memory_space<vmem>>, vector<16x32xbf16>
    tpu.vector_store %arg4[%c176, %c0_85], %137 {strides = array<i32>} : memref<256x32xbf16, #tpu.memory_space<vmem>>, vector<16x32xbf16>,
    %c768 = arith.constant 768 : index
    %c0_86 = arith.constant 0 : index
    %139 = tpu.strided_load %arg5[%c768, %c0_86] {strides = array<i32: 2, 1>} : memref<1024x32xf32, #tpu.memory_space<vmem>>, vector<16x32xf32>
    %c769 = arith.constant 769 : index
    %c0_87 = arith.constant 0 : index
    %140 = tpu.strided_load %arg5[%c769, %c0_87] {strides = array<i32: 2, 1>} : memref<1024x32xf32, #tpu.memory_space<vmem>>, vector<16x32xf32>
    %c800 = arith.constant 800 : index
    %c0_88 = arith.constant 0 : index
    %141 = tpu.strided_load %arg5[%c800, %c0_88] {strides = array<i32: 2, 1>} : memref<1024x32xf32, #tpu.memory_space<vmem>>, vector<16x32xf32>
    %c801 = arith.constant 801 : index
    %c0_89 = arith.constant 0 : index
    %142 = tpu.strided_load %arg5[%c801, %c0_89] {strides = array<i32: 2, 1>} : memref<1024x32xf32, #tpu.memory_space<vmem>>, vector<16x32xf32>
    %143 = arith.maximumf %139, %140 : vector<16x32xf32>
    %144 = arith.maximumf %141, %142 : vector<16x32xf32>
    %145 = arith.maximumf %143, %144 : vector<16x32xf32>
    %cst_90 = arith.constant 0.000000e+00 : f32
    %146 = vector.broadcast %cst_90 : f32 to vector<16x32xf32>
    %147 = arith.maximumf %145, %146 : vector<16x32xf32>
    %148 = arith.truncf %147 : vector<16x32xf32> to vector<16x32xbf16>
    %c192_91 = arith.constant 192 : index
    %c0_92 = arith.constant 0 : index
    %149 = vector.load %arg4[%c192_91, %c0_92] : memref<256x32xbf16, #tpu.memory_space<vmem>>, vector<16x32xbf16>
    tpu.vector_store %arg4[%c192_91, %c0_92], %148 {strides = array<i32>} : memref<256x32xbf16, #tpu.memory_space<vmem>>, vector<16x32xbf16>,
    %c832 = arith.constant 832 : index
    %c0_93 = arith.constant 0 : index
    %150 = tpu.strided_load %arg5[%c832, %c0_93] {strides = array<i32: 2, 1>} : memref<1024x32xf32, #tpu.memory_space<vmem>>, vector<16x32xf32>
    %c833 = arith.constant 833 : index
    %c0_94 = arith.constant 0 : index
    %151 = tpu.strided_load %arg5[%c833, %c0_94] {strides = array<i32: 2, 1>} : memref<1024x32xf32, #tpu.memory_space<vmem>>, vector<16x32xf32>
    %c864 = arith.constant 864 : index
    %c0_95 = arith.constant 0 : index
    %152 = tpu.strided_load %arg5[%c864, %c0_95] {strides = array<i32: 2, 1>} : memref<1024x32xf32, #tpu.memory_space<vmem>>, vector<16x32xf32>
    %c865 = arith.constant 865 : index
    %c0_96 = arith.constant 0 : index
    %153 = tpu.strided_load %arg5[%c865, %c0_96] {strides = array<i32: 2, 1>} : memref<1024x32xf32, #tpu.memory_space<vmem>>, vector<16x32xf32>
    %154 = arith.maximumf %150, %151 : vector<16x32xf32>
    %155 = arith.maximumf %152, %153 : vector<16x32xf32>
    %156 = arith.maximumf %154, %155 : vector<16x32xf32>
    %cst_97 = arith.constant 0.000000e+00 : f32
    %157 = vector.broadcast %cst_97 : f32 to vector<16x32xf32>
    %158 = arith.maximumf %156, %157 : vector<16x32xf32>
    %159 = arith.truncf %158 : vector<16x32xf32> to vector<16x32xbf16>
    %c208 = arith.constant 208 : index
    %c0_98 = arith.constant 0 : index
    %160 = vector.load %arg4[%c208, %c0_98] : memref<256x32xbf16, #tpu.memory_space<vmem>>, vector<16x32xbf16>
    tpu.vector_store %arg4[%c208, %c0_98], %159 {strides = array<i32>} : memref<256x32xbf16, #tpu.memory_space<vmem>>, vector<16x32xbf16>,
    %c896 = arith.constant 896 : index
    %c0_99 = arith.constant 0 : index
    %161 = tpu.strided_load %arg5[%c896, %c0_99] {strides = array<i32: 2, 1>} : memref<1024x32xf32, #tpu.memory_space<vmem>>, vector<16x32xf32>
    %c897 = arith.constant 897 : index
    %c0_100 = arith.constant 0 : index
    %162 = tpu.strided_load %arg5[%c897, %c0_100] {strides = array<i32: 2, 1>} : memref<1024x32xf32, #tpu.memory_space<vmem>>, vector<16x32xf32>
    %c928 = arith.constant 928 : index
    %c0_101 = arith.constant 0 : index
    %163 = tpu.strided_load %arg5[%c928, %c0_101] {strides = array<i32: 2, 1>} : memref<1024x32xf32, #tpu.memory_space<vmem>>, vector<16x32xf32>
    %c929 = arith.constant 929 : index
    %c0_102 = arith.constant 0 : index
    %164 = tpu.strided_load %arg5[%c929, %c0_102] {strides = array<i32: 2, 1>} : memref<1024x32xf32, #tpu.memory_space<vmem>>, vector<16x32xf32>
    %165 = arith.maximumf %161, %162 : vector<16x32xf32>
    %166 = arith.maximumf %163, %164 : vector<16x32xf32>
    %167 = arith.maximumf %165, %166 : vector<16x32xf32>
    %cst_103 = arith.constant 0.000000e+00 : f32
    %168 = vector.broadcast %cst_103 : f32 to vector<16x32xf32>
    %169 = arith.maximumf %167, %168 : vector<16x32xf32>
    %170 = arith.truncf %169 : vector<16x32xf32> to vector<16x32xbf16>
    %c224_104 = arith.constant 224 : index
    %c0_105 = arith.constant 0 : index
    %171 = vector.load %arg4[%c224_104, %c0_105] : memref<256x32xbf16, #tpu.memory_space<vmem>>, vector<16x32xbf16>
    tpu.vector_store %arg4[%c224_104, %c0_105], %170 {strides = array<i32>} : memref<256x32xbf16, #tpu.memory_space<vmem>>, vector<16x32xbf16>,
    %c960 = arith.constant 960 : index
    %c0_106 = arith.constant 0 : index
    %172 = tpu.strided_load %arg5[%c960, %c0_106] {strides = array<i32: 2, 1>} : memref<1024x32xf32, #tpu.memory_space<vmem>>, vector<16x32xf32>
    %c961 = arith.constant 961 : index
    %c0_107 = arith.constant 0 : index
    %173 = tpu.strided_load %arg5[%c961, %c0_107] {strides = array<i32: 2, 1>} : memref<1024x32xf32, #tpu.memory_space<vmem>>, vector<16x32xf32>
    %c992 = arith.constant 992 : index
    %c0_108 = arith.constant 0 : index
    %174 = tpu.strided_load %arg5[%c992, %c0_108] {strides = array<i32: 2, 1>} : memref<1024x32xf32, #tpu.memory_space<vmem>>, vector<16x32xf32>
    %c993 = arith.constant 993 : index
    %c0_109 = arith.constant 0 : index
    %175 = tpu.strided_load %arg5[%c993, %c0_109] {strides = array<i32: 2, 1>} : memref<1024x32xf32, #tpu.memory_space<vmem>>, vector<16x32xf32>
    %176 = arith.maximumf %172, %173 : vector<16x32xf32>
    %177 = arith.maximumf %174, %175 : vector<16x32xf32>
    %178 = arith.maximumf %176, %177 : vector<16x32xf32>
    %cst_110 = arith.constant 0.000000e+00 : f32
    %179 = vector.broadcast %cst_110 : f32 to vector<16x32xf32>
    %180 = arith.maximumf %178, %179 : vector<16x32xf32>
    %181 = arith.truncf %180 : vector<16x32xf32> to vector<16x32xbf16>
    %c240 = arith.constant 240 : index
    %c0_111 = arith.constant 0 : index
    %182 = vector.load %arg4[%c240, %c0_111] : memref<256x32xbf16, #tpu.memory_space<vmem>>, vector<16x32xbf16>
    tpu.vector_store %arg4[%c240, %c0_111], %181 {strides = array<i32>} : memref<256x32xbf16, #tpu.memory_space<vmem>>, vector<16x32xbf16>,
    return
  }
  func.func @transform_0(%arg0: i32) -> (i32, i32) {
    %c0_i32 = arith.constant 0 : i32
    %c0_i32_0 = arith.constant 0 : i32
    return %arg0, %c0_i32 : i32, i32
  }
  func.func @transform_1(%arg0: i32) -> (i32, i32) {
    %c0_i32 = arith.constant 0 : i32
    %c0_i32_0 = arith.constant 0 : i32
    %c0_i32_1 = arith.constant 0 : i32
    return %c0_i32, %c0_i32_0 : i32, i32
  }
  func.func @transform_2(%arg0: i32) -> (i32, i32) {
    %c0_i32 = arith.constant 0 : i32
    %c0_i32_0 = arith.constant 0 : i32
    %c0_i32_1 = arith.constant 0 : i32
    return %c0_i32, %c0_i32_0 : i32, i32
  }
  func.func @transform_3(%arg0: i32) -> (i32, i32) {
    %c0_i32 = arith.constant 0 : i32
    %c0_i32_0 = arith.constant 0 : i32
    return %arg0, %c0_i32 : i32, i32
  }
}

module attributes {stable_mosaic.version = 11 : i64} {
  func.func @_conv_bias_pool_relu_kernel(%arg0: i32, %arg1: memref<256x384xbf16, #tpu.memory_space<vmem>>, %arg2: memref<384x64xbf16, #tpu.memory_space<vmem>>, %arg3: memref<1x64xf32, #tpu.memory_space<vmem>>, %arg4: memref<64x64xbf16, #tpu.memory_space<vmem>>, %arg5: memref<256x64xf32, #tpu.memory_space<vmem>>) attributes {dimension_semantics = [#tpu.dimension_semantics<parallel>], iteration_bounds = array<i64: 2>, scalar_prefetch = 0 : i64, scratch_operands = 1 : i64, tpu.core_type = #tpu.core_type<tc>, window_params = [{transform_indices = @transform_0, window_bounds = array<i64: 256, 384>}, {pipeline_mode = #tpu.pipeline_mode<synchronous>, transform_indices = @transform_1, window_bounds = array<i64: 384, 64>}, {pipeline_mode = #tpu.pipeline_mode<synchronous>, transform_indices = @transform_2, window_bounds = array<i64: 1, 64>}, {transform_indices = @transform_3, window_bounds = array<i64: 64, 64>}]} {
    %c0 = arith.constant 0 : index
    %c0_0 = arith.constant 0 : index
    %0 = vector.load %arg1[%c0, %c0_0] : memref<256x384xbf16, #tpu.memory_space<vmem>>, vector<256x384xbf16>
    %c0_1 = arith.constant 0 : index
    %c0_2 = arith.constant 0 : index
    %1 = vector.load %arg2[%c0_1, %c0_2] : memref<384x64xbf16, #tpu.memory_space<vmem>>, vector<384x64xbf16>
    %cst = arith.constant dense<0.000000e+00> : vector<256x64xf32>
    %2 = tpu.matmul %0, %1, %cst {dimension_numbers = #tpu.dot_dimension_numbers<[1], [0], [0], [1], [0, 0, 1, 1], [], []>} : vector<256x384xbf16>, vector<384x64xbf16>, vector<256x64xf32> -> vector<256x64xf32>
    %c0_3 = arith.constant 0 : index
    %c0_4 = arith.constant 0 : index
    %3 = vector.load %arg3[%c0_3, %c0_4] : memref<1x64xf32, #tpu.memory_space<vmem>>, vector<1x64xf32>
    %4 = vector.broadcast %3 : vector<1x64xf32> to vector<256x64xf32>
    %5 = arith.addf %2, %4 : vector<256x64xf32>
    %c0_5 = arith.constant 0 : index
    %c0_6 = arith.constant 0 : index
    %6 = vector.load %arg5[%c0_5, %c0_6] : memref<256x64xf32, #tpu.memory_space<vmem>>, vector<256x64xf32>
    tpu.vector_store %arg5[%c0_5, %c0_6], %5 {strides = array<i32>} : memref<256x64xf32, #tpu.memory_space<vmem>>, vector<256x64xf32>,
    %c0_7 = arith.constant 0 : index
    %c0_8 = arith.constant 0 : index
    %7 = tpu.strided_load %arg5[%c0_7, %c0_8] {strides = array<i32: 2, 1>} : memref<256x64xf32, #tpu.memory_space<vmem>>, vector<8x64xf32>
    %c1 = arith.constant 1 : index
    %c0_9 = arith.constant 0 : index
    %8 = tpu.strided_load %arg5[%c1, %c0_9] {strides = array<i32: 2, 1>} : memref<256x64xf32, #tpu.memory_space<vmem>>, vector<8x64xf32>
    %c16 = arith.constant 16 : index
    %c0_10 = arith.constant 0 : index
    %9 = tpu.strided_load %arg5[%c16, %c0_10] {strides = array<i32: 2, 1>} : memref<256x64xf32, #tpu.memory_space<vmem>>, vector<8x64xf32>
    %c17 = arith.constant 17 : index
    %c0_11 = arith.constant 0 : index
    %10 = tpu.strided_load %arg5[%c17, %c0_11] {strides = array<i32: 2, 1>} : memref<256x64xf32, #tpu.memory_space<vmem>>, vector<8x64xf32>
    %11 = arith.maximumf %7, %8 : vector<8x64xf32>
    %12 = arith.maximumf %9, %10 : vector<8x64xf32>
    %13 = arith.maximumf %11, %12 : vector<8x64xf32>
    %cst_12 = arith.constant 0.000000e+00 : f32
    %14 = vector.broadcast %cst_12 : f32 to vector<8x64xf32>
    %15 = arith.maximumf %13, %14 : vector<8x64xf32>
    %16 = arith.truncf %15 : vector<8x64xf32> to vector<8x64xbf16>
    %c0_13 = arith.constant 0 : index
    %c0_14 = arith.constant 0 : index
    %17 = vector.load %arg4[%c0_13, %c0_14] : memref<64x64xbf16, #tpu.memory_space<vmem>>, vector<8x64xbf16>
    tpu.vector_store %arg4[%c0_13, %c0_14], %16 {strides = array<i32>} : memref<64x64xbf16, #tpu.memory_space<vmem>>, vector<8x64xbf16>,
    %c32 = arith.constant 32 : index
    %c0_15 = arith.constant 0 : index
    %18 = tpu.strided_load %arg5[%c32, %c0_15] {strides = array<i32: 2, 1>} : memref<256x64xf32, #tpu.memory_space<vmem>>, vector<8x64xf32>
    %c33 = arith.constant 33 : index
    %c0_16 = arith.constant 0 : index
    %19 = tpu.strided_load %arg5[%c33, %c0_16] {strides = array<i32: 2, 1>} : memref<256x64xf32, #tpu.memory_space<vmem>>, vector<8x64xf32>
    %c48 = arith.constant 48 : index
    %c0_17 = arith.constant 0 : index
    %20 = tpu.strided_load %arg5[%c48, %c0_17] {strides = array<i32: 2, 1>} : memref<256x64xf32, #tpu.memory_space<vmem>>, vector<8x64xf32>
    %c49 = arith.constant 49 : index
    %c0_18 = arith.constant 0 : index
    %21 = tpu.strided_load %arg5[%c49, %c0_18] {strides = array<i32: 2, 1>} : memref<256x64xf32, #tpu.memory_space<vmem>>, vector<8x64xf32>
    %22 = arith.maximumf %18, %19 : vector<8x64xf32>
    %23 = arith.maximumf %20, %21 : vector<8x64xf32>
    %24 = arith.maximumf %22, %23 : vector<8x64xf32>
    %cst_19 = arith.constant 0.000000e+00 : f32
    %25 = vector.broadcast %cst_19 : f32 to vector<8x64xf32>
    %26 = arith.maximumf %24, %25 : vector<8x64xf32>
    %27 = arith.truncf %26 : vector<8x64xf32> to vector<8x64xbf16>
    %c8 = arith.constant 8 : index
    %c0_20 = arith.constant 0 : index
    %28 = vector.load %arg4[%c8, %c0_20] : memref<64x64xbf16, #tpu.memory_space<vmem>>, vector<8x64xbf16>
    tpu.vector_store %arg4[%c8, %c0_20], %27 {strides = array<i32>} : memref<64x64xbf16, #tpu.memory_space<vmem>>, vector<8x64xbf16>,
    %c64 = arith.constant 64 : index
    %c0_21 = arith.constant 0 : index
    %29 = tpu.strided_load %arg5[%c64, %c0_21] {strides = array<i32: 2, 1>} : memref<256x64xf32, #tpu.memory_space<vmem>>, vector<8x64xf32>
    %c65 = arith.constant 65 : index
    %c0_22 = arith.constant 0 : index
    %30 = tpu.strided_load %arg5[%c65, %c0_22] {strides = array<i32: 2, 1>} : memref<256x64xf32, #tpu.memory_space<vmem>>, vector<8x64xf32>
    %c80 = arith.constant 80 : index
    %c0_23 = arith.constant 0 : index
    %31 = tpu.strided_load %arg5[%c80, %c0_23] {strides = array<i32: 2, 1>} : memref<256x64xf32, #tpu.memory_space<vmem>>, vector<8x64xf32>
    %c81 = arith.constant 81 : index
    %c0_24 = arith.constant 0 : index
    %32 = tpu.strided_load %arg5[%c81, %c0_24] {strides = array<i32: 2, 1>} : memref<256x64xf32, #tpu.memory_space<vmem>>, vector<8x64xf32>
    %33 = arith.maximumf %29, %30 : vector<8x64xf32>
    %34 = arith.maximumf %31, %32 : vector<8x64xf32>
    %35 = arith.maximumf %33, %34 : vector<8x64xf32>
    %cst_25 = arith.constant 0.000000e+00 : f32
    %36 = vector.broadcast %cst_25 : f32 to vector<8x64xf32>
    %37 = arith.maximumf %35, %36 : vector<8x64xf32>
    %38 = arith.truncf %37 : vector<8x64xf32> to vector<8x64xbf16>
    %c16_26 = arith.constant 16 : index
    %c0_27 = arith.constant 0 : index
    %39 = vector.load %arg4[%c16_26, %c0_27] : memref<64x64xbf16, #tpu.memory_space<vmem>>, vector<8x64xbf16>
    tpu.vector_store %arg4[%c16_26, %c0_27], %38 {strides = array<i32>} : memref<64x64xbf16, #tpu.memory_space<vmem>>, vector<8x64xbf16>,
    %c96 = arith.constant 96 : index
    %c0_28 = arith.constant 0 : index
    %40 = tpu.strided_load %arg5[%c96, %c0_28] {strides = array<i32: 2, 1>} : memref<256x64xf32, #tpu.memory_space<vmem>>, vector<8x64xf32>
    %c97 = arith.constant 97 : index
    %c0_29 = arith.constant 0 : index
    %41 = tpu.strided_load %arg5[%c97, %c0_29] {strides = array<i32: 2, 1>} : memref<256x64xf32, #tpu.memory_space<vmem>>, vector<8x64xf32>
    %c112 = arith.constant 112 : index
    %c0_30 = arith.constant 0 : index
    %42 = tpu.strided_load %arg5[%c112, %c0_30] {strides = array<i32: 2, 1>} : memref<256x64xf32, #tpu.memory_space<vmem>>, vector<8x64xf32>
    %c113 = arith.constant 113 : index
    %c0_31 = arith.constant 0 : index
    %43 = tpu.strided_load %arg5[%c113, %c0_31] {strides = array<i32: 2, 1>} : memref<256x64xf32, #tpu.memory_space<vmem>>, vector<8x64xf32>
    %44 = arith.maximumf %40, %41 : vector<8x64xf32>
    %45 = arith.maximumf %42, %43 : vector<8x64xf32>
    %46 = arith.maximumf %44, %45 : vector<8x64xf32>
    %cst_32 = arith.constant 0.000000e+00 : f32
    %47 = vector.broadcast %cst_32 : f32 to vector<8x64xf32>
    %48 = arith.maximumf %46, %47 : vector<8x64xf32>
    %49 = arith.truncf %48 : vector<8x64xf32> to vector<8x64xbf16>
    %c24 = arith.constant 24 : index
    %c0_33 = arith.constant 0 : index
    %50 = vector.load %arg4[%c24, %c0_33] : memref<64x64xbf16, #tpu.memory_space<vmem>>, vector<8x64xbf16>
    tpu.vector_store %arg4[%c24, %c0_33], %49 {strides = array<i32>} : memref<64x64xbf16, #tpu.memory_space<vmem>>, vector<8x64xbf16>,
    %c128 = arith.constant 128 : index
    %c0_34 = arith.constant 0 : index
    %51 = tpu.strided_load %arg5[%c128, %c0_34] {strides = array<i32: 2, 1>} : memref<256x64xf32, #tpu.memory_space<vmem>>, vector<8x64xf32>
    %c129 = arith.constant 129 : index
    %c0_35 = arith.constant 0 : index
    %52 = tpu.strided_load %arg5[%c129, %c0_35] {strides = array<i32: 2, 1>} : memref<256x64xf32, #tpu.memory_space<vmem>>, vector<8x64xf32>
    %c144 = arith.constant 144 : index
    %c0_36 = arith.constant 0 : index
    %53 = tpu.strided_load %arg5[%c144, %c0_36] {strides = array<i32: 2, 1>} : memref<256x64xf32, #tpu.memory_space<vmem>>, vector<8x64xf32>
    %c145 = arith.constant 145 : index
    %c0_37 = arith.constant 0 : index
    %54 = tpu.strided_load %arg5[%c145, %c0_37] {strides = array<i32: 2, 1>} : memref<256x64xf32, #tpu.memory_space<vmem>>, vector<8x64xf32>
    %55 = arith.maximumf %51, %52 : vector<8x64xf32>
    %56 = arith.maximumf %53, %54 : vector<8x64xf32>
    %57 = arith.maximumf %55, %56 : vector<8x64xf32>
    %cst_38 = arith.constant 0.000000e+00 : f32
    %58 = vector.broadcast %cst_38 : f32 to vector<8x64xf32>
    %59 = arith.maximumf %57, %58 : vector<8x64xf32>
    %60 = arith.truncf %59 : vector<8x64xf32> to vector<8x64xbf16>
    %c32_39 = arith.constant 32 : index
    %c0_40 = arith.constant 0 : index
    %61 = vector.load %arg4[%c32_39, %c0_40] : memref<64x64xbf16, #tpu.memory_space<vmem>>, vector<8x64xbf16>
    tpu.vector_store %arg4[%c32_39, %c0_40], %60 {strides = array<i32>} : memref<64x64xbf16, #tpu.memory_space<vmem>>, vector<8x64xbf16>,
    %c160 = arith.constant 160 : index
    %c0_41 = arith.constant 0 : index
    %62 = tpu.strided_load %arg5[%c160, %c0_41] {strides = array<i32: 2, 1>} : memref<256x64xf32, #tpu.memory_space<vmem>>, vector<8x64xf32>
    %c161 = arith.constant 161 : index
    %c0_42 = arith.constant 0 : index
    %63 = tpu.strided_load %arg5[%c161, %c0_42] {strides = array<i32: 2, 1>} : memref<256x64xf32, #tpu.memory_space<vmem>>, vector<8x64xf32>
    %c176 = arith.constant 176 : index
    %c0_43 = arith.constant 0 : index
    %64 = tpu.strided_load %arg5[%c176, %c0_43] {strides = array<i32: 2, 1>} : memref<256x64xf32, #tpu.memory_space<vmem>>, vector<8x64xf32>
    %c177 = arith.constant 177 : index
    %c0_44 = arith.constant 0 : index
    %65 = tpu.strided_load %arg5[%c177, %c0_44] {strides = array<i32: 2, 1>} : memref<256x64xf32, #tpu.memory_space<vmem>>, vector<8x64xf32>
    %66 = arith.maximumf %62, %63 : vector<8x64xf32>
    %67 = arith.maximumf %64, %65 : vector<8x64xf32>
    %68 = arith.maximumf %66, %67 : vector<8x64xf32>
    %cst_45 = arith.constant 0.000000e+00 : f32
    %69 = vector.broadcast %cst_45 : f32 to vector<8x64xf32>
    %70 = arith.maximumf %68, %69 : vector<8x64xf32>
    %71 = arith.truncf %70 : vector<8x64xf32> to vector<8x64xbf16>
    %c40 = arith.constant 40 : index
    %c0_46 = arith.constant 0 : index
    %72 = vector.load %arg4[%c40, %c0_46] : memref<64x64xbf16, #tpu.memory_space<vmem>>, vector<8x64xbf16>
    tpu.vector_store %arg4[%c40, %c0_46], %71 {strides = array<i32>} : memref<64x64xbf16, #tpu.memory_space<vmem>>, vector<8x64xbf16>,
    %c192 = arith.constant 192 : index
    %c0_47 = arith.constant 0 : index
    %73 = tpu.strided_load %arg5[%c192, %c0_47] {strides = array<i32: 2, 1>} : memref<256x64xf32, #tpu.memory_space<vmem>>, vector<8x64xf32>
    %c193 = arith.constant 193 : index
    %c0_48 = arith.constant 0 : index
    %74 = tpu.strided_load %arg5[%c193, %c0_48] {strides = array<i32: 2, 1>} : memref<256x64xf32, #tpu.memory_space<vmem>>, vector<8x64xf32>
    %c208 = arith.constant 208 : index
    %c0_49 = arith.constant 0 : index
    %75 = tpu.strided_load %arg5[%c208, %c0_49] {strides = array<i32: 2, 1>} : memref<256x64xf32, #tpu.memory_space<vmem>>, vector<8x64xf32>
    %c209 = arith.constant 209 : index
    %c0_50 = arith.constant 0 : index
    %76 = tpu.strided_load %arg5[%c209, %c0_50] {strides = array<i32: 2, 1>} : memref<256x64xf32, #tpu.memory_space<vmem>>, vector<8x64xf32>
    %77 = arith.maximumf %73, %74 : vector<8x64xf32>
    %78 = arith.maximumf %75, %76 : vector<8x64xf32>
    %79 = arith.maximumf %77, %78 : vector<8x64xf32>
    %cst_51 = arith.constant 0.000000e+00 : f32
    %80 = vector.broadcast %cst_51 : f32 to vector<8x64xf32>
    %81 = arith.maximumf %79, %80 : vector<8x64xf32>
    %82 = arith.truncf %81 : vector<8x64xf32> to vector<8x64xbf16>
    %c48_52 = arith.constant 48 : index
    %c0_53 = arith.constant 0 : index
    %83 = vector.load %arg4[%c48_52, %c0_53] : memref<64x64xbf16, #tpu.memory_space<vmem>>, vector<8x64xbf16>
    tpu.vector_store %arg4[%c48_52, %c0_53], %82 {strides = array<i32>} : memref<64x64xbf16, #tpu.memory_space<vmem>>, vector<8x64xbf16>,
    %c224 = arith.constant 224 : index
    %c0_54 = arith.constant 0 : index
    %84 = tpu.strided_load %arg5[%c224, %c0_54] {strides = array<i32: 2, 1>} : memref<256x64xf32, #tpu.memory_space<vmem>>, vector<8x64xf32>
    %c225 = arith.constant 225 : index
    %c0_55 = arith.constant 0 : index
    %85 = tpu.strided_load %arg5[%c225, %c0_55] {strides = array<i32: 2, 1>} : memref<256x64xf32, #tpu.memory_space<vmem>>, vector<8x64xf32>
    %c240 = arith.constant 240 : index
    %c0_56 = arith.constant 0 : index
    %86 = tpu.strided_load %arg5[%c240, %c0_56] {strides = array<i32: 2, 1>} : memref<256x64xf32, #tpu.memory_space<vmem>>, vector<8x64xf32>
    %c241 = arith.constant 241 : index
    %c0_57 = arith.constant 0 : index
    %87 = tpu.strided_load %arg5[%c241, %c0_57] {strides = array<i32: 2, 1>} : memref<256x64xf32, #tpu.memory_space<vmem>>, vector<8x64xf32>
    %88 = arith.maximumf %84, %85 : vector<8x64xf32>
    %89 = arith.maximumf %86, %87 : vector<8x64xf32>
    %90 = arith.maximumf %88, %89 : vector<8x64xf32>
    %cst_58 = arith.constant 0.000000e+00 : f32
    %91 = vector.broadcast %cst_58 : f32 to vector<8x64xf32>
    %92 = arith.maximumf %90, %91 : vector<8x64xf32>
    %93 = arith.truncf %92 : vector<8x64xf32> to vector<8x64xbf16>
    %c56 = arith.constant 56 : index
    %c0_59 = arith.constant 0 : index
    %94 = vector.load %arg4[%c56, %c0_59] : memref<64x64xbf16, #tpu.memory_space<vmem>>, vector<8x64xbf16>
    tpu.vector_store %arg4[%c56, %c0_59], %93 {strides = array<i32>} : memref<64x64xbf16, #tpu.memory_space<vmem>>, vector<8x64xbf16>,
    return
  }
  func.func @transform_0(%arg0: i32) -> (i32, i32) {
    %c0_i32 = arith.constant 0 : i32
    %c0_i32_0 = arith.constant 0 : i32
    return %arg0, %c0_i32 : i32, i32
  }
  func.func @transform_1(%arg0: i32) -> (i32, i32) {
    %c0_i32 = arith.constant 0 : i32
    %c0_i32_0 = arith.constant 0 : i32
    %c0_i32_1 = arith.constant 0 : i32
    return %c0_i32, %c0_i32_0 : i32, i32
  }
  func.func @transform_2(%arg0: i32) -> (i32, i32) {
    %c0_i32 = arith.constant 0 : i32
    %c0_i32_0 = arith.constant 0 : i32
    %c0_i32_1 = arith.constant 0 : i32
    return %c0_i32, %c0_i32_0 : i32, i32
  }
  func.func @transform_3(%arg0: i32) -> (i32, i32) {
    %c0_i32 = arith.constant 0 : i32
    %c0_i32_0 = arith.constant 0 : i32
    return %arg0, %c0_i32 : i32, i32
  }
}

module attributes {stable_mosaic.version = 11 : i64} {
  func.func @_conv_bias_pool_relu_kernel(%arg0: i32, %arg1: memref<64x640xbf16, #tpu.memory_space<vmem>>, %arg2: memref<640x128xbf16, #tpu.memory_space<vmem>>, %arg3: memref<1x128xf32, #tpu.memory_space<vmem>>, %arg4: memref<16x128xbf16, #tpu.memory_space<vmem>>, %arg5: memref<64x128xf32, #tpu.memory_space<vmem>>) attributes {dimension_semantics = [#tpu.dimension_semantics<parallel>], iteration_bounds = array<i64: 2>, scalar_prefetch = 0 : i64, scratch_operands = 1 : i64, tpu.core_type = #tpu.core_type<tc>, window_params = [{transform_indices = @transform_0, window_bounds = array<i64: 64, 640>}, {pipeline_mode = #tpu.pipeline_mode<synchronous>, transform_indices = @transform_1, window_bounds = array<i64: 640, 128>}, {pipeline_mode = #tpu.pipeline_mode<synchronous>, transform_indices = @transform_2, window_bounds = array<i64: 1, 128>}, {transform_indices = @transform_3, window_bounds = array<i64: 16, 128>}]} {
    %c0 = arith.constant 0 : index
    %c0_0 = arith.constant 0 : index
    %0 = vector.load %arg1[%c0, %c0_0] : memref<64x640xbf16, #tpu.memory_space<vmem>>, vector<64x640xbf16>
    %c0_1 = arith.constant 0 : index
    %c0_2 = arith.constant 0 : index
    %1 = vector.load %arg2[%c0_1, %c0_2] : memref<640x128xbf16, #tpu.memory_space<vmem>>, vector<640x128xbf16>
    %cst = arith.constant dense<0.000000e+00> : vector<64x128xf32>
    %2 = tpu.matmul %0, %1, %cst {dimension_numbers = #tpu.dot_dimension_numbers<[1], [0], [0], [1], [0, 0, 1, 1], [], []>} : vector<64x640xbf16>, vector<640x128xbf16>, vector<64x128xf32> -> vector<64x128xf32>
    %c0_3 = arith.constant 0 : index
    %c0_4 = arith.constant 0 : index
    %3 = vector.load %arg3[%c0_3, %c0_4] : memref<1x128xf32, #tpu.memory_space<vmem>>, vector<1x128xf32>
    %4 = vector.broadcast %3 : vector<1x128xf32> to vector<64x128xf32>
    %5 = arith.addf %2, %4 : vector<64x128xf32>
    %c0_5 = arith.constant 0 : index
    %c0_6 = arith.constant 0 : index
    %6 = vector.load %arg5[%c0_5, %c0_6] : memref<64x128xf32, #tpu.memory_space<vmem>>, vector<64x128xf32>
    tpu.vector_store %arg5[%c0_5, %c0_6], %5 {strides = array<i32>} : memref<64x128xf32, #tpu.memory_space<vmem>>, vector<64x128xf32>,
    %c0_7 = arith.constant 0 : index
    %c0_8 = arith.constant 0 : index
    %7 = tpu.strided_load %arg5[%c0_7, %c0_8] {strides = array<i32: 2, 1>} : memref<64x128xf32, #tpu.memory_space<vmem>>, vector<4x128xf32>
    %c1 = arith.constant 1 : index
    %c0_9 = arith.constant 0 : index
    %8 = tpu.strided_load %arg5[%c1, %c0_9] {strides = array<i32: 2, 1>} : memref<64x128xf32, #tpu.memory_space<vmem>>, vector<4x128xf32>
    %c8 = arith.constant 8 : index
    %c0_10 = arith.constant 0 : index
    %9 = tpu.strided_load %arg5[%c8, %c0_10] {strides = array<i32: 2, 1>} : memref<64x128xf32, #tpu.memory_space<vmem>>, vector<4x128xf32>
    %c9 = arith.constant 9 : index
    %c0_11 = arith.constant 0 : index
    %10 = tpu.strided_load %arg5[%c9, %c0_11] {strides = array<i32: 2, 1>} : memref<64x128xf32, #tpu.memory_space<vmem>>, vector<4x128xf32>
    %11 = arith.maximumf %7, %8 : vector<4x128xf32>
    %12 = arith.maximumf %9, %10 : vector<4x128xf32>
    %13 = arith.maximumf %11, %12 : vector<4x128xf32>
    %cst_12 = arith.constant 0.000000e+00 : f32
    %14 = vector.broadcast %cst_12 : f32 to vector<4x128xf32>
    %15 = arith.maximumf %13, %14 : vector<4x128xf32>
    %16 = arith.truncf %15 : vector<4x128xf32> to vector<4x128xbf16>
    %c0_13 = arith.constant 0 : index
    %c0_14 = arith.constant 0 : index
    %17 = vector.load %arg4[%c0_13, %c0_14] : memref<16x128xbf16, #tpu.memory_space<vmem>>, vector<4x128xbf16>
    tpu.vector_store %arg4[%c0_13, %c0_14], %16 {strides = array<i32>} : memref<16x128xbf16, #tpu.memory_space<vmem>>, vector<4x128xbf16>,
    %c16 = arith.constant 16 : index
    %c0_15 = arith.constant 0 : index
    %18 = tpu.strided_load %arg5[%c16, %c0_15] {strides = array<i32: 2, 1>} : memref<64x128xf32, #tpu.memory_space<vmem>>, vector<4x128xf32>
    %c17 = arith.constant 17 : index
    %c0_16 = arith.constant 0 : index
    %19 = tpu.strided_load %arg5[%c17, %c0_16] {strides = array<i32: 2, 1>} : memref<64x128xf32, #tpu.memory_space<vmem>>, vector<4x128xf32>
    %c24 = arith.constant 24 : index
    %c0_17 = arith.constant 0 : index
    %20 = tpu.strided_load %arg5[%c24, %c0_17] {strides = array<i32: 2, 1>} : memref<64x128xf32, #tpu.memory_space<vmem>>, vector<4x128xf32>
    %c25 = arith.constant 25 : index
    %c0_18 = arith.constant 0 : index
    %21 = tpu.strided_load %arg5[%c25, %c0_18] {strides = array<i32: 2, 1>} : memref<64x128xf32, #tpu.memory_space<vmem>>, vector<4x128xf32>
    %22 = arith.maximumf %18, %19 : vector<4x128xf32>
    %23 = arith.maximumf %20, %21 : vector<4x128xf32>
    %24 = arith.maximumf %22, %23 : vector<4x128xf32>
    %cst_19 = arith.constant 0.000000e+00 : f32
    %25 = vector.broadcast %cst_19 : f32 to vector<4x128xf32>
    %26 = arith.maximumf %24, %25 : vector<4x128xf32>
    %27 = arith.truncf %26 : vector<4x128xf32> to vector<4x128xbf16>
    %c4 = arith.constant 4 : index
    %c0_20 = arith.constant 0 : index
    %28 = vector.load %arg4[%c4, %c0_20] : memref<16x128xbf16, #tpu.memory_space<vmem>>, vector<4x128xbf16>
    tpu.vector_store %arg4[%c4, %c0_20], %27 {strides = array<i32>} : memref<16x128xbf16, #tpu.memory_space<vmem>>, vector<4x128xbf16>,
    %c32 = arith.constant 32 : index
    %c0_21 = arith.constant 0 : index
    %29 = tpu.strided_load %arg5[%c32, %c0_21] {strides = array<i32: 2, 1>} : memref<64x128xf32, #tpu.memory_space<vmem>>, vector<4x128xf32>
    %c33 = arith.constant 33 : index
    %c0_22 = arith.constant 0 : index
    %30 = tpu.strided_load %arg5[%c33, %c0_22] {strides = array<i32: 2, 1>} : memref<64x128xf32, #tpu.memory_space<vmem>>, vector<4x128xf32>
    %c40 = arith.constant 40 : index
    %c0_23 = arith.constant 0 : index
    %31 = tpu.strided_load %arg5[%c40, %c0_23] {strides = array<i32: 2, 1>} : memref<64x128xf32, #tpu.memory_space<vmem>>, vector<4x128xf32>
    %c41 = arith.constant 41 : index
    %c0_24 = arith.constant 0 : index
    %32 = tpu.strided_load %arg5[%c41, %c0_24] {strides = array<i32: 2, 1>} : memref<64x128xf32, #tpu.memory_space<vmem>>, vector<4x128xf32>
    %33 = arith.maximumf %29, %30 : vector<4x128xf32>
    %34 = arith.maximumf %31, %32 : vector<4x128xf32>
    %35 = arith.maximumf %33, %34 : vector<4x128xf32>
    %cst_25 = arith.constant 0.000000e+00 : f32
    %36 = vector.broadcast %cst_25 : f32 to vector<4x128xf32>
    %37 = arith.maximumf %35, %36 : vector<4x128xf32>
    %38 = arith.truncf %37 : vector<4x128xf32> to vector<4x128xbf16>
    %c8_26 = arith.constant 8 : index
    %c0_27 = arith.constant 0 : index
    %39 = vector.load %arg4[%c8_26, %c0_27] : memref<16x128xbf16, #tpu.memory_space<vmem>>, vector<4x128xbf16>
    tpu.vector_store %arg4[%c8_26, %c0_27], %38 {strides = array<i32>} : memref<16x128xbf16, #tpu.memory_space<vmem>>, vector<4x128xbf16>,
    %c48 = arith.constant 48 : index
    %c0_28 = arith.constant 0 : index
    %40 = tpu.strided_load %arg5[%c48, %c0_28] {strides = array<i32: 2, 1>} : memref<64x128xf32, #tpu.memory_space<vmem>>, vector<4x128xf32>
    %c49 = arith.constant 49 : index
    %c0_29 = arith.constant 0 : index
    %41 = tpu.strided_load %arg5[%c49, %c0_29] {strides = array<i32: 2, 1>} : memref<64x128xf32, #tpu.memory_space<vmem>>, vector<4x128xf32>
    %c56 = arith.constant 56 : index
    %c0_30 = arith.constant 0 : index
    %42 = tpu.strided_load %arg5[%c56, %c0_30] {strides = array<i32: 2, 1>} : memref<64x128xf32, #tpu.memory_space<vmem>>, vector<4x128xf32>
    %c57 = arith.constant 57 : index
    %c0_31 = arith.constant 0 : index
    %43 = tpu.strided_load %arg5[%c57, %c0_31] {strides = array<i32: 2, 1>} : memref<64x128xf32, #tpu.memory_space<vmem>>, vector<4x128xf32>
    %44 = arith.maximumf %40, %41 : vector<4x128xf32>
    %45 = arith.maximumf %42, %43 : vector<4x128xf32>
    %46 = arith.maximumf %44, %45 : vector<4x128xf32>
    %cst_32 = arith.constant 0.000000e+00 : f32
    %47 = vector.broadcast %cst_32 : f32 to vector<4x128xf32>
    %48 = arith.maximumf %46, %47 : vector<4x128xf32>
    %49 = arith.truncf %48 : vector<4x128xf32> to vector<4x128xbf16>
    %c12 = arith.constant 12 : index
    %c0_33 = arith.constant 0 : index
    %50 = vector.load %arg4[%c12, %c0_33] : memref<16x128xbf16, #tpu.memory_space<vmem>>, vector<4x128xbf16>
    tpu.vector_store %arg4[%c12, %c0_33], %49 {strides = array<i32>} : memref<16x128xbf16, #tpu.memory_space<vmem>>, vector<4x128xbf16>,
    return
  }
  func.func @transform_0(%arg0: i32) -> (i32, i32) {
    %c0_i32 = arith.constant 0 : i32
    %c0_i32_0 = arith.constant 0 : i32
    return %arg0, %c0_i32 : i32, i32
  }
  func.func @transform_1(%arg0: i32) -> (i32, i32) {
    %c0_i32 = arith.constant 0 : i32
    %c0_i32_0 = arith.constant 0 : i32
    %c0_i32_1 = arith.constant 0 : i32
    return %c0_i32, %c0_i32_0 : i32, i32
  }
  func.func @transform_2(%arg0: i32) -> (i32, i32) {
    %c0_i32 = arith.constant 0 : i32
    %c0_i32_0 = arith.constant 0 : i32
    %c0_i32_1 = arith.constant 0 : i32
    return %c0_i32, %c0_i32_0 : i32, i32
  }
  func.func @transform_3(%arg0: i32) -> (i32, i32) {
    %c0_i32 = arith.constant 0 : i32
    %c0_i32_0 = arith.constant 0 : i32
    return %arg0, %c0_i32 : i32, i32
  }
}

module attributes {stable_mosaic.version = 11 : i64} {
  func.func @_fc_head_kernel(%arg0: i32, %arg1: memref<2x2048xbf16, #tpu.memory_space<vmem>>, %arg2: memref<2048x256xbf16, #tpu.memory_space<vmem>>, %arg3: memref<1x256xf32, #tpu.memory_space<vmem>>, %arg4: memref<256x128xbf16, #tpu.memory_space<vmem>>, %arg5: memref<1x128xf32, #tpu.memory_space<vmem>>, %arg6: memref<128x128xbf16, #tpu.memory_space<vmem>>, %arg7: memref<1x128xf32, #tpu.memory_space<vmem>>, %arg8: memref<2x128xf32, #tpu.memory_space<vmem>>) attributes {dimension_semantics = [#tpu.dimension_semantics<parallel>], iteration_bounds = array<i64: 1>, scalar_prefetch = 0 : i64, scratch_operands = 0 : i64, tpu.core_type = #tpu.core_type<tc>, window_params = [{transform_indices = @transform_0, window_bounds = array<i64: 2, 2048>}, {pipeline_mode = #tpu.pipeline_mode<synchronous>, transform_indices = @transform_1, window_bounds = array<i64: 2048, 256>}, {pipeline_mode = #tpu.pipeline_mode<synchronous>, transform_indices = @transform_2, window_bounds = array<i64: 1, 256>}, {pipeline_mode = #tpu.pipeline_mode<synchronous>, transform_indices = @transform_3, window_bounds = array<i64: 256, 128>}, {pipeline_mode = #tpu.pipeline_mode<synchronous>, transform_indices = @transform_4, window_bounds = array<i64: 1, 128>}, {pipeline_mode = #tpu.pipeline_mode<synchronous>, transform_indices = @transform_5, window_bounds = array<i64: 128, 128>}, {pipeline_mode = #tpu.pipeline_mode<synchronous>, transform_indices = @transform_6, window_bounds = array<i64: 1, 128>}, {transform_indices = @transform_7, window_bounds = array<i64: 2, 128>}]} {
    %c0 = arith.constant 0 : index
    %c0_0 = arith.constant 0 : index
    %0 = vector.load %arg1[%c0, %c0_0] : memref<2x2048xbf16, #tpu.memory_space<vmem>>, vector<2x2048xbf16>
    %c0_1 = arith.constant 0 : index
    %c0_2 = arith.constant 0 : index
    %1 = vector.load %arg2[%c0_1, %c0_2] : memref<2048x256xbf16, #tpu.memory_space<vmem>>, vector<2048x256xbf16>
    %cst = arith.constant dense<0.000000e+00> : vector<2x256xf32>
    %2 = tpu.matmul %0, %1, %cst {dimension_numbers = #tpu.dot_dimension_numbers<[1], [0], [0], [1], [0, 0, 1, 1], [], []>} : vector<2x2048xbf16>, vector<2048x256xbf16>, vector<2x256xf32> -> vector<2x256xf32>
    %c0_3 = arith.constant 0 : index
    %c0_4 = arith.constant 0 : index
    %3 = vector.load %arg3[%c0_3, %c0_4] : memref<1x256xf32, #tpu.memory_space<vmem>>, vector<1x256xf32>
    %4 = vector.broadcast %3 : vector<1x256xf32> to vector<2x256xf32>
    %5 = arith.addf %2, %4 : vector<2x256xf32>
    %cst_5 = arith.constant 0.000000e+00 : f32
    %6 = vector.broadcast %cst_5 : f32 to vector<2x256xf32>
    %7 = arith.maximumf %5, %6 : vector<2x256xf32>
    %8 = arith.truncf %7 : vector<2x256xf32> to vector<2x256xbf16>
    %c0_6 = arith.constant 0 : index
    %c0_7 = arith.constant 0 : index
    %9 = vector.load %arg4[%c0_6, %c0_7] : memref<256x128xbf16, #tpu.memory_space<vmem>>, vector<256x128xbf16>
    %cst_8 = arith.constant dense<0.000000e+00> : vector<2x128xf32>
    %10 = tpu.matmul %8, %9, %cst_8 {dimension_numbers = #tpu.dot_dimension_numbers<[1], [0], [0], [1], [0, 0, 1, 1], [], []>} : vector<2x256xbf16>, vector<256x128xbf16>, vector<2x128xf32> -> vector<2x128xf32>
    %c0_9 = arith.constant 0 : index
    %c0_10 = arith.constant 0 : index
    %11 = vector.load %arg5[%c0_9, %c0_10] : memref<1x128xf32, #tpu.memory_space<vmem>>, vector<1x128xf32>
    %12 = vector.broadcast %11 : vector<1x128xf32> to vector<2x128xf32>
    %13 = arith.addf %10, %12 : vector<2x128xf32>
    %cst_11 = arith.constant 0.000000e+00 : f32
    %14 = vector.broadcast %cst_11 : f32 to vector<2x128xf32>
    %15 = arith.maximumf %13, %14 : vector<2x128xf32>
    %16 = arith.truncf %15 : vector<2x128xf32> to vector<2x128xbf16>
    %c0_12 = arith.constant 0 : index
    %c0_13 = arith.constant 0 : index
    %17 = vector.load %arg6[%c0_12, %c0_13] : memref<128x128xbf16, #tpu.memory_space<vmem>>, vector<128x128xbf16>
    %cst_14 = arith.constant dense<0.000000e+00> : vector<2x128xf32>
    %18 = tpu.matmul %16, %17, %cst_14 {dimension_numbers = #tpu.dot_dimension_numbers<[1], [0], [0], [1], [0, 0, 1, 1], [], []>} : vector<2x128xbf16>, vector<128x128xbf16>, vector<2x128xf32> -> vector<2x128xf32>
    %c0_15 = arith.constant 0 : index
    %c0_16 = arith.constant 0 : index
    %19 = vector.load %arg7[%c0_15, %c0_16] : memref<1x128xf32, #tpu.memory_space<vmem>>, vector<1x128xf32>
    %20 = vector.broadcast %19 : vector<1x128xf32> to vector<2x128xf32>
    %21 = arith.addf %18, %20 : vector<2x128xf32>
    %c0_17 = arith.constant 0 : index
    %c0_18 = arith.constant 0 : index
    %22 = vector.load %arg8[%c0_17, %c0_18] : memref<2x128xf32, #tpu.memory_space<vmem>>, vector<2x128xf32>
    tpu.vector_store %arg8[%c0_17, %c0_18], %21 {strides = array<i32>} : memref<2x128xf32, #tpu.memory_space<vmem>>, vector<2x128xf32>,
    return
  }
  func.func @transform_0(%arg0: i32) -> (i32, i32) {
    %c0_i32 = arith.constant 0 : i32
    %c0_i32_0 = arith.constant 0 : i32
    return %arg0, %c0_i32 : i32, i32
  }
  func.func @transform_1(%arg0: i32) -> (i32, i32) {
    %c0_i32 = arith.constant 0 : i32
    %c0_i32_0 = arith.constant 0 : i32
    %c0_i32_1 = arith.constant 0 : i32
    return %c0_i32, %c0_i32_0 : i32, i32
  }
  func.func @transform_2(%arg0: i32) -> (i32, i32) {
    %c0_i32 = arith.constant 0 : i32
    %c0_i32_0 = arith.constant 0 : i32
    %c0_i32_1 = arith.constant 0 : i32
    return %c0_i32, %c0_i32_0 : i32, i32
  }
  func.func @transform_3(%arg0: i32) -> (i32, i32) {
    %c0_i32 = arith.constant 0 : i32
    %c0_i32_0 = arith.constant 0 : i32
    %c0_i32_1 = arith.constant 0 : i32
    return %c0_i32, %c0_i32_0 : i32, i32
  }
  func.func @transform_4(%arg0: i32) -> (i32, i32) {
    %c0_i32 = arith.constant 0 : i32
    %c0_i32_0 = arith.constant 0 : i32
    %c0_i32_1 = arith.constant 0 : i32
    return %c0_i32, %c0_i32_0 : i32, i32
  }
  func.func @transform_5(%arg0: i32) -> (i32, i32) {
    %c0_i32 = arith.constant 0 : i32
    %c0_i32_0 = arith.constant 0 : i32
    %c0_i32_1 = arith.constant 0 : i32
    return %c0_i32, %c0_i32_0 : i32, i32
  }
  func.func @transform_6(%arg0: i32) -> (i32, i32) {
    %c0_i32 = arith.constant 0 : i32
    %c0_i32_0 = arith.constant 0 : i32
    %c0_i32_1 = arith.constant 0 : i32
    return %c0_i32, %c0_i32_0 : i32, i32
  }
  func.func @transform_7(%arg0: i32) -> (i32, i32) {
    %c0_i32 = arith.constant 0 : i32
    %c0_i32_0 = arith.constant 0 : i32
    return %arg0, %c0_i32 : i32, i32
  }
}

</mosaic_0001>

<bundles_post_ra>
// kernel: simple_cnn_forward.4
= control target key start
LH: loop header
LB: loop body
LE: loop exit
PB: predicated region body
PF: predicated region fallthrough
CT: control target
= control target key end

     0   :  { %s2149_s12 = smov 0   ;;  %s2596_s0 = inlined_call_operand.vmem [shape: bf16[2048,128], index: 0, kind: input, shape index: {}]   ;;  %s2597_s1 = inlined_call_operand.vmem [shape: bf16[128,32], index: 1, kind: input, shape index: {}]   ;;  %s2598_s2 = inlined_call_operand.vmem [shape: f32[1,32], index: 2, kind: input, shape index: {}]   ;;  %s2599_s3 = inlined_call_operand.vmem [shape: bf16[512,32], index: 3, kind: output, shape index: {}]  }
   0x1 LB: > { %s1716_s13 = sadd.s32 4294967295, %s2127_s12   ;;  %p1720_p0 = scmp.ge.s32.totalorder %s2127_s12, 1  ;;  %s2127_s12 = sphi %s2149_s12, %s13_s12  }
   0x2   : > { %p138_p1 = scmp.lt.s32.totalorder %s2127_s12, 3 }
   0x4   : > { %p139_p2 = pnand %p1720_p0, %p138_p1 }
   0x5   : > { %s1721_s22 = sshll.u32 (!%p139_p2), %s1716_s13, 7  ;;  %s1723_s10 = sshll.u32 (!%p139_p2), %s1716_s13, 5 }
   0x6   : > { %142 = sbr.rel (%p139_p2) target bundleno = 446 (0x1be), region = 32  ;;  %p163_p3 = scmp.lt.s32.totalorder (!%p139_p2), %s1721_s22, 255 }
   0x7   : > { %p169_p4 = scmp.lt.s32.totalorder (!%p139_p2), %s1723_s10, 63 }
   0xb   : > { %v2086_v0 = vld [vmem:[%s2597_s1 + $0x38] sm:$0xff]  ;;  %v2085_v1 = vld [vmem:[%s2597_s1 + $0x30] sm:$0xff]  ;;  %v2084_v2 = vld [vmem:[%s2597_s1 + $0x28] sm:$0xff]  ;;  %s2601_s22 = smov (!%p163_p3, %s1721_s22), 255  ;;  %vm1083_vm0 = vcmask 261120   ;;  %s2603_s10 = smov (!%p169_p4, %s1723_s10), 63 }
   0xc   : > { %754 = vmatpush.bf16.msra.mxu0 %v2086_v0  ;;  %2087 = vmatpush.bf16.msra.mxu1 %v2086_v0  ;;  %v2083_v3 = vld [vmem:[%s2597_s1 + $0x20] sm:$0xff]  ;;  %v2082_v4 = vld [vmem:[%s2597_s1 + $0x18] sm:$0xff]  ;;  %v2081_v5 = vld [vmem:[%s2597_s1 + $0x10] sm:$0xff]  ;;  %s1722_s29 = sshll.u32 %s2601_s22, 2  ;;  %s1724_s11 = sshll.u32 %s2603_s10, 2  ;;  %vm1237_vm1 = vcmask 257024  }
   0xd   : > { %2088 = vmatpush.bf16.msra.mxu2 %v2086_v0  ;;  %2089 = vmatpush.bf16.msra.mxu3 %v2086_v0  ;;  %v2080_v6 = vld [vmem:[%s2597_s1 + $0x8] sm:$0xff]  ;;  %v2079_v7 = vld [vmem:[%s2597_s1] sm:$0xff]  ;;  %s2186_s7 = scalar_lea.vmem %s2596_s0, %s1722_s29  ;;  %s2304_s15 = scalar_lea.vmem %s2599_s3, %s1724_s11 }
   0xe   : > { %v2015_v8 = vld [vmem:[%s2186_s7] sm:$0xff]  ;;  %v2016_v12 = vld [vmem:[%s2186_s7 + $0x8] sm:$0xff]  ;;  %v2017_v16 = vld [vmem:[%s2186_s7 + $0x10] sm:$0xff] }
   0xf   : > { %v2031_v9 = vld [vmem:[%s2186_s7 + $0x80] sm:$0xff]  ;;  %v2032_v13 = vld [vmem:[%s2186_s7 + $0x88] sm:$0xff]  ;;  %v2033_v17 = vld [vmem:[%s2186_s7 + $0x90] sm:$0xff] }
  0x10   : > { %755 = vmatpush.bf16.msra.mxu0 %v2085_v1  ;;  %2090 = vmatpush.bf16.msra.mxu1 %v2085_v1  ;;  %v2047_v10 = vld [vmem:[%s2186_s7 + $0x100] sm:$0xff]  ;;  %v2048_v14 = vld [vmem:[%s2186_s7 + $0x108] sm:$0xff]  ;;  %v2049_v18 = vld [vmem:[%s2186_s7 + $0x110] sm:$0xff] }
  0x11   : > { %2091 = vmatpush.bf16.msra.mxu2 %v2085_v1  ;;  %2092 = vmatpush.bf16.msra.mxu3 %v2085_v1  ;;  %v2063_v11 = vld [vmem:[%s2186_s7 + $0x180] sm:$0xff]  ;;  %v2064_v15 = vld [vmem:[%s2186_s7 + $0x188] sm:$0xff]  ;;  %v2065_v19 = vld [vmem:[%s2186_s7 + $0x190] sm:$0xff] }
  0x12   : > { %v2018_v20 = vld [vmem:[%s2186_s7 + $0x18] sm:$0xff]  ;;  %v2019_v24 = vld [vmem:[%s2186_s7 + $0x20] sm:$0xff]  ;;  %v2020_v28 = vld [vmem:[%s2186_s7 + $0x28] sm:$0xff] }
  0x13   : > { %v2034_v21 = vld [vmem:[%s2186_s7 + $0x98] sm:$0xff]  ;;  %v2035_v25 = vld [vmem:[%s2186_s7 + $0xa0] sm:$0xff]  ;;  %v2036_v29 = vld [vmem:[%s2186_s7 + $0xa8] sm:$0xff] }
  0x14   : > { %756 = vmatpush.bf16.msra.mxu0 %v2084_v2  ;;  %2093 = vmatpush.bf16.msra.mxu1 %v2084_v2  ;;  %v2050_v22 = vld [vmem:[%s2186_s7 + $0x118] sm:$0xff]  ;;  %v2051_v26 = vld [vmem:[%s2186_s7 + $0x120] sm:$0xff]  ;;  %v2052_v30 = vld [vmem:[%s2186_s7 + $0x128] sm:$0xff] }
  0x15   : > { %2094 = vmatpush.bf16.msra.mxu2 %v2084_v2  ;;  %2095 = vmatpush.bf16.msra.mxu3 %v2084_v2  ;;  %v2066_v23 = vld [vmem:[%s2186_s7 + $0x198] sm:$0xff]  ;;  %v2067_v27 = vld [vmem:[%s2186_s7 + $0x1a0] sm:$0xff]  ;;  %v2068_v31 = vld [vmem:[%s2186_s7 + $0x1a8] sm:$0xff] }
  0x16   : > { %v2021_v32 = vld [vmem:[%s2186_s7 + $0x30] sm:$0xff]  ;;  %v2022_v36 = vld [vmem:[%s2186_s7 + $0x38] sm:$0xff]  ;;  %v2223_v40 = vld [vmem:[%s2598_s2] ss:$0 sm:$0xff] }
  0x17   : > { %v2037_v33 = vld [vmem:[%s2186_s7 + $0xb0] sm:$0xff]  ;;  %v2038_v37 = vld [vmem:[%s2186_s7 + $0xb8] sm:$0xff]  ;;  %v2023_v41 = vld [vmem:[%s2186_s7 + $0x40] sm:$0xff] }
  0x18   : > { %757 = vmatpush.bf16.msra.mxu0 %v2083_v3  ;;  %2096 = vmatpush.bf16.msra.mxu1 %v2083_v3  ;;  %v2053_v34 = vld [vmem:[%s2186_s7 + $0x130] sm:$0xff]  ;;  %v2054_v38 = vld [vmem:[%s2186_s7 + $0x138] sm:$0xff]  ;;  %v2039_v42 = vld [vmem:[%s2186_s7 + $0xc0] sm:$0xff] }
  0x19   : > { %2097 = vmatpush.bf16.msra.mxu2 %v2083_v3  ;;  %2098 = vmatpush.bf16.msra.mxu3 %v2083_v3  ;;  %v2069_v35 = vld [vmem:[%s2186_s7 + $0x1b0] sm:$0xff]  ;;  %v2070_v39 = vld [vmem:[%s2186_s7 + $0x1b8] sm:$0xff]  ;;  %v2055_v45 = vld [vmem:[%s2186_s7 + $0x140] sm:$0xff] }
  0x1a   : > { %v2071_v46 = vld [vmem:[%s2186_s7 + $0x1c0] sm:$0xff]  ;;  %v2024_v59 = vld [vmem:[%s2186_s7 + $0x48] sm:$0xff] }
  0x1b   : > { %v2040_v60 = vld [vmem:[%s2186_s7 + $0xc8] sm:$0xff] }
  0x1c   : > { %758 = vmatpush.bf16.msra.mxu0 %v2082_v4  ;;  %2099 = vmatpush.bf16.msra.mxu1 %v2082_v4  ;;  %v2056_v1 = vld [vmem:[%s2186_s7 + $0x148] sm:$0xff] }
  0x1d   : > { %2100 = vmatpush.bf16.msra.mxu2 %v2082_v4  ;;  %2101 = vmatpush.bf16.msra.mxu3 %v2082_v4  ;;  %v2072_v2 = vld [vmem:[%s2186_s7 + $0x1c8] sm:$0xff] }
  0x20   : > { %759 = vmatpush.bf16.msra.mxu0 %v2081_v5  ;;  %2102 = vmatpush.bf16.msra.mxu1 %v2081_v5 }
  0x21   : > { %2103 = vmatpush.bf16.msra.mxu2 %v2081_v5  ;;  %2104 = vmatpush.bf16.msra.mxu3 %v2081_v5 }
  0x24   : > { %760 = vmatpush.bf16.msra.mxu0 %v2080_v6  ;;  %2105 = vmatpush.bf16.msra.mxu1 %v2080_v6 }
  0x25   : > { %2106 = vmatpush.bf16.msra.mxu2 %v2080_v6  ;;  %2107 = vmatpush.bf16.msra.mxu3 %v2080_v6 }
  0x28   : > { %761 = vmatpush.bf16.msra.mxu0 %v2079_v7  ;;  %2108 = vmatpush.bf16.msra.mxu1 %v2079_v7 }
  0x29   : > { %2109 = vmatpush.bf16.msra.mxu2 %v2079_v7  ;;  %2110 = vmatpush.bf16.msra.mxu3 %v2079_v7 }
  0x2b   : > { %762 = vmatmul.bf16.vlgmr.msra.gmra.mxu0 %v2015_v8  ;;  %842 = vmatmul.bf16.vlgmr.msra.gmra.mxu1 %v2031_v9 }
  0x2c   : > { %922 = vmatmul.bf16.vlgmr.msra.gmra.mxu2 %v2047_v10  ;;  %1002 = vmatmul.bf16.vlgmr.msra.gmra.mxu3 %v2063_v11 }
  0x3b   : > { %767 = vmatmul.bf16.gmra.mxu0 %v2016_v12  ;;  %847 = vmatmul.bf16.gmra.mxu1 %v2032_v13 }
  0x3c   : > { %927 = vmatmul.bf16.gmra.mxu2 %v2048_v14  ;;  %1007 = vmatmul.bf16.gmra.mxu3 %v2064_v15  ;;  %v2025_v15 = vld [vmem:[%s2186_s7 + $0x50] sm:$0xff] }
  0x4b   : > { %772 = vmatmul.bf16.gmra.mxu0 %v2017_v16  ;;  %852 = vmatmul.bf16.gmra.mxu1 %v2033_v17  ;;  %v2041_v16 = vld [vmem:[%s2186_s7 + $0xd0] sm:$0xff] }
  0x4c   : > { %932 = vmatmul.bf16.gmra.mxu2 %v2049_v18  ;;  %1012 = vmatmul.bf16.gmra.mxu3 %v2065_v19 }
  0x5b   : > { %777 = vmatmul.bf16.gmra.mxu0 %v2018_v20  ;;  %857 = vmatmul.bf16.gmra.mxu1 %v2034_v21  ;;  %v2057_v21 = vld [vmem:[%s2186_s7 + $0x150] sm:$0xff] }
  0x5c   : > { %937 = vmatmul.bf16.gmra.mxu2 %v2050_v22  ;;  %1017 = vmatmul.bf16.gmra.mxu3 %v2066_v23  ;;  %v2073_v22 = vld [vmem:[%s2186_s7 + $0x1d0] sm:$0xff] }
  0x6b   : > { %782 = vmatmul.bf16.gmra.mxu0 %v2019_v24  ;;  %862 = vmatmul.bf16.gmra.mxu1 %v2035_v25 }
  0x6c   : > { %942 = vmatmul.bf16.gmra.mxu2 %v2051_v26  ;;  %1022 = vmatmul.bf16.gmra.mxu3 %v2067_v27 }
  0x7b   : > { %787 = vmatmul.bf16.gmra.mxu0 %v2020_v28  ;;  %867 = vmatmul.bf16.gmra.mxu1 %v2036_v29 }
  0x7c   : > { %947 = vmatmul.bf16.gmra.mxu2 %v2052_v30  ;;  %1027 = vmatmul.bf16.gmra.mxu3 %v2068_v31 }
  0x8b   : > { %792 = vmatmul.bf16.gmra.mxu0 %v2021_v32  ;;  %872 = vmatmul.bf16.gmra.mxu1 %v2037_v33 }
  0x8c   : > { %952 = vmatmul.bf16.gmra.mxu2 %v2053_v34  ;;  %1032 = vmatmul.bf16.gmra.mxu3 %v2069_v35  ;;  %v2026_v35 = vld [vmem:[%s2186_s7 + $0x58] sm:$0xff] }
  0x9b   : > { %797 = vmatmul.bf16.gmra.mxu0 %v2022_v36  ;;  %877 = vmatmul.bf16.gmra.mxu1 %v2038_v37  ;;  %v2042_v36 = vld [vmem:[%s2186_s7 + $0xd8] sm:$0xff] }
  0x9c   : > { %957 = vmatmul.bf16.gmra.mxu2 %v2054_v38  ;;  %1037 = vmatmul.bf16.gmra.mxu3 %v2070_v39 }
  0xa8   : > { %v763_v43 = vpop.f32.mrf.mxu0  ;;  %v843_v44 = vpop.f32.mrf.mxu1 }
  0xa9   : > { %v764_v47 = vadd.f32 %v2223_v40, %v763_v43  ;;  %v844_v48 = vadd.f32 %v2223_v40, %v843_v44  ;;  %v2074_v43 = vld [vmem:[%s2186_s7 + $0x1d8] sm:$0xff] }
  0xab   : > { %1084 = vst.msk [vmem:[#allocation2] sm:$0xff] %vm1083_vm0, %v764_v47  ;;  %802 = vmatmul.bf16.gmra.mxu0 %v2023_v41  ;;  %882 = vmatmul.bf16.gmra.mxu1 %v2039_v42  ;;  %v2058_v42 = vld [vmem:[%s2186_s7 + $0x158] sm:$0xff] }
  0xac   : > { %1116 = vst.msk [vmem:[#allocation2 + $0x100] sm:$0xff] %vm1083_vm0, %v844_v48  ;;  %962 = vmatmul.bf16.gmra.mxu2 %v2055_v45  ;;  %1042 = vmatmul.bf16.gmra.mxu3 %v2071_v46 }
  0xaf   : > { %v923_v49 = vpop.f32.mrf.mxu2  ;;  %v1003_v50 = vpop.f32.mrf.mxu3 }
  0xb0   : > { %v924_v51 = vadd.f32 %v2223_v40, %v923_v49  ;;  %v1004_v52 = vadd.f32 %v2223_v40, %v1003_v50  ;;  %v765_v53 = vpop.f32.mrf.mxu0  ;;  %v845_v54 = vpop.f32.mrf.mxu1 }
  0xb1   : > { %v766_v55 = vadd.f32 %v2223_v40, %v765_v53  ;;  %v846_v56 = vadd.f32 %v2223_v40, %v845_v54 }
  0xb2   : > { %1148 = vst.msk [vmem:[#allocation2 + $0x200] sm:$0xff] %vm1083_vm0, %v924_v51 }
  0xb3   : > { %1180 = vst.msk [vmem:[#allocation2 + $0x300] sm:$0xff] %vm1083_vm0, %v1004_v52 }
  0xb4   : > { %1085 = vst.msk [vmem:[#allocation2 + $0x8] sm:$0xff] %vm1083_vm0, %v766_v55 }
  0xb5   : > { %1117 = vst.msk [vmem:[#allocation2 + $0x108] sm:$0xff] %vm1083_vm0, %v846_v56 }
  0xb7   : > { %v925_v57 = vpop.f32.mrf.mxu2  ;;  %v1005_v58 = vpop.f32.mrf.mxu3 }
  0xb8   : > { %v926_v61 = vadd.f32 %v2223_v40, %v925_v57  ;;  %v1006_v62 = vadd.f32 %v2223_v40, %v1005_v58  ;;  %v768_v63 = vpop.f32.mrf.mxu0  ;;  %v848_v0 = vpop.f32.mrf.mxu1 }
  0xb9   : > { %v769_v3 = vadd.f32 %v2223_v40, %v768_v63  ;;  %v849_v4 = vadd.f32 %v2223_v40, %v848_v0 }
  0xba   : > { %1149 = vst.msk [vmem:[#allocation2 + $0x208] sm:$0xff] %vm1083_vm0, %v926_v61 }
  0xbb   : > { %1181 = vst.msk [vmem:[#allocation2 + $0x308] sm:$0xff] %vm1083_vm0, %v1006_v62  ;;  %807 = vmatmul.bf16.gmra.mxu0 %v2024_v59  ;;  %887 = vmatmul.bf16.gmra.mxu1 %v2040_v60  ;;  %v1212_v44 = vld [vmem:[#allocation2] ss:$2 sm:$0xff]  ;;  %v1216_v45 = vld [vmem:[#allocation2 + $0x1] ss:$2 sm:$0xff] }
  0xbc   : > { %1086 = vst.msk [vmem:[#allocation2 + $0x10] sm:$0xff] %vm1083_vm0, %v769_v3  ;;  %967 = vmatmul.bf16.gmra.mxu2 %v2056_v1  ;;  %1047 = vmatmul.bf16.gmra.mxu3 %v2072_v2  ;;  %v1325_v48 = vld [vmem:[#allocation2 + $0x100] ss:$2 sm:$0xff]  ;;  %v1329_v49 = vld [vmem:[#allocation2 + $0x101] ss:$2 sm:$0xff]  ;;  %v1227_v52 = vmax.f32 %v1212_v44, %v1216_v45 }
  0xbd   : > { %1118 = vst.msk [vmem:[#allocation2 + $0x110] sm:$0xff] %vm1083_vm0, %v849_v4  ;;  %v1340_v56 = vmax.f32 %v1325_v48, %v1329_v49 }
  0xbf   : > { %v928_v5 = vpop.f32.mrf.mxu2  ;;  %v1008_v6 = vpop.f32.mrf.mxu3 }
  0xc0   : > { %v929_v7 = vadd.f32 %v2223_v40, %v928_v5  ;;  %v1009_v8 = vadd.f32 %v2223_v40, %v1008_v6  ;;  %v770_v9 = vpop.f32.mrf.mxu0  ;;  %v850_v10 = vpop.f32.mrf.mxu1 }
  0xc1   : > { %v771_v11 = vadd.f32 %v2223_v40, %v770_v9  ;;  %v851_v12 = vadd.f32 %v2223_v40, %v850_v10  ;;  %v1437_v59 = vld [vmem:[#allocation2 + $0x200] ss:$2 sm:$0xff]  ;;  %v1441_v60 = vld [vmem:[#allocation2 + $0x201] ss:$2 sm:$0xff] }
  0xc2   : > { %1150 = vst.msk [vmem:[#allocation2 + $0x210] sm:$0xff] %vm1083_vm0, %v929_v7  ;;  %v1549_v0 = vld [vmem:[#allocation2 + $0x300] ss:$2 sm:$0xff]  ;;  %v1553_v1 = vld [vmem:[#allocation2 + $0x301] ss:$2 sm:$0xff]  ;;  %v1452_v10 = vmax.f32 %v1437_v59, %v1441_v60 }
  0xc3   : > { %1182 = vst.msk [vmem:[#allocation2 + $0x310] sm:$0xff] %vm1083_vm0, %v1009_v8 }
  0xc4   : > { %1087 = vst.msk [vmem:[#allocation2 + $0x18] sm:$0xff] %vm1083_vm0, %v771_v11 }
  0xc5   : > { %1119 = vst.msk [vmem:[#allocation2 + $0x118] sm:$0xff] %vm1083_vm0, %v851_v12 }
  0xc7   : > { %v930_v13 = vpop.f32.mrf.mxu2  ;;  %v1010_v14 = vpop.f32.mrf.mxu3 }
  0xc8   : > { %v931_v17 = vadd.f32 %v2223_v40, %v930_v13  ;;  %v1011_v18 = vadd.f32 %v2223_v40, %v1010_v14  ;;  %v773_v19 = vpop.f32.mrf.mxu0  ;;  %v853_v20 = vpop.f32.mrf.mxu1 }
  0xc9   : > { %v774_v23 = vadd.f32 %v2223_v40, %v773_v19  ;;  %v854_v24 = vadd.f32 %v2223_v40, %v853_v20 }
  0xca   : > { %1151 = vst.msk [vmem:[#allocation2 + $0x218] sm:$0xff] %vm1083_vm0, %v931_v17 }
  0xcb   : > { %1183 = vst.msk [vmem:[#allocation2 + $0x318] sm:$0xff] %vm1083_vm0, %v1011_v18  ;;  %812 = vmatmul.bf16.gmra.mxu0 %v2025_v15  ;;  %892 = vmatmul.bf16.gmra.mxu1 %v2041_v16  ;;  %v1564_v16 = vmax.f32 %v1549_v0, %v1553_v1 }
  0xcc   : > { %1088 = vst.msk [vmem:[#allocation2 + $0x20] sm:$0xff] %vm1083_vm0, %v774_v23  ;;  %972 = vmatmul.bf16.gmra.mxu2 %v2057_v21  ;;  %1052 = vmatmul.bf16.gmra.mxu3 %v2073_v22 }
  0xcd   : > { %1120 = vst.msk [vmem:[#allocation2 + $0x120] sm:$0xff] %vm1083_vm0, %v854_v24 }
  0xcf   : > { %v933_v25 = vpop.f32.mrf.mxu2  ;;  %v1013_v26 = vpop.f32.mrf.mxu3 }
  0xd0   : > { %v934_v27 = vadd.f32 %v2223_v40, %v933_v25  ;;  %v1014_v28 = vadd.f32 %v2223_v40, %v1013_v26  ;;  %v775_v29 = vpop.f32.mrf.mxu0  ;;  %v855_v30 = vpop.f32.mrf.mxu1  ;;  %v2027_v26 = vld [vmem:[%s2186_s7 + $0x60] sm:$0xff] }
  0xd1   : > { %v776_v31 = vadd.f32 %v2223_v40, %v775_v29  ;;  %v856_v32 = vadd.f32 %v2223_v40, %v855_v30  ;;  %v1443_v59 = vld [vmem:[#allocation2 + $0x211] ss:$2 sm:$0xff] }
  0xd2   : > { %1152 = vst.msk [vmem:[#allocation2 + $0x220] sm:$0xff] %vm1083_vm0, %v934_v27  ;;  %v2043_v27 = vld [vmem:[%s2186_s7 + $0xe0] sm:$0xff]  ;;  %v1555_v0 = vld [vmem:[#allocation2 + $0x311] ss:$2 sm:$0xff] }
  0xd3   : > { %1184 = vst.msk [vmem:[#allocation2 + $0x320] sm:$0xff] %vm1083_vm0, %v1014_v28 }
  0xd4   : > { %1089 = vst.msk [vmem:[#allocation2 + $0x28] sm:$0xff] %vm1083_vm0, %v776_v31 }
  0xd5   : > { %1121 = vst.msk [vmem:[#allocation2 + $0x128] sm:$0xff] %vm1083_vm0, %v856_v32  ;;  %v2059_v32 = vld [vmem:[%s2186_s7 + $0x160] sm:$0xff] }
  0xd7   : > { %v935_v33 = vpop.f32.mrf.mxu2  ;;  %v1015_v34 = vpop.f32.mrf.mxu3 }
  0xd8   : > { %v936_v37 = vadd.f32 %v2223_v40, %v935_v33  ;;  %v1016_v38 = vadd.f32 %v2223_v40, %v1015_v34  ;;  %v778_v39 = vpop.f32.mrf.mxu0  ;;  %v858_v41 = vpop.f32.mrf.mxu1  ;;  %v2075_v33 = vld [vmem:[%s2186_s7 + $0x1e0] sm:$0xff] }
  0xd9   : > { %v779_v46 = vadd.f32 %v2223_v40, %v778_v39  ;;  %v859_v47 = vadd.f32 %v2223_v40, %v858_v41  ;;  %v1327_v41 = vld [vmem:[#allocation2 + $0x110] ss:$2 sm:$0xff] }
  0xda   : > { %1153 = vst.msk [vmem:[#allocation2 + $0x228] sm:$0xff] %vm1083_vm0, %v936_v37  ;;  %v1214_v37 = vld [vmem:[#allocation2 + $0x10] ss:$2 sm:$0xff] }
  0xdb   : > { %v1220_v50 = vld [vmem:[#allocation2 + $0x20] ss:$2 sm:$0xff]  ;;  %v1224_v51 = vld [vmem:[#allocation2 + $0x21] ss:$2 sm:$0xff]  ;;  %1185 = vst.msk [vmem:[#allocation2 + $0x328] sm:$0xff] %vm1083_vm0, %v1016_v38  ;;  %817 = vmatmul.bf16.gmra.mxu0 %v2026_v35  ;;  %897 = vmatmul.bf16.gmra.mxu1 %v2042_v36 }
  0xdc   : > { %v1229_v53 = vmax.f32 %v1220_v50, %v1224_v51  ;;  %v1333_v54 = vld [vmem:[#allocation2 + $0x120] ss:$2 sm:$0xff]  ;;  %v1337_v55 = vld [vmem:[#allocation2 + $0x121] ss:$2 sm:$0xff]  ;;  %1090 = vst.msk [vmem:[#allocation2 + $0x30] sm:$0xff] %vm1083_vm0, %v779_v46  ;;  %977 = vmatmul.bf16.gmra.mxu2 %v2058_v42  ;;  %1057 = vmatmul.bf16.gmra.mxu3 %v2074_v43 }
  0xdd   : > { %v1342_v57 = vmax.f32 %v1333_v54, %v1337_v55  ;;  %1122 = vst.msk [vmem:[#allocation2 + $0x130] sm:$0xff] %vm1083_vm0, %v859_v47  ;;  %v1218_v38 = vld [vmem:[#allocation2 + $0x11] ss:$2 sm:$0xff] }
  0xde   : > { %v1231_v58 = vmax.f32 %v1227_v52, %v1229_v53  ;;  %v1331_v42 = vld [vmem:[#allocation2 + $0x111] ss:$2 sm:$0xff]  ;;  %v1228_v45 = vmax.f32 %v1214_v37, %v1218_v38 }
  0xdf   : > { %v1344_v61 = vmax.f32 %v1340_v56, %v1342_v57  ;;  %v938_v62 = vpop.f32.mrf.mxu2  ;;  %v1018_v63 = vpop.f32.mrf.mxu3  ;;  %v1341_v49 = vmax.f32 %v1327_v41, %v1331_v42  ;;  %v2029_v42 = vld [vmem:[%s2186_s7 + $0x70] sm:$0xff] }
  0xe0   : > { %v1233_v2 = vmax.f32 %v1231_v58, 0.0  ;;  %v939_v3 = vadd.f32 %v2223_v40, %v938_v62  ;;  %v1019_v4 = vadd.f32 %v2223_v40, %v1018_v63  ;;  %v780_v5 = vpop.f32.mrf.mxu0  ;;  %v860_v6 = vpop.f32.mrf.mxu1  ;;  %v1439_v58 = vld [vmem:[#allocation2 + $0x210] ss:$2 sm:$0xff] }
  0xe1   : > { %v1346_v7 = vmax.f32 %v1344_v61, 0.0  ;;  %v1445_v8 = vld [vmem:[#allocation2 + $0x220] ss:$2 sm:$0xff]  ;;  %v1449_v9 = vld [vmem:[#allocation2 + $0x221] ss:$2 sm:$0xff]  ;;  %v781_v15 = vadd.f32 %v2223_v40, %v780_v5  ;;  %v861_v19 = vadd.f32 %v2223_v40, %v860_v6  ;;  %v1453_v5 = vmax.f32 %v1439_v58, %v1443_v59 }
  0xe2   : > { %v1235_v11 = vpack.c.bf16 %v1233_v2, %v1233_v2  ;;  %v1454_v12 = vmax.f32 %v1445_v8, %v1449_v9  ;;  %v1557_v13 = vld [vmem:[#allocation2 + $0x320] ss:$2 sm:$0xff]  ;;  %v1561_v14 = vld [vmem:[#allocation2 + $0x321] ss:$2 sm:$0xff]  ;;  %1154 = vst.msk [vmem:[#allocation2 + $0x230] sm:$0xff] %vm1083_vm0, %v939_v3 }
  0xe3   : > { %v1348_v17 = vpack.c.bf16 %v1346_v7, %v1346_v7  ;;  %v1566_v18 = vmax.f32 %v1557_v13, %v1561_v14  ;;  %1186 = vst.msk [vmem:[#allocation2 + $0x330] sm:$0xff] %vm1083_vm0, %v1019_v4  ;;  %v1551_v63 = vld [vmem:[#allocation2 + $0x310] ss:$2 sm:$0xff] }
  0xe4   : > { %1238 = vst.msk [vmem:[%s2304_s15] sm:$0xf] %vm1237_vm1, %v1235_v11  ;;  %v1456_v20 = vmax.f32 %v1452_v10, %v1454_v12  ;;  %v1565_v10 = vmax.f32 %v1551_v63, %v1555_v0  ;;  %v2046_v63 = vld [vmem:[%s2186_s7 + $0xf8] sm:$0xff] }
  0xe5   : > { %1350 = vst.msk [vmem:[%s2304_s15 + $0x20] sm:$0xf] %vm1237_vm1, %v1348_v17  ;;  %v1568_v21 = vmax.f32 %v1564_v16, %v1566_v18  ;;  %v2028_v17 = vld [vmem:[%s2186_s7 + $0x68] sm:$0xff] }
  0xe6   : > { %v1458_v22 = vmax.f32 %v1456_v20, 0.0  ;;  %1091 = vst.msk [vmem:[#allocation2 + $0x38] sm:$0xff] %vm1083_vm0, %v781_v15  ;;  %v2044_v18 = vld [vmem:[%s2186_s7 + $0xe8] sm:$0xff] }
  0xe7   : > { %v1570_v23 = vmax.f32 %v1568_v21, 0.0  ;;  %1123 = vst.msk [vmem:[#allocation2 + $0x138] sm:$0xff] %vm1083_vm0, %v861_v19  ;;  %v940_v24 = vpop.f32.mrf.mxu2  ;;  %v1020_v25 = vpop.f32.mrf.mxu3 }
  0xe8   : > { %v1460_v28 = vpack.c.bf16 %v1458_v22, %v1458_v22  ;;  %v941_v29 = vadd.f32 %v2223_v40, %v940_v24  ;;  %v783_v30 = vpop.f32.mrf.mxu0  ;;  %v863_v31 = vpop.f32.mrf.mxu1  ;;  %v1021_v35 = vadd.f32 %v2223_v40, %v1020_v25  ;;  %v2060_v24 = vld [vmem:[%s2186_s7 + $0x168] sm:$0xff] }
  0xe9   : > { %v1572_v34 = vpack.c.bf16 %v1570_v23, %v1570_v23  ;;  %v784_v36 = vadd.f32 %v2223_v40, %v783_v30  ;;  %v864_v39 = vadd.f32 %v2223_v40, %v863_v31  ;;  %v2076_v25 = vld [vmem:[%s2186_s7 + $0x1e8] sm:$0xff] }
  0xea   : > { %1462 = vst.msk [vmem:[%s2304_s15 + $0x40] sm:$0xf] %vm1237_vm1, %v1460_v28 }
  0xeb   : > { %1574 = vst.msk [vmem:[%s2304_s15 + $0x60] sm:$0xf] %vm1237_vm1, %v1572_v34  ;;  %822 = vmatmul.bf16.gmra.mxu0 %v2027_v26  ;;  %902 = vmatmul.bf16.gmra.mxu1 %v2043_v27 }
  0xec   : > { %1155 = vst.msk [vmem:[#allocation2 + $0x238] sm:$0xff] %vm1083_vm0, %v941_v29  ;;  %982 = vmatmul.bf16.gmra.mxu2 %v2059_v32  ;;  %1062 = vmatmul.bf16.gmra.mxu3 %v2075_v33 }
  0xed   : > { %v1222_v43 = vld [vmem:[#allocation2 + $0x30] ss:$2 sm:$0xff]  ;;  %v1226_v44 = vld [vmem:[#allocation2 + $0x31] ss:$2 sm:$0xff]  ;;  %1187 = vst.msk [vmem:[#allocation2 + $0x338] sm:$0xff] %vm1083_vm0, %v1021_v35 }
  0xee   : > { %v1230_v46 = vmax.f32 %v1222_v43, %v1226_v44  ;;  %v1335_v47 = vld [vmem:[#allocation2 + $0x130] ss:$2 sm:$0xff]  ;;  %v1339_v48 = vld [vmem:[#allocation2 + $0x131] ss:$2 sm:$0xff]  ;;  %1092 = vst.msk [vmem:[#allocation2 + $0x40] sm:$0xff] %vm1083_vm0, %v784_v36 }
  0xef   : > { %v1343_v50 = vmax.f32 %v1335_v47, %v1339_v48  ;;  %1124 = vst.msk [vmem:[#allocation2 + $0x140] sm:$0xff] %vm1083_vm0, %v864_v39  ;;  %v943_v51 = vpop.f32.mrf.mxu2  ;;  %v1023_v52 = vpop.f32.mrf.mxu3  ;;  %v2045_v43 = vld [vmem:[%s2186_s7 + $0xf0] sm:$0xff] }
  0xf0   : > { %v1232_v53 = vmax.f32 %v1228_v45, %v1230_v46  ;;  %v944_v54 = vadd.f32 %v2223_v40, %v943_v51  ;;  %v1024_v55 = vadd.f32 %v2223_v40, %v1023_v52  ;;  %v785_v56 = vpop.f32.mrf.mxu0  ;;  %v865_v57 = vpop.f32.mrf.mxu1  ;;  %v2061_v48 = vld [vmem:[%s2186_s7 + $0x170] sm:$0xff] }
  0xf1   : > { %v1345_v60 = vmax.f32 %v1341_v49, %v1343_v50  ;;  %v786_v61 = vadd.f32 %v2223_v40, %v785_v56  ;;  %v866_v62 = vadd.f32 %v2223_v40, %v865_v57  ;;  %v2077_v49 = vld [vmem:[%s2186_s7 + $0x1f0] sm:$0xff] }
  0xf2   : > { %v1234_v1 = vmax.f32 %v1232_v53, 0.0  ;;  %1156 = vst.msk [vmem:[#allocation2 + $0x240] sm:$0xff] %vm1083_vm0, %v944_v54 }
  0xf3   : > { %v1347_v2 = vmax.f32 %v1345_v60, 0.0  ;;  %v1447_v3 = vld [vmem:[#allocation2 + $0x230] ss:$2 sm:$0xff]  ;;  %v1451_v4 = vld [vmem:[#allocation2 + $0x231] ss:$2 sm:$0xff]  ;;  %1188 = vst.msk [vmem:[#allocation2 + $0x340] sm:$0xff] %vm1083_vm0, %v1024_v55 }
  0xf4   : > { %v1236_v6 = vpack.c.bf16 %v1234_v1, %v1234_v1  ;;  %v1455_v7 = vmax.f32 %v1447_v3, %v1451_v4  ;;  %v1559_v8 = vld [vmem:[#allocation2 + $0x330] ss:$2 sm:$0xff]  ;;  %v1563_v9 = vld [vmem:[#allocation2 + $0x331] ss:$2 sm:$0xff]  ;;  %1093 = vst.msk [vmem:[#allocation2 + $0x48] sm:$0xff] %vm1083_vm0, %v786_v61 }
  0xf5   : > { %v1349_v11 = vpack.c.bf16 %v1347_v2, %v1347_v2  ;;  %v1567_v12 = vmax.f32 %v1559_v8, %v1563_v9  ;;  %1125 = vst.msk [vmem:[#allocation2 + $0x148] sm:$0xff] %vm1083_vm0, %v866_v62  ;;  %v2030_v62 = vld [vmem:[%s2186_s7 + $0x78] sm:$0xff] }
  0xf6   : > { %1239 = vst.msk [vmem:[%s2304_s15 + $0x4] sm:$0xf] %vm1237_vm1, %v1236_v6  ;;  %v1457_v13 = vmax.f32 %v1453_v5, %v1455_v7  ;;  %v2062_v4 = vld [vmem:[%s2186_s7 + $0x178] sm:$0xff] }
  0xf7   : > { %1351 = vst.msk [vmem:[%s2304_s15 + $0x24] sm:$0xf] %vm1237_vm1, %v1349_v11  ;;  %v1569_v14 = vmax.f32 %v1565_v10, %v1567_v12  ;;  %v945_v15 = vpop.f32.mrf.mxu2  ;;  %v1025_v16 = vpop.f32.mrf.mxu3  ;;  %v2078_v5 = vld [vmem:[%s2186_s7 + $0x1f8] sm:$0xff] }
  0xf8   : > { %v1459_v19 = vmax.f32 %v1457_v13, 0.0  ;;  %v946_v20 = vadd.f32 %v2223_v40, %v945_v15  ;;  %v1026_v21 = vadd.f32 %v2223_v40, %v1025_v16  ;;  %v788_v22 = vpop.f32.mrf.mxu0  ;;  %v868_v23 = vpop.f32.mrf.mxu1 }
  0xf9   : > { %v1571_v26 = vmax.f32 %v1569_v14, 0.0  ;;  %v789_v28 = vadd.f32 %v2223_v40, %v788_v22  ;;  %v869_v30 = vadd.f32 %v2223_v40, %v868_v23 }
  0xfa   : > { %v1461_v27 = vpack.c.bf16 %v1459_v19, %v1459_v19  ;;  %1157 = vst.msk [vmem:[#allocation2 + $0x248] sm:$0xff] %vm1083_vm0, %v946_v20 }
  0xfb   : > { %v1573_v29 = vpack.c.bf16 %v1571_v26, %v1571_v26  ;;  %1189 = vst.msk [vmem:[#allocation2 + $0x348] sm:$0xff] %vm1083_vm0, %v1026_v21  ;;  %827 = vmatmul.bf16.gmra.mxu0 %v2028_v17  ;;  %907 = vmatmul.bf16.gmra.mxu1 %v2044_v18  ;;  %v1241_v6 = vld [vmem:[#allocation2 + $0x40] ss:$2 sm:$0xff]  ;;  %v1245_v7 = vld [vmem:[#allocation2 + $0x41] ss:$2 sm:$0xff] }
  0xfc   : > { %1463 = vst.msk [vmem:[%s2304_s15 + $0x44] sm:$0xf] %vm1237_vm1, %v1461_v27  ;;  %987 = vmatmul.bf16.gmra.mxu2 %v2060_v24  ;;  %1067 = vmatmul.bf16.gmra.mxu3 %v2076_v25  ;;  %v1353_v10 = vld [vmem:[#allocation2 + $0x140] ss:$2 sm:$0xff]  ;;  %v1357_v11 = vld [vmem:[#allocation2 + $0x141] ss:$2 sm:$0xff]  ;;  %v1256_v14 = vmax.f32 %v1241_v6, %v1245_v7 }
  0xfd   : > { %1575 = vst.msk [vmem:[%s2304_s15 + $0x64] sm:$0xf] %vm1237_vm1, %v1573_v29  ;;  %v1368_v18 = vmax.f32 %v1353_v10, %v1357_v11 }
  0xfe   : > { %1094 = vst.msk [vmem:[#allocation2 + $0x50] sm:$0xff] %vm1083_vm0, %v789_v28 }
  0xff   : > { %1126 = vst.msk [vmem:[#allocation2 + $0x150] sm:$0xff] %vm1083_vm0, %v869_v30  ;;  %v948_v31 = vpop.f32.mrf.mxu2  ;;  %v1028_v32 = vpop.f32.mrf.mxu3 }
 0x100   : > { %v949_v33 = vadd.f32 %v2223_v40, %v948_v31  ;;  %v1029_v34 = vadd.f32 %v2223_v40, %v1028_v32  ;;  %v790_v35 = vpop.f32.mrf.mxu0  ;;  %v870_v36 = vpop.f32.mrf.mxu1 }
 0x101   : > { %v791_v37 = vadd.f32 %v2223_v40, %v790_v35  ;;  %v871_v38 = vadd.f32 %v2223_v40, %v870_v36  ;;  %v1465_v21 = vld [vmem:[#allocation2 + $0x240] ss:$2 sm:$0xff]  ;;  %v1469_v22 = vld [vmem:[#allocation2 + $0x241] ss:$2 sm:$0xff] }
 0x102   : > { %1158 = vst.msk [vmem:[#allocation2 + $0x250] sm:$0xff] %vm1083_vm0, %v949_v33  ;;  %v1577_v26 = vld [vmem:[#allocation2 + $0x340] ss:$2 sm:$0xff]  ;;  %v1581_v27 = vld [vmem:[#allocation2 + $0x341] ss:$2 sm:$0xff]  ;;  %v1480_v36 = vmax.f32 %v1465_v21, %v1469_v22 }
 0x103   : > { %1190 = vst.msk [vmem:[#allocation2 + $0x350] sm:$0xff] %vm1083_vm0, %v1029_v34 }
 0x104   : > { %1095 = vst.msk [vmem:[#allocation2 + $0x58] sm:$0xff] %vm1083_vm0, %v791_v37 }
 0x105   : > { %1127 = vst.msk [vmem:[#allocation2 + $0x158] sm:$0xff] %vm1083_vm0, %v871_v38 }
 0x107   : > { %v950_v39 = vpop.f32.mrf.mxu2  ;;  %v1030_v41 = vpop.f32.mrf.mxu3 }
 0x108   : > { %v951_v44 = vadd.f32 %v2223_v40, %v950_v39  ;;  %v1031_v45 = vadd.f32 %v2223_v40, %v1030_v41  ;;  %v793_v46 = vpop.f32.mrf.mxu0  ;;  %v873_v47 = vpop.f32.mrf.mxu1 }
 0x109   : > { %v794_v50 = vadd.f32 %v2223_v40, %v793_v46  ;;  %v874_v51 = vadd.f32 %v2223_v40, %v873_v47 }
 0x10a   : > { %1159 = vst.msk [vmem:[#allocation2 + $0x258] sm:$0xff] %vm1083_vm0, %v951_v44 }
 0x10b   : > { %1191 = vst.msk [vmem:[#allocation2 + $0x358] sm:$0xff] %vm1083_vm0, %v1031_v45  ;;  %832 = vmatmul.bf16.gmra.mxu0 %v2029_v42  ;;  %912 = vmatmul.bf16.gmra.mxu1 %v2045_v43  ;;  %v1592_v43 = vmax.f32 %v1577_v26, %v1581_v27 }
 0x10c   : > { %1096 = vst.msk [vmem:[#allocation2 + $0x60] sm:$0xff] %vm1083_vm0, %v794_v50  ;;  %992 = vmatmul.bf16.gmra.mxu2 %v2061_v48  ;;  %1072 = vmatmul.bf16.gmra.mxu3 %v2077_v49 }
 0x10d   : > { %1128 = vst.msk [vmem:[#allocation2 + $0x160] sm:$0xff] %vm1083_vm0, %v874_v51 }
 0x10f   : > { %v953_v52 = vpop.f32.mrf.mxu2  ;;  %v1033_v53 = vpop.f32.mrf.mxu3 }
 0x110   : > { %v954_v54 = vadd.f32 %v2223_v40, %v953_v52  ;;  %v1034_v55 = vadd.f32 %v2223_v40, %v1033_v53  ;;  %v795_v56 = vpop.f32.mrf.mxu0  ;;  %v875_v57 = vpop.f32.mrf.mxu1 }
 0x111   : > { %v796_v58 = vadd.f32 %v2223_v40, %v795_v56  ;;  %v876_v59 = vadd.f32 %v2223_v40, %v875_v57 }
 0x112   : > { %1160 = vst.msk [vmem:[#allocation2 + $0x260] sm:$0xff] %vm1083_vm0, %v954_v54  ;;  %v1579_v21 = vld [vmem:[#allocation2 + $0x350] ss:$2 sm:$0xff]  ;;  %v1583_v22 = vld [vmem:[#allocation2 + $0x351] ss:$2 sm:$0xff] }
 0x113   : > { %1192 = vst.msk [vmem:[#allocation2 + $0x360] sm:$0xff] %vm1083_vm0, %v1034_v55 }
 0x114   : > { %1097 = vst.msk [vmem:[#allocation2 + $0x68] sm:$0xff] %vm1083_vm0, %v796_v58 }
 0x115   : > { %1129 = vst.msk [vmem:[#allocation2 + $0x168] sm:$0xff] %vm1083_vm0, %v876_v59 }
 0x117   : > { %v955_v60 = vpop.f32.mrf.mxu2  ;;  %v1035_v61 = vpop.f32.mrf.mxu3 }
 0x118   : > { %v956_v0 = vadd.f32 %v2223_v40, %v955_v60  ;;  %v1036_v1 = vadd.f32 %v2223_v40, %v1035_v61  ;;  %v798_v2 = vpop.f32.mrf.mxu0  ;;  %v878_v3 = vpop.f32.mrf.mxu1  ;;  %v1243_v60 = vld [vmem:[#allocation2 + $0x50] ss:$2 sm:$0xff]  ;;  %v1247_v61 = vld [vmem:[#allocation2 + $0x51] ss:$2 sm:$0xff] }
 0x119   : > { %v799_v8 = vadd.f32 %v2223_v40, %v798_v2  ;;  %v879_v9 = vadd.f32 %v2223_v40, %v878_v3  ;;  %v1257_v3 = vmax.f32 %v1243_v60, %v1247_v61 }
 0x11a   : > { %1161 = vst.msk [vmem:[#allocation2 + $0x268] sm:$0xff] %vm1083_vm0, %v956_v0  ;;  %v1359_v0 = vld [vmem:[#allocation2 + $0x151] ss:$2 sm:$0xff] }
 0x11b   : > { %v1249_v12 = vld [vmem:[#allocation2 + $0x60] ss:$2 sm:$0xff]  ;;  %v1253_v13 = vld [vmem:[#allocation2 + $0x61] ss:$2 sm:$0xff]  ;;  %1193 = vst.msk [vmem:[#allocation2 + $0x368] sm:$0xff] %vm1083_vm0, %v1036_v1  ;;  %837 = vmatmul.bf16.gmra.mxu0 %v2030_v62  ;;  %917 = vmatmul.bf16.gmra.mxu1 %v2046_v63 }
 0x11c   : > { %v1258_v15 = vmax.f32 %v1249_v12, %v1253_v13  ;;  %v1361_v16 = vld [vmem:[#allocation2 + $0x160] ss:$2 sm:$0xff]  ;;  %v1365_v17 = vld [vmem:[#allocation2 + $0x161] ss:$2 sm:$0xff]  ;;  %1098 = vst.msk [vmem:[#allocation2 + $0x70] sm:$0xff] %vm1083_vm0, %v799_v8  ;;  %997 = vmatmul.bf16.gmra.mxu2 %v2062_v4  ;;  %1077 = vmatmul.bf16.gmra.mxu3 %v2078_v5 }
 0x11d   : > { %v1370_v19 = vmax.f32 %v1361_v16, %v1365_v17  ;;  %1130 = vst.msk [vmem:[#allocation2 + $0x170] sm:$0xff] %vm1083_vm0, %v879_v9  ;;  %v1355_v63 = vld [vmem:[#allocation2 + $0x150] ss:$2 sm:$0xff]  ;;  %v1471_v17 = vld [vmem:[#allocation2 + $0x251] ss:$2 sm:$0xff] }
 0x11e   : > { %v1260_v20 = vmax.f32 %v1256_v14, %v1258_v15  ;;  %v1369_v7 = vmax.f32 %v1355_v63, %v1359_v0  ;;  %v1467_v16 = vld [vmem:[#allocation2 + $0x250] ss:$2 sm:$0xff] }
 0x11f   : > { %v1372_v23 = vmax.f32 %v1368_v18, %v1370_v19  ;;  %v958_v24 = vpop.f32.mrf.mxu2  ;;  %v1038_v25 = vpop.f32.mrf.mxu3  ;;  %v1481_v27 = vmax.f32 %v1467_v16, %v1471_v17 }
 0x120   : > { %v1262_v28 = vmax.f32 %v1260_v20, 0.0  ;;  %v959_v29 = vadd.f32 %v2223_v40, %v958_v24  ;;  %v1039_v30 = vadd.f32 %v2223_v40, %v1038_v25  ;;  %v800_v31 = vpop.f32.mrf.mxu0  ;;  %v880_v32 = vpop.f32.mrf.mxu1 }
 0x121   : > { %v1374_v33 = vmax.f32 %v1372_v23, 0.0  ;;  %v1473_v34 = vld [vmem:[#allocation2 + $0x260] ss:$2 sm:$0xff]  ;;  %v1477_v35 = vld [vmem:[#allocation2 + $0x261] ss:$2 sm:$0xff]  ;;  %v801_v42 = vadd.f32 %v2223_v40, %v800_v31  ;;  %v881_v46 = vadd.f32 %v2223_v40, %v880_v32  ;;  %v1593_v32 = vmax.f32 %v1579_v21, %v1583_v22 }
 0x122   : > { %v1264_v37 = vpack.c.bf16 %v1262_v28, %v1262_v28  ;;  %v1482_v38 = vmax.f32 %v1473_v34, %v1477_v35  ;;  %v1585_v39 = vld [vmem:[#allocation2 + $0x360] ss:$2 sm:$0xff]  ;;  %v1589_v41 = vld [vmem:[#allocation2 + $0x361] ss:$2 sm:$0xff]  ;;  %1162 = vst.msk [vmem:[#allocation2 + $0x270] sm:$0xff] %vm1083_vm0, %v959_v29 }
 0x123   : > { %v1376_v44 = vpack.c.bf16 %v1374_v33, %v1374_v33  ;;  %v1594_v45 = vmax.f32 %v1585_v39, %v1589_v41  ;;  %1194 = vst.msk [vmem:[#allocation2 + $0x370] sm:$0xff] %vm1083_vm0, %v1039_v30 }
 0x124   : > { %1266 = vst.msk [vmem:[%s2304_s15 + $0x8] sm:$0xf] %vm1237_vm1, %v1264_v37  ;;  %v1484_v47 = vmax.f32 %v1480_v36, %v1482_v38 }
 0x125   : > { %1378 = vst.msk [vmem:[%s2304_s15 + $0x28] sm:$0xf] %vm1237_vm1, %v1376_v44  ;;  %v1596_v48 = vmax.f32 %v1592_v43, %v1594_v45 }
 0x126   : > { %v1486_v49 = vmax.f32 %v1484_v47, 0.0  ;;  %1099 = vst.msk [vmem:[#allocation2 + $0x78] sm:$0xff] %vm1083_vm0, %v801_v42 }
 0x127   : > { %v1598_v50 = vmax.f32 %v1596_v48, 0.0  ;;  %1131 = vst.msk [vmem:[#allocation2 + $0x178] sm:$0xff] %vm1083_vm0, %v881_v46  ;;  %v960_v51 = vpop.f32.mrf.mxu2  ;;  %v1040_v52 = vpop.f32.mrf.mxu3 }
 0x128   : > { %v1488_v53 = vpack.c.bf16 %v1486_v49, %v1486_v49  ;;  %v961_v54 = vadd.f32 %v2223_v40, %v960_v51  ;;  %v803_v55 = vpop.f32.mrf.mxu0  ;;  %v883_v56 = vpop.f32.mrf.mxu1  ;;  %v1041_v58 = vadd.f32 %v2223_v40, %v1040_v52 }
 0x129   : > { %v1600_v57 = vpack.c.bf16 %v1598_v50, %v1598_v50  ;;  %v804_v59 = vadd.f32 %v2223_v40, %v803_v55  ;;  %v884_v62 = vadd.f32 %v2223_v40, %v883_v56 }
 0x12a   : > { %1490 = vst.msk [vmem:[%s2304_s15 + $0x48] sm:$0xf] %vm1237_vm1, %v1488_v53 }
 0x12b   : > { %1602 = vst.msk [vmem:[%s2304_s15 + $0x68] sm:$0xf] %vm1237_vm1, %v1600_v57 }
 0x12c   : > { %1163 = vst.msk [vmem:[#allocation2 + $0x278] sm:$0xff] %vm1083_vm0, %v961_v54 }
 0x12d   : > { %v1251_v1 = vld [vmem:[#allocation2 + $0x70] ss:$2 sm:$0xff]  ;;  %v1255_v2 = vld [vmem:[#allocation2 + $0x71] ss:$2 sm:$0xff]  ;;  %1195 = vst.msk [vmem:[#allocation2 + $0x378] sm:$0xff] %vm1083_vm0, %v1041_v58 }
 0x12e   : > { %v1259_v4 = vmax.f32 %v1251_v1, %v1255_v2  ;;  %v1363_v5 = vld [vmem:[#allocation2 + $0x170] ss:$2 sm:$0xff]  ;;  %v1367_v6 = vld [vmem:[#allocation2 + $0x171] ss:$2 sm:$0xff]  ;;  %1100 = vst.msk [vmem:[#allocation2 + $0x80] sm:$0xff] %vm1083_vm0, %v804_v59 }
 0x12f   : > { %v1371_v8 = vmax.f32 %v1363_v5, %v1367_v6  ;;  %1132 = vst.msk [vmem:[#allocation2 + $0x180] sm:$0xff] %vm1083_vm0, %v884_v62  ;;  %v963_v9 = vpop.f32.mrf.mxu2  ;;  %v1043_v10 = vpop.f32.mrf.mxu3 }
 0x130   : > { %v1261_v11 = vmax.f32 %v1257_v3, %v1259_v4  ;;  %v964_v12 = vadd.f32 %v2223_v40, %v963_v9  ;;  %v1044_v13 = vadd.f32 %v2223_v40, %v1043_v10  ;;  %v805_v14 = vpop.f32.mrf.mxu0  ;;  %v885_v15 = vpop.f32.mrf.mxu1 }
 0x131   : > { %v1373_v18 = vmax.f32 %v1369_v7, %v1371_v8  ;;  %v806_v19 = vadd.f32 %v2223_v40, %v805_v14  ;;  %v886_v20 = vadd.f32 %v2223_v40, %v885_v15 }
 0x132   : > { %v1263_v23 = vmax.f32 %v1261_v11, 0.0  ;;  %1164 = vst.msk [vmem:[#allocation2 + $0x280] sm:$0xff] %vm1083_vm0, %v964_v12 }
 0x133   : > { %v1375_v24 = vmax.f32 %v1373_v18, 0.0  ;;  %v1475_v25 = vld [vmem:[#allocation2 + $0x270] ss:$2 sm:$0xff]  ;;  %v1479_v26 = vld [vmem:[#allocation2 + $0x271] ss:$2 sm:$0xff]  ;;  %1196 = vst.msk [vmem:[#allocation2 + $0x380] sm:$0xff] %vm1083_vm0, %v1044_v13 }
 0x134   : > { %v1265_v28 = vpack.c.bf16 %v1263_v23, %v1263_v23  ;;  %v1483_v29 = vmax.f32 %v1475_v25, %v1479_v26  ;;  %v1587_v30 = vld [vmem:[#allocation2 + $0x370] ss:$2 sm:$0xff]  ;;  %v1591_v31 = vld [vmem:[#allocation2 + $0x371] ss:$2 sm:$0xff]  ;;  %1101 = vst.msk [vmem:[#allocation2 + $0x88] sm:$0xff] %vm1083_vm0, %v806_v19 }
 0x135   : > { %v1377_v33 = vpack.c.bf16 %v1375_v24, %v1375_v24  ;;  %v1595_v34 = vmax.f32 %v1587_v30, %v1591_v31  ;;  %1133 = vst.msk [vmem:[#allocation2 + $0x188] sm:$0xff] %vm1083_vm0, %v886_v20 }
 0x136   : > { %1267 = vst.msk [vmem:[%s2304_s15 + $0xc] sm:$0xf] %vm1237_vm1, %v1265_v28  ;;  %v1485_v35 = vmax.f32 %v1481_v27, %v1483_v29 }
 0x137   : > { %1379 = vst.msk [vmem:[%s2304_s15 + $0x2c] sm:$0xf] %vm1237_vm1, %v1377_v33  ;;  %v1597_v36 = vmax.f32 %v1593_v32, %v1595_v34  ;;  %v965_v37 = vpop.f32.mrf.mxu2  ;;  %v1045_v38 = vpop.f32.mrf.mxu3 }
 0x138   : > { %v1487_v39 = vmax.f32 %v1485_v35, 0.0  ;;  %v966_v41 = vadd.f32 %v2223_v40, %v965_v37  ;;  %v1046_v42 = vadd.f32 %v2223_v40, %v1045_v38  ;;  %v808_v43 = vpop.f32.mrf.mxu0  ;;  %v888_v44 = vpop.f32.mrf.mxu1  ;;  %v2483_v38 = vld [vmem:[%s2598_s2] ss:$0 sm:$0xff] }
 0x139   : > { %v1599_v45 = vmax.f32 %v1597_v36, 0.0  ;;  %v809_v47 = vadd.f32 %v2223_v40, %v808_v43  ;;  %v889_v49 = vadd.f32 %v2223_v40, %v888_v44 }
 0x13a   : > { %v1489_v46 = vpack.c.bf16 %v1487_v39, %v1487_v39  ;;  %1165 = vst.msk [vmem:[#allocation2 + $0x288] sm:$0xff] %vm1083_vm0, %v966_v41 }
 0x13b   : > { %v1601_v48 = vpack.c.bf16 %v1599_v45, %v1599_v45  ;;  %1197 = vst.msk [vmem:[#allocation2 + $0x388] sm:$0xff] %vm1083_vm0, %v1046_v42  ;;  %v1269_v16 = vld [vmem:[#allocation2 + $0x80] ss:$2 sm:$0xff]  ;;  %v1273_v17 = vld [vmem:[#allocation2 + $0x81] ss:$2 sm:$0xff] }
 0x13c   : > { %1491 = vst.msk [vmem:[%s2304_s15 + $0x4c] sm:$0xf] %vm1237_vm1, %v1489_v46  ;;  %v1381_v20 = vld [vmem:[#allocation2 + $0x180] ss:$2 sm:$0xff]  ;;  %v1385_v21 = vld [vmem:[#allocation2 + $0x181] ss:$2 sm:$0xff]  ;;  %v1284_v24 = vmax.f32 %v1269_v16, %v1273_v17 }
 0x13d   : > { %1603 = vst.msk [vmem:[%s2304_s15 + $0x6c] sm:$0xf] %vm1237_vm1, %v1601_v48  ;;  %v1396_v28 = vmax.f32 %v1381_v20, %v1385_v21 }
 0x13e   : > { %1102 = vst.msk [vmem:[#allocation2 + $0x90] sm:$0xff] %vm1083_vm0, %v809_v47 }
 0x13f   : > { %1134 = vst.msk [vmem:[#allocation2 + $0x190] sm:$0xff] %vm1083_vm0, %v889_v49  ;;  %v968_v50 = vpop.f32.mrf.mxu2  ;;  %v1048_v51 = vpop.f32.mrf.mxu3 }
 0x140   : > { %v969_v52 = vadd.f32 %v2223_v40, %v968_v50  ;;  %v1049_v53 = vadd.f32 %v2223_v40, %v1048_v51  ;;  %v810_v54 = vpop.f32.mrf.mxu0  ;;  %v890_v55 = vpop.f32.mrf.mxu1 }
 0x141   : > { %v811_v56 = vadd.f32 %v2223_v40, %v810_v54  ;;  %v891_v57 = vadd.f32 %v2223_v40, %v890_v55  ;;  %v1497_v31 = vld [vmem:[#allocation2 + $0x281] ss:$2 sm:$0xff] }
 0x142   : > { %1166 = vst.msk [vmem:[#allocation2 + $0x290] sm:$0xff] %vm1083_vm0, %v969_v52  ;;  %v1605_v35 = vld [vmem:[#allocation2 + $0x380] ss:$2 sm:$0xff]  ;;  %v1609_v36 = vld [vmem:[#allocation2 + $0x381] ss:$2 sm:$0xff] }
 0x143   : > { %1198 = vst.msk [vmem:[#allocation2 + $0x390] sm:$0xff] %vm1083_vm0, %v1049_v53  ;;  %v1620_v53 = vmax.f32 %v1605_v35, %v1609_v36 }
 0x144   : > { %1103 = vst.msk [vmem:[#allocation2 + $0x98] sm:$0xff] %vm1083_vm0, %v811_v56 }
 0x145   : > { %1135 = vst.msk [vmem:[#allocation2 + $0x198] sm:$0xff] %vm1083_vm0, %v891_v57 }
 0x147   : > { %v970_v58 = vpop.f32.mrf.mxu2  ;;  %v1050_v59 = vpop.f32.mrf.mxu3 }
 0x148   : > { %v971_v60 = vadd.f32 %v2223_v40, %v970_v58  ;;  %v1051_v61 = vadd.f32 %v2223_v40, %v1050_v59  ;;  %v813_v62 = vpop.f32.mrf.mxu0  ;;  %v893_v63 = vpop.f32.mrf.mxu1 }
 0x149   : > { %v814_v0 = vadd.f32 %v2223_v40, %v813_v62  ;;  %v894_v1 = vadd.f32 %v2223_v40, %v893_v63 }
 0x14a   : > { %1167 = vst.msk [vmem:[#allocation2 + $0x298] sm:$0xff] %vm1083_vm0, %v971_v60 }
 0x14b   : > { %1199 = vst.msk [vmem:[#allocation2 + $0x398] sm:$0xff] %vm1083_vm0, %v1051_v61 }
 0x14c   : > { %1104 = vst.msk [vmem:[#allocation2 + $0xa0] sm:$0xff] %vm1083_vm0, %v814_v0 }
 0x14d   : > { %1136 = vst.msk [vmem:[#allocation2 + $0x1a0] sm:$0xff] %vm1083_vm0, %v894_v1 }
 0x14f   : > { %v973_v2 = vpop.f32.mrf.mxu2  ;;  %v1053_v3 = vpop.f32.mrf.mxu3 }
 0x150   : > { %v974_v4 = vadd.f32 %v2223_v40, %v973_v2  ;;  %v1054_v5 = vadd.f32 %v2223_v40, %v1053_v3  ;;  %v815_v6 = vpop.f32.mrf.mxu0  ;;  %v895_v7 = vpop.f32.mrf.mxu1 }
 0x151   : > { %v816_v8 = vadd.f32 %v2223_v40, %v815_v6  ;;  %v896_v9 = vadd.f32 %v2223_v40, %v895_v7  ;;  %v1271_v6 = vld [vmem:[#allocation2 + $0x90] ss:$2 sm:$0xff]  ;;  %v1275_v7 = vld [vmem:[#allocation2 + $0x91] ss:$2 sm:$0xff] }
 0x152   : > { %1168 = vst.msk [vmem:[#allocation2 + $0x2a0] sm:$0xff] %vm1083_vm0, %v974_v4 }
 0x153   : > { %1200 = vst.msk [vmem:[#allocation2 + $0x3a0] sm:$0xff] %vm1083_vm0, %v1054_v5 }
 0x154   : > { %1105 = vst.msk [vmem:[#allocation2 + $0xa8] sm:$0xff] %vm1083_vm0, %v816_v8 }
 0x155   : > { %1137 = vst.msk [vmem:[#allocation2 + $0x1a8] sm:$0xff] %vm1083_vm0, %v896_v9  ;;  %v1383_v9 = vld [vmem:[#allocation2 + $0x190] ss:$2 sm:$0xff] }
 0x157   : > { %v975_v10 = vpop.f32.mrf.mxu2  ;;  %v1055_v11 = vpop.f32.mrf.mxu3 }
 0x158   : > { %v976_v12 = vadd.f32 %v2223_v40, %v975_v10  ;;  %v1056_v13 = vadd.f32 %v2223_v40, %v1055_v11  ;;  %v818_v14 = vpop.f32.mrf.mxu0  ;;  %v898_v15 = vpop.f32.mrf.mxu1  ;;  %v1387_v10 = vld [vmem:[#allocation2 + $0x191] ss:$2 sm:$0xff] }
 0x159   : > { %v819_v18 = vadd.f32 %v2223_v40, %v818_v14  ;;  %v899_v19 = vadd.f32 %v2223_v40, %v898_v15  ;;  %v1493_v40 = vld [vmem:[#allocation2 + $0x280] ss:$2 sm:$0xff]  ;;  %v1397_v17 = vmax.f32 %v1383_v9, %v1387_v10 }
 0x15a   : > { %1169 = vst.msk [vmem:[#allocation2 + $0x2a8] sm:$0xff] %vm1083_vm0, %v976_v12  ;;  %v1508_v47 = vmax.f32 %v1493_v40, %v1497_v31  ;;  %v1607_v40 = vld [vmem:[#allocation2 + $0x390] ss:$2 sm:$0xff]  ;;  %v1611_v31 = vld [vmem:[#allocation2 + $0x391] ss:$2 sm:$0xff] }
 0x15b   : > { %v1277_v22 = vld [vmem:[#allocation2 + $0xa0] ss:$2 sm:$0xff]  ;;  %v1281_v23 = vld [vmem:[#allocation2 + $0xa1] ss:$2 sm:$0xff]  ;;  %1201 = vst.msk [vmem:[#allocation2 + $0x3a8] sm:$0xff] %vm1083_vm0, %v1056_v13  ;;  %v1285_v13 = vmax.f32 %v1271_v6, %v1275_v7 }
 0x15c   : > { %v1286_v25 = vmax.f32 %v1277_v22, %v1281_v23  ;;  %v1389_v26 = vld [vmem:[#allocation2 + $0x1a0] ss:$2 sm:$0xff]  ;;  %v1393_v27 = vld [vmem:[#allocation2 + $0x1a1] ss:$2 sm:$0xff]  ;;  %1106 = vst.msk [vmem:[#allocation2 + $0xb0] sm:$0xff] %vm1083_vm0, %v819_v18 }
 0x15d   : > { %v1398_v29 = vmax.f32 %v1389_v26, %v1393_v27  ;;  %1138 = vst.msk [vmem:[#allocation2 + $0x1b0] sm:$0xff] %vm1083_vm0, %v899_v19  ;;  %v1495_v26 = vld [vmem:[#allocation2 + $0x290] ss:$2 sm:$0xff]  ;;  %v1499_v27 = vld [vmem:[#allocation2 + $0x291] ss:$2 sm:$0xff] }
 0x15e   : > { %v1288_v30 = vmax.f32 %v1284_v24, %v1286_v25  ;;  %v1509_v36 = vmax.f32 %v1495_v26, %v1499_v27 }
 0x15f   : > { %v1400_v32 = vmax.f32 %v1396_v28, %v1398_v29  ;;  %v978_v33 = vpop.f32.mrf.mxu2  ;;  %v1058_v34 = vpop.f32.mrf.mxu3 }
 0x160   : > { %v1290_v37 = vmax.f32 %v1288_v30, 0.0  ;;  %v979_v39 = vadd.f32 %v2483_v38, %v978_v33  ;;  %v1059_v41 = vadd.f32 %v2483_v38, %v1058_v34  ;;  %v820_v42 = vpop.f32.mrf.mxu0  ;;  %v900_v43 = vpop.f32.mrf.mxu1 }
 0x161   : > { %v1402_v44 = vmax.f32 %v1400_v32, 0.0  ;;  %v1501_v45 = vld [vmem:[#allocation2 + $0x2a0] ss:$2 sm:$0xff]  ;;  %v1505_v46 = vld [vmem:[#allocation2 + $0x2a1] ss:$2 sm:$0xff]  ;;  %v821_v52 = vadd.f32 %v2483_v38, %v820_v42  ;;  %v901_v56 = vadd.f32 %v2483_v38, %v900_v43  ;;  %v1621_v43 = vmax.f32 %v1607_v40, %v1611_v31 }
 0x162   : > { %v1292_v48 = vpack.c.bf16 %v1290_v37, %v1290_v37  ;;  %v1510_v49 = vmax.f32 %v1501_v45, %v1505_v46  ;;  %v1613_v50 = vld [vmem:[#allocation2 + $0x3a0] ss:$2 sm:$0xff]  ;;  %v1617_v51 = vld [vmem:[#allocation2 + $0x3a1] ss:$2 sm:$0xff]  ;;  %1170 = vst.msk [vmem:[#allocation2 + $0x2b0] sm:$0xff] %vm1083_vm0, %v979_v39 }
 0x163   : > { %v1404_v54 = vpack.c.bf16 %v1402_v44, %v1402_v44  ;;  %v1622_v55 = vmax.f32 %v1613_v50, %v1617_v51  ;;  %1202 = vst.msk [vmem:[#allocation2 + $0x3b0] sm:$0xff] %vm1083_vm0, %v1059_v41 }
 0x164   : > { %1294 = vst.msk [vmem:[%s2304_s15 + $0x10] sm:$0xf] %vm1237_vm1, %v1292_v48  ;;  %v1512_v57 = vmax.f32 %v1508_v47, %v1510_v49 }
 0x165   : > { %1406 = vst.msk [vmem:[%s2304_s15 + $0x30] sm:$0xf] %vm1237_vm1, %v1404_v54  ;;  %v1624_v58 = vmax.f32 %v1620_v53, %v1622_v55 }
 0x166   : > { %v1514_v59 = vmax.f32 %v1512_v57, 0.0  ;;  %1107 = vst.msk [vmem:[#allocation2 + $0xb8] sm:$0xff] %vm1083_vm0, %v821_v52 }
 0x167   : > { %v1626_v60 = vmax.f32 %v1624_v58, 0.0  ;;  %1139 = vst.msk [vmem:[#allocation2 + $0x1b8] sm:$0xff] %vm1083_vm0, %v901_v56  ;;  %v980_v61 = vpop.f32.mrf.mxu2  ;;  %v1060_v62 = vpop.f32.mrf.mxu3 }
 0x168   : > { %v1516_v63 = vpack.c.bf16 %v1514_v59, %v1514_v59  ;;  %v981_v0 = vadd.f32 %v2483_v38, %v980_v61  ;;  %v823_v1 = vpop.f32.mrf.mxu0  ;;  %v903_v2 = vpop.f32.mrf.mxu1  ;;  %v1061_v4 = vadd.f32 %v2483_v38, %v1060_v62 }
 0x169   : > { %v1628_v3 = vpack.c.bf16 %v1626_v60, %v1626_v60  ;;  %v824_v5 = vadd.f32 %v2483_v38, %v823_v1  ;;  %v904_v8 = vadd.f32 %v2483_v38, %v903_v2 }
 0x16a   : > { %1518 = vst.msk [vmem:[%s2304_s15 + $0x50] sm:$0xf] %vm1237_vm1, %v1516_v63 }
 0x16b   : > { %1630 = vst.msk [vmem:[%s2304_s15 + $0x70] sm:$0xf] %vm1237_vm1, %v1628_v3 }
 0x16c   : > { %1171 = vst.msk [vmem:[#allocation2 + $0x2b8] sm:$0xff] %vm1083_vm0, %v981_v0 }
 0x16d   : > { %v1279_v11 = vld [vmem:[#allocation2 + $0xb0] ss:$2 sm:$0xff]  ;;  %v1283_v12 = vld [vmem:[#allocation2 + $0xb1] ss:$2 sm:$0xff]  ;;  %1203 = vst.msk [vmem:[#allocation2 + $0x3b8] sm:$0xff] %vm1083_vm0, %v1061_v4 }
 0x16e   : > { %v1287_v14 = vmax.f32 %v1279_v11, %v1283_v12  ;;  %v1391_v15 = vld [vmem:[#allocation2 + $0x1b0] ss:$2 sm:$0xff]  ;;  %v1395_v16 = vld [vmem:[#allocation2 + $0x1b1] ss:$2 sm:$0xff]  ;;  %1108 = vst.msk [vmem:[#allocation2 + $0xc0] sm:$0xff] %vm1083_vm0, %v824_v5 }
 0x16f   : > { %v1399_v18 = vmax.f32 %v1391_v15, %v1395_v16  ;;  %1140 = vst.msk [vmem:[#allocation2 + $0x1c0] sm:$0xff] %vm1083_vm0, %v904_v8  ;;  %v983_v19 = vpop.f32.mrf.mxu2  ;;  %v1063_v20 = vpop.f32.mrf.mxu3 }
 0x170   : > { %v1289_v21 = vmax.f32 %v1285_v13, %v1287_v14  ;;  %v984_v22 = vadd.f32 %v2483_v38, %v983_v19  ;;  %v1064_v23 = vadd.f32 %v2483_v38, %v1063_v20  ;;  %v825_v24 = vpop.f32.mrf.mxu0  ;;  %v905_v25 = vpop.f32.mrf.mxu1 }
 0x171   : > { %v1401_v28 = vmax.f32 %v1397_v17, %v1399_v18  ;;  %v826_v29 = vadd.f32 %v2483_v38, %v825_v24  ;;  %v906_v30 = vadd.f32 %v2483_v38, %v905_v25 }
 0x172   : > { %v1291_v32 = vmax.f32 %v1289_v21, 0.0  ;;  %1172 = vst.msk [vmem:[#allocation2 + $0x2c0] sm:$0xff] %vm1083_vm0, %v984_v22 }
 0x173   : > { %v1403_v33 = vmax.f32 %v1401_v28, 0.0  ;;  %v1503_v34 = vld [vmem:[#allocation2 + $0x2b0] ss:$2 sm:$0xff]  ;;  %v1507_v35 = vld [vmem:[#allocation2 + $0x2b1] ss:$2 sm:$0xff]  ;;  %1204 = vst.msk [vmem:[#allocation2 + $0x3c0] sm:$0xff] %vm1083_vm0, %v1064_v23 }
 0x174   : > { %v1293_v37 = vpack.c.bf16 %v1291_v32, %v1291_v32  ;;  %v1511_v39 = vmax.f32 %v1503_v34, %v1507_v35  ;;  %v1615_v41 = vld [vmem:[#allocation2 + $0x3b0] ss:$2 sm:$0xff]  ;;  %v1619_v42 = vld [vmem:[#allocation2 + $0x3b1] ss:$2 sm:$0xff]  ;;  %1109 = vst.msk [vmem:[#allocation2 + $0xc8] sm:$0xff] %vm1083_vm0, %v826_v29 }
 0x175   : > { %v1405_v44 = vpack.c.bf16 %v1403_v33, %v1403_v33  ;;  %v1623_v45 = vmax.f32 %v1615_v41, %v1619_v42  ;;  %1141 = vst.msk [vmem:[#allocation2 + $0x1c8] sm:$0xff] %vm1083_vm0, %v906_v30 }
 0x176   : > { %1295 = vst.msk [vmem:[%s2304_s15 + $0x14] sm:$0xf] %vm1237_vm1, %v1293_v37  ;;  %v1513_v46 = vmax.f32 %v1509_v36, %v1511_v39 }
 0x177   : > { %1407 = vst.msk [vmem:[%s2304_s15 + $0x34] sm:$0xf] %vm1237_vm1, %v1405_v44  ;;  %v1625_v47 = vmax.f32 %v1621_v43, %v1623_v45  ;;  %v985_v48 = vpop.f32.mrf.mxu2  ;;  %v1065_v49 = vpop.f32.mrf.mxu3 }
 0x178   : > { %v1515_v50 = vmax.f32 %v1513_v46, 0.0  ;;  %v986_v51 = vadd.f32 %v2483_v38, %v985_v48  ;;  %v1066_v52 = vadd.f32 %v2483_v38, %v1065_v49  ;;  %v828_v53 = vpop.f32.mrf.mxu0  ;;  %v908_v54 = vpop.f32.mrf.mxu1 }
 0x179   : > { %v1627_v55 = vmax.f32 %v1625_v47, 0.0  ;;  %v829_v57 = vadd.f32 %v2483_v38, %v828_v53  ;;  %v909_v59 = vadd.f32 %v2483_v38, %v908_v54 }
 0x17a   : > { %v1517_v56 = vpack.c.bf16 %v1515_v50, %v1515_v50  ;;  %1173 = vst.msk [vmem:[#allocation2 + $0x2c8] sm:$0xff] %vm1083_vm0, %v986_v51 }
 0x17b   : > { %v1629_v58 = vpack.c.bf16 %v1627_v55, %v1627_v55  ;;  %1205 = vst.msk [vmem:[#allocation2 + $0x3c8] sm:$0xff] %vm1083_vm0, %v1066_v52  ;;  %v1297_v26 = vld [vmem:[#allocation2 + $0xc0] ss:$2 sm:$0xff]  ;;  %v1301_v27 = vld [vmem:[#allocation2 + $0xc1] ss:$2 sm:$0xff] }
 0x17c   : > { %1519 = vst.msk [vmem:[%s2304_s15 + $0x54] sm:$0xf] %vm1237_vm1, %v1517_v56  ;;  %v1409_v30 = vld [vmem:[#allocation2 + $0x1c0] ss:$2 sm:$0xff]  ;;  %v1413_v40 = vld [vmem:[#allocation2 + $0x1c1] ss:$2 sm:$0xff]  ;;  %v1312_v33 = vmax.f32 %v1297_v26, %v1301_v27 }
 0x17d   : > { %1631 = vst.msk [vmem:[%s2304_s15 + $0x74] sm:$0xf] %vm1237_vm1, %v1629_v58  ;;  %v1424_v37 = vmax.f32 %v1409_v30, %v1413_v40 }
 0x17e   : > { %1110 = vst.msk [vmem:[#allocation2 + $0xd0] sm:$0xff] %vm1083_vm0, %v829_v57 }
 0x17f   : > { %1142 = vst.msk [vmem:[#allocation2 + $0x1d0] sm:$0xff] %vm1083_vm0, %v909_v59  ;;  %v988_v60 = vpop.f32.mrf.mxu2  ;;  %v1068_v61 = vpop.f32.mrf.mxu3 }
 0x180   : > { %v989_v62 = vadd.f32 %v2483_v38, %v988_v60  ;;  %v1069_v63 = vadd.f32 %v2483_v38, %v1068_v61  ;;  %v830_v0 = vpop.f32.mrf.mxu0  ;;  %v910_v1 = vpop.f32.mrf.mxu1 }
 0x181   : > { %v831_v2 = vadd.f32 %v2483_v38, %v830_v0  ;;  %v911_v3 = vadd.f32 %v2483_v38, %v910_v1  ;;  %v1521_v42 = vld [vmem:[#allocation2 + $0x2c0] ss:$2 sm:$0xff]  ;;  %v1525_v43 = vld [vmem:[#allocation2 + $0x2c1] ss:$2 sm:$0xff] }
 0x182   : > { %1174 = vst.msk [vmem:[#allocation2 + $0x2d0] sm:$0xff] %vm1083_vm0, %v989_v62  ;;  %v1633_v47 = vld [vmem:[#allocation2 + $0x3c0] ss:$2 sm:$0xff]  ;;  %v1637_v48 = vld [vmem:[#allocation2 + $0x3c1] ss:$2 sm:$0xff]  ;;  %v1536_v57 = vmax.f32 %v1521_v42, %v1525_v43 }
 0x183   : > { %1206 = vst.msk [vmem:[#allocation2 + $0x3d0] sm:$0xff] %vm1083_vm0, %v1069_v63  ;;  %v1648_v63 = vmax.f32 %v1633_v47, %v1637_v48 }
 0x184   : > { %1111 = vst.msk [vmem:[#allocation2 + $0xd8] sm:$0xff] %vm1083_vm0, %v831_v2 }
 0x185   : > { %1143 = vst.msk [vmem:[#allocation2 + $0x1d8] sm:$0xff] %vm1083_vm0, %v911_v3 }
 0x187   : > { %v990_v4 = vpop.f32.mrf.mxu2  ;;  %v1070_v5 = vpop.f32.mrf.mxu3 }
 0x188   : > { %v991_v6 = vadd.f32 %v2483_v38, %v990_v4  ;;  %v1071_v7 = vadd.f32 %v2483_v38, %v1070_v5  ;;  %v833_v8 = vpop.f32.mrf.mxu0  ;;  %v913_v9 = vpop.f32.mrf.mxu1 }
 0x189   : > { %v834_v10 = vadd.f32 %v2483_v38, %v833_v8  ;;  %v914_v11 = vadd.f32 %v2483_v38, %v913_v9 }
 0x18a   : > { %1175 = vst.msk [vmem:[#allocation2 + $0x2d8] sm:$0xff] %vm1083_vm0, %v991_v6 }
 0x18b   : > { %1207 = vst.msk [vmem:[#allocation2 + $0x3d8] sm:$0xff] %vm1083_vm0, %v1071_v7 }
 0x18c   : > { %1112 = vst.msk [vmem:[#allocation2 + $0xe0] sm:$0xff] %vm1083_vm0, %v834_v10 }
 0x18d   : > { %1144 = vst.msk [vmem:[#allocation2 + $0x1e0] sm:$0xff] %vm1083_vm0, %v914_v11 }
 0x18f   : > { %v993_v12 = vpop.f32.mrf.mxu2  ;;  %v1073_v13 = vpop.f32.mrf.mxu3 }
 0x190   : > { %v994_v14 = vadd.f32 %v2483_v38, %v993_v12  ;;  %v1074_v15 = vadd.f32 %v2483_v38, %v1073_v13  ;;  %v835_v16 = vpop.f32.mrf.mxu0  ;;  %v915_v17 = vpop.f32.mrf.mxu1  ;;  %v1299_v13 = vld [vmem:[#allocation2 + $0xd0] ss:$2 sm:$0xff] }
 0x191   : > { %v836_v18 = vadd.f32 %v2483_v38, %v835_v16  ;;  %v916_v19 = vadd.f32 %v2483_v38, %v915_v17  ;;  %v1415_v16 = vld [vmem:[#allocation2 + $0x1d1] ss:$2 sm:$0xff] }
 0x192   : > { %1176 = vst.msk [vmem:[#allocation2 + $0x2e0] sm:$0xff] %vm1083_vm0, %v994_v14  ;;  %v1303_v14 = vld [vmem:[#allocation2 + $0xd1] ss:$2 sm:$0xff] }
 0x193   : > { %1208 = vst.msk [vmem:[#allocation2 + $0x3e0] sm:$0xff] %vm1083_vm0, %v1074_v15  ;;  %v1411_v15 = vld [vmem:[#allocation2 + $0x1d0] ss:$2 sm:$0xff]  ;;  %v1527_v26 = vld [vmem:[#allocation2 + $0x2d1] ss:$2 sm:$0xff] }
 0x194   : > { %1113 = vst.msk [vmem:[#allocation2 + $0xe8] sm:$0xff] %vm1083_vm0, %v836_v18 }
 0x195   : > { %1145 = vst.msk [vmem:[#allocation2 + $0x1e8] sm:$0xff] %vm1083_vm0, %v916_v19  ;;  %v1313_v19 = vmax.f32 %v1299_v13, %v1303_v14 }
 0x197   : > { %v995_v20 = vpop.f32.mrf.mxu2  ;;  %v1075_v21 = vpop.f32.mrf.mxu3 }
 0x198   : > { %v996_v22 = vadd.f32 %v2483_v38, %v995_v20  ;;  %v1076_v23 = vadd.f32 %v2483_v38, %v1075_v21  ;;  %v838_v24 = vpop.f32.mrf.mxu0  ;;  %v918_v25 = vpop.f32.mrf.mxu1 }
 0x199   : > { %v839_v28 = vadd.f32 %v2483_v38, %v838_v24  ;;  %v919_v29 = vadd.f32 %v2483_v38, %v918_v25  ;;  %v1523_v25 = vld [vmem:[#allocation2 + $0x2d0] ss:$2 sm:$0xff] }
 0x19a   : > { %1177 = vst.msk [vmem:[#allocation2 + $0x2e8] sm:$0xff] %vm1083_vm0, %v996_v22 }
 0x19b   : > { %v1305_v31 = vld [vmem:[#allocation2 + $0xe0] ss:$2 sm:$0xff]  ;;  %v1309_v32 = vld [vmem:[#allocation2 + $0xe1] ss:$2 sm:$0xff]  ;;  %1209 = vst.msk [vmem:[#allocation2 + $0x3e8] sm:$0xff] %vm1083_vm0, %v1076_v23  ;;  %v1425_v23 = vmax.f32 %v1411_v15, %v1415_v16 }
 0x19c   : > { %v1314_v34 = vmax.f32 %v1305_v31, %v1309_v32  ;;  %v1417_v35 = vld [vmem:[#allocation2 + $0x1e0] ss:$2 sm:$0xff]  ;;  %v1421_v36 = vld [vmem:[#allocation2 + $0x1e1] ss:$2 sm:$0xff]  ;;  %1114 = vst.msk [vmem:[#allocation2 + $0xf0] sm:$0xff] %vm1083_vm0, %v839_v28 }
 0x19d   : > { %v1426_v39 = vmax.f32 %v1417_v35, %v1421_v36  ;;  %1146 = vst.msk [vmem:[#allocation2 + $0x1f0] sm:$0xff] %vm1083_vm0, %v919_v29  ;;  %v1635_v28 = vld [vmem:[#allocation2 + $0x3d0] ss:$2 sm:$0xff]  ;;  %v1639_v29 = vld [vmem:[#allocation2 + $0x3d1] ss:$2 sm:$0xff] }
 0x19e   : > { %v1316_v41 = vmax.f32 %v1312_v33, %v1314_v34  ;;  %v1537_v33 = vmax.f32 %v1523_v25, %v1527_v26 }
 0x19f   : > { %v1428_v44 = vmax.f32 %v1424_v37, %v1426_v39  ;;  %v998_v45 = vpop.f32.mrf.mxu2  ;;  %v1078_v46 = vpop.f32.mrf.mxu3  ;;  %v1649_v39 = vmax.f32 %v1635_v28, %v1639_v29 }
 0x1a0   : > { %v1318_v49 = vmax.f32 %v1316_v41, 0.0  ;;  %v999_v50 = vadd.f32 %v2483_v38, %v998_v45  ;;  %v1079_v51 = vadd.f32 %v2483_v38, %v1078_v46  ;;  %v840_v52 = vpop.f32.mrf.mxu0  ;;  %v920_v53 = vpop.f32.mrf.mxu1 }
 0x1a1   : > { %v1430_v54 = vmax.f32 %v1428_v44, 0.0  ;;  %v1529_v55 = vld [vmem:[#allocation2 + $0x2e0] ss:$2 sm:$0xff]  ;;  %v1533_v56 = vld [vmem:[#allocation2 + $0x2e1] ss:$2 sm:$0xff]  ;;  %v841_v62 = vadd.f32 %v2483_v38, %v840_v52  ;;  %v921_v2 = vadd.f32 %v2483_v38, %v920_v53 }
 0x1a2   : > { %v1320_v58 = vpack.c.bf16 %v1318_v49, %v1318_v49  ;;  %v1538_v59 = vmax.f32 %v1529_v55, %v1533_v56  ;;  %v1641_v60 = vld [vmem:[#allocation2 + $0x3e0] ss:$2 sm:$0xff]  ;;  %v1645_v61 = vld [vmem:[#allocation2 + $0x3e1] ss:$2 sm:$0xff]  ;;  %1178 = vst.msk [vmem:[#allocation2 + $0x2f0] sm:$0xff] %vm1083_vm0, %v999_v50 }
 0x1a3   : > { %v1432_v0 = vpack.c.bf16 %v1430_v54, %v1430_v54  ;;  %v1650_v1 = vmax.f32 %v1641_v60, %v1645_v61  ;;  %1210 = vst.msk [vmem:[#allocation2 + $0x3f0] sm:$0xff] %vm1083_vm0, %v1079_v51 }
 0x1a4   : > { %1322 = vst.msk [vmem:[%s2304_s15 + $0x18] sm:$0xf] %vm1237_vm1, %v1320_v58  ;;  %v1540_v3 = vmax.f32 %v1536_v57, %v1538_v59 }
 0x1a5   : > { %1434 = vst.msk [vmem:[%s2304_s15 + $0x38] sm:$0xf] %vm1237_vm1, %v1432_v0  ;;  %v1652_v4 = vmax.f32 %v1648_v63, %v1650_v1 }
 0x1a6   : > { %v1542_v5 = vmax.f32 %v1540_v3, 0.0  ;;  %1115 = vst.msk [vmem:[#allocation2 + $0xf8] sm:$0xff] %vm1083_vm0, %v841_v62 }
 0x1a7   : > { %v1654_v6 = vmax.f32 %v1652_v4, 0.0  ;;  %1147 = vst.msk [vmem:[#allocation2 + $0x1f8] sm:$0xff] %vm1083_vm0, %v921_v2  ;;  %v1000_v7 = vpop.f32.mrf.mxu2  ;;  %v1080_v8 = vpop.f32.mrf.mxu3 }
 0x1a8   : > { %v1544_v9 = vpack.c.bf16 %v1542_v5, %v1542_v5  ;;  %v1001_v10 = vadd.f32 %v2483_v38, %v1000_v7  ;;  %v1081_v12 = vadd.f32 %v2483_v38, %v1080_v8 }
 0x1a9   : > { %v1656_v11 = vpack.c.bf16 %v1654_v6, %v1654_v6 }
 0x1aa   : > { %1546 = vst.msk [vmem:[%s2304_s15 + $0x58] sm:$0xf] %vm1237_vm1, %v1544_v9 }
 0x1ab   : > { %1658 = vst.msk [vmem:[%s2304_s15 + $0x78] sm:$0xf] %vm1237_vm1, %v1656_v11 }
 0x1ac   : > { %1179 = vst.msk [vmem:[#allocation2 + $0x2f8] sm:$0xff] %vm1083_vm0, %v1001_v10 }
 0x1ad   : > { %v1307_v17 = vld [vmem:[#allocation2 + $0xf0] ss:$2 sm:$0xff]  ;;  %v1311_v18 = vld [vmem:[#allocation2 + $0xf1] ss:$2 sm:$0xff]  ;;  %1211 = vst.msk [vmem:[#allocation2 + $0x3f8] sm:$0xff] %vm1083_vm0, %v1081_v12 }
 0x1ae   : > { %v1315_v20 = vmax.f32 %v1307_v17, %v1311_v18  ;;  %v1419_v21 = vld [vmem:[#allocation2 + $0x1f0] ss:$2 sm:$0xff]  ;;  %v1423_v22 = vld [vmem:[#allocation2 + $0x1f1] ss:$2 sm:$0xff] }
 0x1af   : > { %v1427_v38 = vmax.f32 %v1419_v21, %v1423_v22 }
 0x1b0   : > { %v1317_v24 = vmax.f32 %v1313_v19, %v1315_v20 }
 0x1b1   : > { %v1429_v27 = vmax.f32 %v1425_v23, %v1427_v38 }
 0x1b2   : > { %v1319_v30 = vmax.f32 %v1317_v24, 0.0 }
 0x1b3   : > { %v1431_v40 = vmax.f32 %v1429_v27, 0.0  ;;  %v1531_v31 = vld [vmem:[#allocation2 + $0x2f0] ss:$2 sm:$0xff]  ;;  %v1535_v32 = vld [vmem:[#allocation2 + $0x2f1] ss:$2 sm:$0xff] }
 0x1b4   : > { %v1321_v34 = vpack.c.bf16 %v1319_v30, %v1319_v30  ;;  %v1539_v35 = vmax.f32 %v1531_v31, %v1535_v32  ;;  %v1643_v36 = vld [vmem:[#allocation2 + $0x3f0] ss:$2 sm:$0xff]  ;;  %v1647_v37 = vld [vmem:[#allocation2 + $0x3f1] ss:$2 sm:$0xff] }
 0x1b5   : > { %v1433_v41 = vpack.c.bf16 %v1431_v40, %v1431_v40  ;;  %v1651_v42 = vmax.f32 %v1643_v36, %v1647_v37 }
 0x1b6   : > { %1323 = vst.msk [vmem:[%s2304_s15 + $0x1c] sm:$0xf] %vm1237_vm1, %v1321_v34  ;;  %v1541_v43 = vmax.f32 %v1537_v33, %v1539_v35 }
 0x1b7   : > { %1435 = vst.msk [vmem:[%s2304_s15 + $0x3c] sm:$0xf] %vm1237_vm1, %v1433_v41  ;;  %v1653_v44 = vmax.f32 %v1649_v39, %v1651_v42 }
 0x1b8   : > { %v1543_v45 = vmax.f32 %v1541_v43, 0.0 }
 0x1b9   : > { %v1655_v46 = vmax.f32 %v1653_v44, 0.0 }
 0x1ba   : > { %v1545_v47 = vpack.c.bf16 %v1543_v45, %v1543_v45 }
 0x1bb   : > { %v1657_v48 = vpack.c.bf16 %v1655_v46, %v1655_v46 }
 0x1bc   : > { %1547 = vst.msk [vmem:[%s2304_s15 + $0x5c] sm:$0xf] %vm1237_vm1, %v1545_v47 }
 0x1bd   : > { %1659 = vst.msk [vmem:[%s2304_s15 + $0x7c] sm:$0xf] %vm1237_vm1, %v1657_v48 }
 0x1be PF: > { %s13_s12 = sadd.s32 1, %s2127_s12  }
 0x1bf   : > { %p10_p5 = scmp.ge.s32.totalorder %s13_s12, 4  }
 0x1c1   :  { %12 = sbr.rel (!%p10_p5) target bundleno = 1 (0x1), region = 189 }

// kernel: simple_cnn_forward.5
= control target key start
LH: loop header
LB: loop body
LE: loop exit
PB: predicated region body
PF: predicated region fallthrough
CT: control target
= control target key end

     0   :  { %s1594_s12 = smov 0   ;;  %s1968_s0 = inlined_call_operand.vmem [shape: bf16[512,384], index: 0, kind: input, shape index: {}]   ;;  %s1969_s1 = inlined_call_operand.vmem [shape: bf16[384,64], index: 1, kind: input, shape index: {}]   ;;  %s1970_s2 = inlined_call_operand.vmem [shape: f32[1,64], index: 2, kind: input, shape index: {}]   ;;  %s1971_s3 = inlined_call_operand.vmem [shape: bf16[128,64], index: 3, kind: output, shape index: {}]  }
   0x1 LB: > { %s1161_s13 = sadd.s32 4294967295, %s1572_s12   ;;  %p1165_p0 = scmp.ge.s32.totalorder %s1572_s12, 1  ;;  %s1572_s12 = sphi %s1594_s12, %s13_s12  }
   0x2   : > { %p139_p1 = scmp.lt.s32.totalorder %s1572_s12, 3 }
   0x4   : > { %p140_p2 = pnand %p1165_p0, %p139_p1 }
   0x5   : > { %s1166_s5 = sshll.u32 (!%p140_p2), %s1161_s13, 5  ;;  %s1168_s19 = sshll.u32 (!%p140_p2), %s1161_s13, 3 }
   0x6   : > { %143 = sbr.rel (%p140_p2) target bundleno = 380 (0x17c), region = 32  ;;  %p165_p3 = scmp.lt.s32.totalorder (!%p140_p2), %s1166_s5, 63 }
   0x7   : > { %p172_p4 = scmp.lt.s32.totalorder (!%p140_p2), %s1168_s19, 15 }
   0xb   : > { %v1515_v0 = vld [vmem:[%s1969_s1 + $0x38] sm:$0xff]  ;;  %v1514_v3 = vld [vmem:[%s1969_s1 + $0x30] sm:$0xff]  ;;  %v1513_v6 = vld [vmem:[%s1969_s1 + $0x28] sm:$0xff]  ;;  %s1973_s5 = smov (!%p165_p3, %s1166_s5), 63  ;;  %vm960_vm0 = vcmask 523264   ;;  %s1975_s19 = smov (!%p172_p4, %s1168_s19), 15 }
   0xc   : > { %v1608_v1 = vld [vmem:[%s1969_s1 + $0x78] sm:$0xff]  ;;  %693 = vmatpush.bf16.msra.mxu0 %v1515_v0  ;;  %1532 = vmatpush.bf16.msra.mxu3 %v1515_v0  ;;  %v1623_v4 = vld [vmem:[%s1969_s1 + $0x70] sm:$0xff]  ;;  %v1638_v7 = vld [vmem:[%s1969_s1 + $0x68] sm:$0xff]  ;;  %s1556_s22 = smul.u32 12, %s1973_s5  ;;  %s1169_s13 = sshll.u32 %s1975_s19, 2  ;;  %vm1005_vm1 = vcmask 519168  }
   0xd   : > { %v1613_v2 = vld [vmem:[%s1969_s1 + $0xb8] sm:$0xff]  ;;  %782 = vmatpush.bf16.msra.mxu1 %v1608_v1  ;;  %v1628_v5 = vld [vmem:[%s1969_s1 + $0xb0] sm:$0xff]  ;;  %v1643_v8 = vld [vmem:[%s1969_s1 + $0xa8] sm:$0xff] }
   0xe   : > { %871 = vmatpush.bf16.msra.mxu2 %v1613_v2  ;;  %v1512_v9 = vld [vmem:[%s1969_s1 + $0x20] sm:$0xff]  ;;  %v1511_v12 = vld [vmem:[%s1969_s1 + $0x18] sm:$0xff]  ;;  %v1510_v15 = vld [vmem:[%s1969_s1 + $0x10] sm:$0xff]  ;;  %s1693_s4 = scalar_lea.vmem %s1968_s0, %s1556_s22  ;;  %s1858_s22 = scalar_lea.vmem %s1971_s3, %s1169_s13 }
   0xf   : > { %v1655_v10 = vld [vmem:[%s1969_s1 + $0x60] sm:$0xff]  ;;  %v1519_v13 = vld [vmem:[%s1969_s1 + $0x58] sm:$0xff]  ;;  %v1518_v16 = vld [vmem:[%s1969_s1 + $0x50] sm:$0xff] }
  0x10   : > { %694 = vmatpush.bf16.msra.mxu0 %v1514_v3  ;;  %1533 = vmatpush.bf16.msra.mxu3 %v1514_v3  ;;  %v1660_v11 = vld [vmem:[%s1969_s1 + $0xa0] sm:$0xff]  ;;  %v1673_v14 = vld [vmem:[%s1969_s1 + $0x98] sm:$0xff]  ;;  %v1685_v17 = vld [vmem:[%s1969_s1 + $0x90] sm:$0xff] }
  0x11   : > { %783 = vmatpush.bf16.msra.mxu1 %v1623_v4  ;;  %v1509_v18 = vld [vmem:[%s1969_s1 + $0x8] sm:$0xff]  ;;  %v1508_v21 = vld [vmem:[%s1969_s1] sm:$0xff]  ;;  %v1174_v29 = vld [vmem:[%s1693_s4 + $0xc] sm:$0xf0] }
  0x12   : > { %872 = vmatpush.bf16.msra.mxu2 %v1628_v5  ;;  %v1517_v19 = vld [vmem:[%s1969_s1 + $0x48] sm:$0xff]  ;;  %v1516_v22 = vld [vmem:[%s1969_s1 + $0x40] sm:$0xff]  ;;  %v1462_v31 = vld [vmem:[%s1693_s4 + $0x10] sm:$0xf0] }
  0x13   : > { %v1702_v20 = vld [vmem:[%s1969_s1 + $0x88] sm:$0xff]  ;;  %v1713_v23 = vld [vmem:[%s1969_s1 + $0x80] sm:$0xff]  ;;  %v1184_v36 = vld [vmem:[%s1693_s4 + $0x18] sm:$0xf] }
  0x14   : > { %695 = vmatpush.bf16.msra.mxu0 %v1513_v6  ;;  %1534 = vmatpush.bf16.msra.mxu3 %v1513_v6  ;;  %v1172_v24 = vld [vmem:[%s1693_s4] sm:$0xf]  ;;  %v1461_v25 = vld [vmem:[%s1693_s4 + $0x8] sm:$0xf0]  ;;  %v1460_v28 = vld [vmem:[%s1693_s4 + $0x4] sm:$0xf] }
  0x15   : > { %784 = vmatpush.bf16.msra.mxu1 %v1638_v7  ;;  %v1316_v26 = vld [vmem:[%s1693_s4 + $0x120] sm:$0xf]  ;;  %v1497_v27 = vld [vmem:[%s1693_s4 + $0x128] sm:$0xf0]  ;;  %v1180_v30 = vld [vmem:[%s1693_s4 + $0x8] sm:$0xf]  ;;  %v1173_v32 = vor.u32 %v1461_v25, %v1172_v24  ;;  %v1177_v34 = vor.u32 %v1460_v28, %v1174_v29 }
  0x16   : > { %873 = vmatpush.bf16.msra.mxu2 %v1643_v8  ;;  %v1317_v33 = vor.u32 %v1497_v27, %v1316_v26  ;;  %v1181_v35 = vor.u32 %v1462_v31, %v1180_v30  ;;  %v1464_v37 = vld [vmem:[%s1693_s4 + $0x20] sm:$0xf0]  ;;  %v1328_v38 = vld [vmem:[%s1693_s4 + $0x138] sm:$0xf]  ;;  %v1463_v40 = vld [vmem:[%s1693_s4 + $0x1c] sm:$0xf] }
  0x17   : > { %v1500_v39 = vld [vmem:[%s1693_s4 + $0x140] sm:$0xf0]  ;;  %v1186_v41 = vld [vmem:[%s1693_s4 + $0x24] sm:$0xf0]  ;;  %v1192_v42 = vld [vmem:[%s1693_s4 + $0x20] sm:$0xf]  ;;  %v1185_v44 = vor.u32 %v1464_v37, %v1184_v36 }
  0x18   : > { %696 = vmatpush.bf16.msra.mxu0 %v1512_v9  ;;  %1535 = vmatpush.bf16.msra.mxu3 %v1512_v9  ;;  %v1465_v43 = vld [vmem:[%s1693_s4 + $0x28] sm:$0xf0]  ;;  %v1329_v45 = vor.u32 %v1500_v39, %v1328_v38  ;;  %v1189_v46 = vor.u32 %v1463_v40, %v1186_v41  ;;  %v1196_v48 = vld [vmem:[%s1693_s4 + $0x30] sm:$0xf]  ;;  %v1467_v49 = vld [vmem:[%s1693_s4 + $0x38] sm:$0xf0] }
  0x19   : > { %785 = vmatpush.bf16.msra.mxu1 %v1655_v10  ;;  %v1193_v47 = vor.u32 %v1465_v43, %v1192_v42  ;;  %v1340_v50 = vld [vmem:[%s1693_s4 + $0x150] sm:$0xf]  ;;  %v1503_v51 = vld [vmem:[%s1693_s4 + $0x158] sm:$0xf0]  ;;  %v1466_v52 = vld [vmem:[%s1693_s4 + $0x34] sm:$0xf]  ;;  %v1197_v56 = vor.u32 %v1467_v49, %v1196_v48 }
  0x1a   : > { %874 = vmatpush.bf16.msra.mxu2 %v1660_v11  ;;  %v1198_v53 = vld [vmem:[%s1693_s4 + $0x3c] sm:$0xf0]  ;;  %v1204_v54 = vld [vmem:[%s1693_s4 + $0x38] sm:$0xf]  ;;  %v1468_v55 = vld [vmem:[%s1693_s4 + $0x40] sm:$0xf0]  ;;  %v1341_v57 = vor.u32 %v1503_v51, %v1340_v50 }
  0x1b   : > { %v1201_v58 = vor.u32 %v1466_v52, %v1198_v53  ;;  %v1205_v59 = vor.u32 %v1468_v55, %v1204_v54  ;;  %v1208_v60 = vld [vmem:[%s1693_s4 + $0x48] sm:$0xf]  ;;  %v1470_v61 = vld [vmem:[%s1693_s4 + $0x50] sm:$0xf0]  ;;  %v1469_v0 = vld [vmem:[%s1693_s4 + $0x4c] sm:$0xf] }
  0x1c   : > { %697 = vmatpush.bf16.msra.mxu0 %v1511_v12  ;;  %1536 = vmatpush.bf16.msra.mxu3 %v1511_v12  ;;  %v1352_v62 = vld [vmem:[%s1693_s4 + $0x168] sm:$0xf]  ;;  %v1506_v63 = vld [vmem:[%s1693_s4 + $0x170] sm:$0xf0]  ;;  %v1471_v3 = vld [vmem:[%s1693_s4 + $0x58] sm:$0xf0] }
  0x1d   : > { %786 = vmatpush.bf16.msra.mxu1 %v1519_v13  ;;  %v1473_v9 = vld [vmem:[%s1693_s4 + $0x68] sm:$0xf0]  ;;  %v1318_v12 = vld [vmem:[%s1693_s4 + $0x12c] sm:$0xf0]  ;;  %v1499_v24 = vld [vmem:[%s1693_s4 + $0x13c] sm:$0xf] }
  0x1e   : > { %875 = vmatpush.bf16.msra.mxu2 %v1673_v14  ;;  %v1330_v25 = vld [vmem:[%s1693_s4 + $0x144] sm:$0xf0]  ;;  %v1240_v26 = vld [vmem:[%s1693_s4 + $0x80] sm:$0xf]  ;;  %v1477_v27 = vld [vmem:[%s1693_s4 + $0x88] sm:$0xf0] }
  0x1f   : > { %v1333_v29 = vor.u32 %v1499_v24, %v1330_v25  ;;  %v1241_v31 = vor.u32 %v1477_v27, %v1240_v26  ;;  %v1342_v36 = vld [vmem:[%s1693_s4 + $0x15c] sm:$0xf0]  ;;  %v1252_v38 = vld [vmem:[%s1693_s4 + $0x98] sm:$0xf]  ;;  %v1480_v39 = vld [vmem:[%s1693_s4 + $0xa0] sm:$0xf0] }
  0x20   : > { %698 = vmatpush.bf16.msra.mxu0 %v1510_v15  ;;  %1537 = vmatpush.bf16.msra.mxu3 %v1510_v15  ;;  %v1474_v15 = vld [vmem:[%s1693_s4 + $0x70] sm:$0xf0]  ;;  %v1246_v37 = vld [vmem:[%s1693_s4 + $0x9c] sm:$0xf0]  ;;  %v1253_v43 = vor.u32 %v1480_v39, %v1252_v38  ;;  %v1354_v48 = vld [vmem:[%s1693_s4 + $0x174] sm:$0xf0] }
  0x21   : > { %787 = vmatpush.bf16.msra.mxu1 %v1518_v16  ;;  %v1258_v49 = vld [vmem:[%s1693_s4 + $0xb4] sm:$0xf0]  ;;  %v1264_v50 = vld [vmem:[%s1693_s4 + $0xb0] sm:$0xf]  ;;  %v1483_v51 = vld [vmem:[%s1693_s4 + $0xb8] sm:$0xf0] }
  0x22   : > { %876 = vmatpush.bf16.msra.mxu2 %v1685_v17  ;;  %v1265_v55 = vor.u32 %v1483_v51, %v1264_v50 }
  0x24   : > { %699 = vmatpush.bf16.msra.mxu0 %v1509_v18  ;;  %1538 = vmatpush.bf16.msra.mxu3 %v1509_v18 }
  0x25   : > { %788 = vmatpush.bf16.msra.mxu1 %v1517_v19 }
  0x26   : > { %877 = vmatpush.bf16.msra.mxu2 %v1702_v20 }
  0x28   : > { %700 = vmatpush.bf16.msra.mxu0 %v1508_v21  ;;  %1539 = vmatpush.bf16.msra.mxu3 %v1508_v21  ;;  %v1476_v21 = vld [vmem:[%s1693_s4 + $0x80] sm:$0xf0] }
  0x29   : > { %789 = vmatpush.bf16.msra.mxu1 %v1516_v22 }
  0x2a   : > { %878 = vmatpush.bf16.msra.mxu2 %v1713_v23 }
  0x2b   : > { %701 = vmatmul.bf16.vlgmr.msra.gmra.mxu0 %v1173_v32  ;;  %761 = vmatmul.bf16.vlgmr.msra.gmra.mxu3 %v1317_v33  ;;  %v1244_v32 = vld [vmem:[%s1693_s4 + $0x90] sm:$0xf]  ;;  %v1479_v33 = vld [vmem:[%s1693_s4 + $0x98] sm:$0xf0] }
  0x2c   : > { %1540 = vmatpush.bf16.msrb.mxu3 %v1608_v1  ;;  %790 = vmatmul.bf16.vlgmr.msra.gmra.mxu1 %v1177_v34  ;;  %v1210_v1 = vld [vmem:[%s1693_s4 + $0x54] sm:$0xf0]  ;;  %v1478_v34 = vld [vmem:[%s1693_s4 + $0x94] sm:$0xf]  ;;  %v1245_v40 = vor.u32 %v1479_v33, %v1244_v32 }
  0x2d   : > { %879 = vmatmul.bf16.vlgmr.msra.gmra.mxu2 %v1181_v35  ;;  %v1213_v6 = vor.u32 %v1469_v0, %v1210_v1  ;;  %v1502_v35 = vld [vmem:[%s1693_s4 + $0x154] sm:$0xf]  ;;  %v1249_v42 = vor.u32 %v1478_v34, %v1246_v37 }
  0x2e   : > { %v1345_v41 = vor.u32 %v1502_v35, %v1342_v36  ;;  %v1486_v0 = vld [vmem:[%s1693_s4 + $0xd0] sm:$0xf0] }
  0x30   : > { %1541 = vmatpush.bf16.msrb.mxu3 %v1623_v4  ;;  %v1209_v4 = vor.u32 %v1470_v61, %v1208_v60  ;;  %v1324_v60 = vld [vmem:[%s1693_s4 + $0x128] sm:$0xf]  ;;  %v1498_v61 = vld [vmem:[%s1693_s4 + $0x130] sm:$0xf0] }
  0x34   : > { %1542 = vmatpush.bf16.msrb.mxu3 %v1638_v7 }
  0x38   : > { %1543 = vmatpush.bf16.msrb.mxu3 %v1655_v10  ;;  %v1472_v10 = vld [vmem:[%s1693_s4 + $0x64] sm:$0xf] }
  0x3b   : > { %706 = vmatmul.bf16.gmra.mxu0 %v1185_v44  ;;  %766 = vmatmul.bf16.gmra.mxu3 %v1329_v45  ;;  %v1256_v44 = vld [vmem:[%s1693_s4 + $0xa8] sm:$0xf]  ;;  %v1482_v45 = vld [vmem:[%s1693_s4 + $0xb0] sm:$0xf0] }
  0x3c   : > { %1544 = vmatpush.bf16.msrb.mxu3 %v1519_v13  ;;  %795 = vmatmul.bf16.gmra.mxu1 %v1189_v46  ;;  %v1222_v13 = vld [vmem:[%s1693_s4 + $0x6c] sm:$0xf0]  ;;  %v1481_v46 = vld [vmem:[%s1693_s4 + $0xac] sm:$0xf]  ;;  %v1257_v52 = vor.u32 %v1482_v45, %v1256_v44  ;;  %v1348_v44 = vld [vmem:[%s1693_s4 + $0x158] sm:$0xf] }
  0x3d   : > { %884 = vmatmul.bf16.gmra.mxu2 %v1193_v47  ;;  %v1225_v18 = vor.u32 %v1472_v10, %v1222_v13  ;;  %v1505_v47 = vld [vmem:[%s1693_s4 + $0x16c] sm:$0xf]  ;;  %v1261_v54 = vor.u32 %v1481_v46, %v1258_v49  ;;  %v1504_v45 = vld [vmem:[%s1693_s4 + $0x160] sm:$0xf0]  ;;  %v1294_v46 = vld [vmem:[%s1693_s4 + $0xfc] sm:$0xf0] }
  0x3e   : > { %v1357_v53 = vor.u32 %v1505_v47, %v1354_v48  ;;  %v1300_v47 = vld [vmem:[%s1693_s4 + $0xf8] sm:$0xf]  ;;  %v1492_v48 = vld [vmem:[%s1693_s4 + $0x100] sm:$0xf0] }
  0x40   : > { %1545 = vmatpush.bf16.msrb.mxu3 %v1518_v16 }
  0x44   : > { %1546 = vmatpush.bf16.msrb.mxu3 %v1517_v19 }
  0x48   : > { %1547 = vmatpush.bf16.msrb.mxu3 %v1516_v22  ;;  %v1475_v22 = vld [vmem:[%s1693_s4 + $0x7c] sm:$0xf] }
  0x4b   : > { %711 = vmatmul.bf16.gmra.mxu0 %v1197_v56  ;;  %771 = vmatmul.bf16.gmra.mxu3 %v1341_v57  ;;  %v1796_v56 = vld [vmem:[%s1970_s2] ss:$0 sm:$0xff] }
  0x4c   : > { %1548 = vmatpush.bf16.msra.mxu3 %v1613_v2  ;;  %800 = vmatmul.bf16.gmra.mxu1 %v1201_v58  ;;  %v1216_v2 = vld [vmem:[%s1693_s4 + $0x50] sm:$0xf]  ;;  %v1268_v57 = vld [vmem:[%s1693_s4 + $0xc0] sm:$0xf]  ;;  %v1485_v58 = vld [vmem:[%s1693_s4 + $0xc8] sm:$0xf0] }
  0x4d   : > { %889 = vmatmul.bf16.gmra.mxu2 %v1205_v59  ;;  %v1217_v7 = vor.u32 %v1471_v3, %v1216_v2  ;;  %v1484_v59 = vld [vmem:[%s1693_s4 + $0xc4] sm:$0xf]  ;;  %v1269_v1 = vor.u32 %v1485_v58, %v1268_v57  ;;  %v1325_v2 = vor.u32 %v1498_v61, %v1324_v60  ;;  %v1301_v58 = vor.u32 %v1492_v48, %v1300_v47 }
  0x50   : > { %1549 = vmatpush.bf16.msra.mxu3 %v1628_v5  ;;  %v1353_v5 = vor.u32 %v1506_v63, %v1352_v62  ;;  %v1270_v62 = vld [vmem:[%s1693_s4 + $0xcc] sm:$0xf0]  ;;  %v1276_v63 = vld [vmem:[%s1693_s4 + $0xc8] sm:$0xf] }
  0x54   : > { %1550 = vmatpush.bf16.msra.mxu3 %v1643_v8  ;;  %v1220_v8 = vld [vmem:[%s1693_s4 + $0x60] sm:$0xf] }
  0x55   : > { %v1221_v16 = vor.u32 %v1473_v9, %v1220_v8 }
  0x58   : > { %1551 = vmatpush.bf16.msra.mxu3 %v1660_v11  ;;  %v1496_v11 = vld [vmem:[%s1693_s4 + $0x124] sm:$0xf] }
  0x5b   : > { %716 = vmatmul.bf16.gmra.mxu0 %v1209_v4  ;;  %776 = vmatmul.bf16.gmra.mxu3 %v1353_v5  ;;  %v1273_v4 = vor.u32 %v1484_v59, %v1270_v62  ;;  %v1277_v5 = vor.u32 %v1486_v0, %v1276_v63 }
  0x5c   : > { %1552 = vmatpush.bf16.msra.mxu3 %v1673_v14  ;;  %805 = vmatmul.bf16.gmra.mxu1 %v1213_v6  ;;  %v1228_v14 = vld [vmem:[%s1693_s4 + $0x68] sm:$0xf] }
  0x5d   : > { %894 = vmatmul.bf16.gmra.mxu2 %v1217_v7  ;;  %v1229_v19 = vor.u32 %v1474_v15, %v1228_v14  ;;  %v1280_v15 = vld [vmem:[%s1693_s4 + $0xd8] sm:$0xf] }
  0x60   : > { %1553 = vmatpush.bf16.msra.mxu3 %v1685_v17  ;;  %v1321_v17 = vor.u32 %v1496_v11, %v1318_v12 }
  0x64   : > { %1554 = vmatpush.bf16.msra.mxu3 %v1702_v20  ;;  %v1232_v20 = vld [vmem:[%s1693_s4 + $0x78] sm:$0xf] }
  0x65   : > { %v1233_v28 = vor.u32 %v1476_v21, %v1232_v20  ;;  %v1282_v20 = vld [vmem:[%s1693_s4 + $0xe4] sm:$0xf0]  ;;  %v1288_v21 = vld [vmem:[%s1693_s4 + $0xe0] sm:$0xf] }
  0x68   : > { %1555 = vmatpush.bf16.msra.mxu3 %v1713_v23  ;;  %v1234_v23 = vld [vmem:[%s1693_s4 + $0x84] sm:$0xf0] }
  0x69   : > { %v1237_v30 = vor.u32 %v1475_v22, %v1234_v23  ;;  %v1489_v22 = vld [vmem:[%s1693_s4 + $0xe8] sm:$0xf0] }
  0x6b   : > { %721 = vmatmul.bf16.gmra.mxu0 %v1221_v16  ;;  %850 = vmatmul.bf16.vlgmr.msrb.gmra.mxu3 %v1321_v17  ;;  %v1488_v16 = vld [vmem:[%s1693_s4 + $0xe0] sm:$0xf0]  ;;  %v1487_v17 = vld [vmem:[%s1693_s4 + $0xdc] sm:$0xf] }
  0x6c   : > { %810 = vmatmul.bf16.gmra.mxu1 %v1225_v18  ;;  %v1336_v18 = vld [vmem:[%s1693_s4 + $0x140] sm:$0xf]  ;;  %v1281_v26 = vor.u32 %v1488_v16, %v1280_v15  ;;  %v1360_v15 = vld [vmem:[%s1693_s4 + $0x170] sm:$0xf]  ;;  %v1507_v16 = vld [vmem:[%s1693_s4 + $0x178] sm:$0xf0] }
  0x6d   : > { %899 = vmatmul.bf16.gmra.mxu2 %v1229_v19  ;;  %v1501_v19 = vld [vmem:[%s1693_s4 + $0x148] sm:$0xf0] }
  0x6e   : > { %v1337_v27 = vor.u32 %v1501_v19, %v1336_v18  ;;  %v1312_v18 = vld [vmem:[%s1693_s4 + $0x110] sm:$0xf]  ;;  %v1495_v19 = vld [vmem:[%s1693_s4 + $0x118] sm:$0xf0] }
  0x7b   : > { %726 = vmatmul.bf16.gmra.mxu0 %v1233_v28  ;;  %855 = vmatmul.bf16.gmra.mxu3 %v1333_v29 }
  0x7c   : > { %815 = vmatmul.bf16.gmra.mxu1 %v1237_v30  ;;  %v1285_v30 = vor.u32 %v1487_v17, %v1282_v20  ;;  %v1306_v17 = vld [vmem:[%s1693_s4 + $0x114] sm:$0xf0] }
  0x7d   : > { %904 = vmatmul.bf16.gmra.mxu2 %v1241_v31  ;;  %v1289_v31 = vor.u32 %v1489_v22, %v1288_v21 }
  0x8b   : > { %731 = vmatmul.bf16.gmra.mxu0 %v1245_v40  ;;  %860 = vmatmul.bf16.gmra.mxu3 %v1345_v41  ;;  %v1292_v41 = vld [vmem:[%s1693_s4 + $0xf0] sm:$0xf] }
  0x8c   : > { %820 = vmatmul.bf16.gmra.mxu1 %v1249_v42  ;;  %v1491_v42 = vld [vmem:[%s1693_s4 + $0xf8] sm:$0xf0] }
  0x8d   : > { %909 = vmatmul.bf16.gmra.mxu2 %v1253_v43  ;;  %v1490_v43 = vld [vmem:[%s1693_s4 + $0xf4] sm:$0xf] }
  0x8e   : > { %v1297_v57 = vor.u32 %v1490_v43, %v1294_v46 }
  0x9b   : > { %736 = vmatmul.bf16.gmra.mxu0 %v1257_v52  ;;  %865 = vmatmul.bf16.gmra.mxu3 %v1357_v53  ;;  %v1293_v52 = vor.u32 %v1491_v42, %v1292_v41  ;;  %v1349_v53 = vor.u32 %v1504_v45, %v1348_v44 }
  0x9c   : > { %825 = vmatmul.bf16.gmra.mxu1 %v1261_v54 }
  0x9d   : > { %914 = vmatmul.bf16.gmra.mxu2 %v1265_v55 }
  0xa8   : > { %v702_v3 = vpop.f32.mrf.mxu0 }
  0xa9   : > { %v703_v6 = vadd.f32 %v1796_v56, %v702_v3  ;;  %v791_v7 = vpop.f32.mrf.mxu1 }
  0xab   : > { %741 = vmatmul.bf16.gmra.mxu0 %v1269_v1  ;;  %939 = vmatmul.bf16.vlgmr.msra.gmra.mxu3 %v1325_v2  ;;  %v792_v8 = vadd.f32 %v791_v7, %v703_v6 }
  0xac   : > { %830 = vmatmul.bf16.gmra.mxu1 %v1273_v4 }
  0xad   : > { %919 = vmatmul.bf16.gmra.mxu2 %v1277_v5 }
  0xae   : > { %v1807_v9 = vpop.f32.mrf.mxu3 }
  0xb0   : > { %v880_v10 = vpop.f32.mrf.mxu2  ;;  %v704_v12 = vpop.f32.mrf.mxu0 }
  0xb1   : > { %v881_v11 = vadd.f32 %v880_v10, %v792_v8  ;;  %v793_v13 = vpop.f32.mrf.mxu1  ;;  %v705_v14 = vadd.f32 %v1796_v56, %v704_v12  ;;  %v1494_v12 = vld [vmem:[%s1693_s4 + $0x110] sm:$0xf0] }
  0xb3   : > { %961 = vst.msk [vmem:[#allocation2] sm:$0xff] %vm960_vm0, %v881_v11  ;;  %v794_v24 = vadd.f32 %v793_v13, %v705_v14  ;;  %v1304_v11 = vld [vmem:[%s1693_s4 + $0x108] sm:$0xf]  ;;  %v1493_v14 = vld [vmem:[%s1693_s4 + $0x10c] sm:$0xf] }
  0xb6   : > { %v1819_v25 = vpop.f32.mrf.mxu3 }
  0xb8   : > { %v882_v23 = vpop.f32.mrf.mxu2  ;;  %v707_v29 = vpop.f32.mrf.mxu0 }
  0xb9   : > { %v883_v28 = vadd.f32 %v882_v23, %v794_v24  ;;  %v708_v32 = vadd.f32 %v1796_v56, %v707_v29  ;;  %v796_v33 = vpop.f32.mrf.mxu1  ;;  %v1305_v23 = vor.u32 %v1494_v12, %v1304_v11 }
  0xbb   : > { %962 = vst.msk [vmem:[#allocation2 + $0x8] sm:$0xff] %vm960_vm0, %v883_v28  ;;  %746 = vmatmul.bf16.gmra.mxu0 %v1281_v26  ;;  %944 = vmatmul.bf16.gmra.mxu3 %v1337_v27  ;;  %v797_v34 = vadd.f32 %v796_v33, %v708_v32  ;;  %v1361_v26 = vor.u32 %v1507_v16, %v1360_v15 }
  0xbc   : > { %835 = vmatmul.bf16.gmra.mxu1 %v1285_v30  ;;  %v1309_v30 = vor.u32 %v1493_v14, %v1306_v17 }
  0xbd   : > { %924 = vmatmul.bf16.gmra.mxu2 %v1289_v31  ;;  %v1313_v31 = vor.u32 %v1495_v19, %v1312_v18 }
  0xbe   : > { %v1823_v35 = vpop.f32.mrf.mxu3 }
  0xc0   : > { %v885_v36 = vpop.f32.mrf.mxu2  ;;  %v709_v38 = vpop.f32.mrf.mxu0 }
  0xc1   : > { %v886_v37 = vadd.f32 %v885_v36, %v797_v34  ;;  %v798_v39 = vpop.f32.mrf.mxu1  ;;  %v710_v40 = vadd.f32 %v1796_v56, %v709_v38 }
  0xc2   : > { %v993_v63 = vld [vmem:[#allocation2] ss:$2 sm:$0xff]  ;;  %v995_v0 = vld [vmem:[#allocation2 + $0x1] ss:$2 sm:$0xff] }
  0xc3   : > { %963 = vst.msk [vmem:[#allocation2 + $0x10] sm:$0xff] %vm960_vm0, %v886_v37  ;;  %v799_v49 = vadd.f32 %v798_v39, %v710_v40  ;;  %v1000_v7 = vmax.f32 %v993_v63, %v995_v0 }
  0xc6   : > { %v1835_v50 = vpop.f32.mrf.mxu3 }
  0xc8   : > { %v887_v51 = vpop.f32.mrf.mxu2  ;;  %v712_v55 = vpop.f32.mrf.mxu0 }
  0xc9   : > { %v888_v54 = vadd.f32 %v887_v51, %v799_v49  ;;  %v713_v59 = vadd.f32 %v1796_v56, %v712_v55  ;;  %v801_v60 = vpop.f32.mrf.mxu1 }
  0xcb   : > { %964 = vst.msk [vmem:[#allocation2 + $0x18] sm:$0xff] %vm960_vm0, %v888_v54  ;;  %751 = vmatmul.bf16.gmra.mxu0 %v1293_v52  ;;  %949 = vmatmul.bf16.gmra.mxu3 %v1349_v53  ;;  %v802_v61 = vadd.f32 %v801_v60, %v713_v59 }
  0xcc   : > { %840 = vmatmul.bf16.gmra.mxu1 %v1297_v57 }
  0xcd   : > { %929 = vmatmul.bf16.gmra.mxu2 %v1301_v58 }
  0xce   : > { %v1841_v62 = vpop.f32.mrf.mxu3 }
  0xd0   : > { %v890_v1 = vpop.f32.mrf.mxu2  ;;  %v714_v3 = vpop.f32.mrf.mxu0 }
  0xd1   : > { %v891_v2 = vadd.f32 %v890_v1, %v802_v61  ;;  %v803_v6 = vpop.f32.mrf.mxu1  ;;  %v715_v10 = vadd.f32 %v1796_v56, %v714_v3 }
  0xd2   : > { %v997_v4 = vld [vmem:[#allocation2 + $0x10] ss:$2 sm:$0xff]  ;;  %v999_v5 = vld [vmem:[#allocation2 + $0x11] ss:$2 sm:$0xff] }
  0xd3   : > { %v1001_v8 = vmax.f32 %v997_v4, %v999_v5  ;;  %965 = vst.msk [vmem:[#allocation2 + $0x20] sm:$0xff] %vm960_vm0, %v891_v2  ;;  %v804_v21 = vadd.f32 %v803_v6, %v715_v10 }
  0xd5   : > { %v1002_v13 = vmax.f32 %v1000_v7, %v1001_v8 }
  0xd6   : > { %v1853_v22 = vpop.f32.mrf.mxu3 }
  0xd7   : > { %v1003_v20 = vmax.f32 %v1002_v13, 0.0 }
  0xd8   : > { %v892_v24 = vpop.f32.mrf.mxu2  ;;  %v717_v29 = vpop.f32.mrf.mxu0 }
  0xd9   : > { %v1004_v27 = vpack.c.bf16 %v1003_v20, %v1003_v20  ;;  %v893_v28 = vadd.f32 %v892_v24, %v804_v21  ;;  %v718_v32 = vadd.f32 %v1796_v56, %v717_v29  ;;  %v806_v33 = vpop.f32.mrf.mxu1 }
  0xdb   : > { %1006 = vst.msk [vmem:[%s1858_s22] sm:$0xf] %vm1005_vm1, %v1004_v27  ;;  %756 = vmatmul.bf16.gmra.mxu0 %v1305_v23  ;;  %954 = vmatmul.bf16.gmra.mxu3 %v1361_v26  ;;  %v807_v34 = vadd.f32 %v806_v33, %v718_v32 }
  0xdc   : > { %966 = vst.msk [vmem:[#allocation2 + $0x28] sm:$0xff] %vm960_vm0, %v893_v28  ;;  %845 = vmatmul.bf16.gmra.mxu1 %v1309_v30 }
  0xdd   : > { %934 = vmatmul.bf16.gmra.mxu2 %v1313_v31 }
  0xde   : > { %v1864_v36 = vpop.f32.mrf.mxu3 }
  0xe0   : > { %v895_v37 = vpop.f32.mrf.mxu2  ;;  %v719_v39 = vpop.f32.mrf.mxu0 }
  0xe1   : > { %v896_v38 = vadd.f32 %v895_v37, %v807_v34  ;;  %v808_v40 = vpop.f32.mrf.mxu1  ;;  %v720_v41 = vadd.f32 %v1796_v56, %v719_v39 }
  0xe3   : > { %967 = vst.msk [vmem:[#allocation2 + $0x30] sm:$0xff] %vm960_vm0, %v896_v38  ;;  %v809_v42 = vadd.f32 %v808_v40, %v720_v41  ;;  %v1008_v52 = vld [vmem:[#allocation2 + $0x20] ss:$2 sm:$0xff]  ;;  %v1010_v53 = vld [vmem:[#allocation2 + $0x21] ss:$2 sm:$0xff] }
  0xe4   : > { %v1015_v61 = vmax.f32 %v1008_v52, %v1010_v53 }
  0xe6   : > { %v1868_v43 = vpop.f32.mrf.mxu3 }
  0xe8   : > { %v897_v44 = vpop.f32.mrf.mxu2  ;;  %v722_v46 = vpop.f32.mrf.mxu0 }
  0xe9   : > { %v898_v45 = vadd.f32 %v897_v44, %v809_v42  ;;  %v723_v47 = vadd.f32 %v1796_v56, %v722_v46  ;;  %v811_v48 = vpop.f32.mrf.mxu1 }
  0xeb   : > { %968 = vst.msk [vmem:[#allocation2 + $0x38] sm:$0xff] %vm960_vm0, %v898_v45  ;;  %v812_v49 = vadd.f32 %v811_v48, %v723_v47  ;;  %v775_v45 = vadd.f32 %v1796_v56, %v1853_v22 }
  0xee   : > { %v1872_v51 = vpop.f32.mrf.mxu3 }
  0xf0   : > { %v900_v54 = vpop.f32.mrf.mxu2  ;;  %v724_v57 = vpop.f32.mrf.mxu0 }
  0xf1   : > { %v901_v55 = vadd.f32 %v900_v54, %v812_v49  ;;  %v813_v60 = vpop.f32.mrf.mxu1  ;;  %v725_v0 = vadd.f32 %v1796_v56, %v724_v57 }
  0xf2   : > { %v1012_v58 = vld [vmem:[#allocation2 + $0x30] ss:$2 sm:$0xff]  ;;  %v1014_v59 = vld [vmem:[#allocation2 + $0x31] ss:$2 sm:$0xff] }
  0xf3   : > { %v1016_v63 = vmax.f32 %v1012_v58, %v1014_v59  ;;  %969 = vst.msk [vmem:[#allocation2 + $0x40] sm:$0xff] %vm960_vm0, %v901_v55  ;;  %v814_v3 = vadd.f32 %v813_v60, %v725_v0 }
  0xf5   : > { %v1017_v1 = vmax.f32 %v1015_v61, %v1016_v63 }
  0xf6   : > { %v1876_v4 = vpop.f32.mrf.mxu3 }
  0xf7   : > { %v1018_v2 = vmax.f32 %v1017_v1, 0.0 }
  0xf8   : > { %v902_v5 = vpop.f32.mrf.mxu2  ;;  %v727_v8 = vpop.f32.mrf.mxu0 }
  0xf9   : > { %v1019_v6 = vpack.c.bf16 %v1018_v2, %v1018_v2  ;;  %v903_v7 = vadd.f32 %v902_v5, %v814_v3  ;;  %v728_v10 = vadd.f32 %v1796_v56, %v727_v8  ;;  %v816_v11 = vpop.f32.mrf.mxu1 }
  0xfb   : > { %1020 = vst.msk [vmem:[%s1858_s22 + $0x4] sm:$0xf] %vm1005_vm1, %v1019_v6  ;;  %v817_v12 = vadd.f32 %v816_v11, %v728_v10  ;;  %v763_v11 = vadd.f32 %v1796_v56, %v1807_v9 }
  0xfc   : > { %970 = vst.msk [vmem:[#allocation2 + $0x48] sm:$0xff] %vm960_vm0, %v903_v7 }
  0xfe   : > { %v1882_v13 = vpop.f32.mrf.mxu3 }
 0x100   : > { %v905_v14 = vpop.f32.mrf.mxu2  ;;  %v729_v16 = vpop.f32.mrf.mxu0 }
 0x101   : > { %v906_v15 = vadd.f32 %v905_v14, %v817_v12  ;;  %v818_v17 = vpop.f32.mrf.mxu1  ;;  %v730_v18 = vadd.f32 %v1796_v56, %v729_v16  ;;  %v852_v14 = vadd.f32 %v1872_v51, %v763_v11  ;;  %v765_v51 = vadd.f32 %v1796_v56, %v1819_v25 }
 0x102   : > { %v768_v25 = vadd.f32 %v1796_v56, %v1823_v35  ;;  %v770_v35 = vadd.f32 %v1796_v56, %v1835_v50 }
 0x103   : > { %971 = vst.msk [vmem:[#allocation2 + $0x50] sm:$0xff] %vm960_vm0, %v906_v15  ;;  %v819_v19 = vadd.f32 %v818_v17, %v730_v18  ;;  %v1022_v30 = vld [vmem:[#allocation2 + $0x40] ss:$2 sm:$0xff]  ;;  %v1024_v31 = vld [vmem:[#allocation2 + $0x41] ss:$2 sm:$0xff] }
 0x104   : > { %v1029_v40 = vmax.f32 %v1022_v30, %v1024_v31 }
 0x106   : > { %v1886_v20 = vpop.f32.mrf.mxu3 }
 0x108   : > { %v907_v21 = vpop.f32.mrf.mxu2  ;;  %v732_v23 = vpop.f32.mrf.mxu0 }
 0x109   : > { %v908_v24 = vadd.f32 %v907_v21, %v819_v19  ;;  %v733_v26 = vadd.f32 %v1796_v56, %v732_v23  ;;  %v821_v27 = vpop.f32.mrf.mxu1 }
 0x10b   : > { %972 = vst.msk [vmem:[#allocation2 + $0x58] sm:$0xff] %vm960_vm0, %v908_v24  ;;  %v822_v28 = vadd.f32 %v821_v27, %v733_v26 }
 0x10e   : > { %v1890_v29 = vpop.f32.mrf.mxu3 }
 0x110   : > { %v910_v32 = vpop.f32.mrf.mxu2  ;;  %v734_v34 = vpop.f32.mrf.mxu0 }
 0x111   : > { %v911_v33 = vadd.f32 %v910_v32, %v822_v28  ;;  %v823_v39 = vpop.f32.mrf.mxu1  ;;  %v735_v42 = vadd.f32 %v1796_v56, %v734_v34  ;;  %v854_v32 = vadd.f32 %v1876_v4, %v765_v51 }
 0x112   : > { %v1026_v37 = vld [vmem:[#allocation2 + $0x50] ss:$2 sm:$0xff]  ;;  %v1028_v38 = vld [vmem:[#allocation2 + $0x51] ss:$2 sm:$0xff] }
 0x113   : > { %v1030_v41 = vmax.f32 %v1026_v37, %v1028_v38  ;;  %973 = vst.msk [vmem:[#allocation2 + $0x60] sm:$0xff] %vm960_vm0, %v911_v33  ;;  %v824_v47 = vadd.f32 %v823_v39, %v735_v42 }
 0x115   : > { %v1031_v44 = vmax.f32 %v1029_v40, %v1030_v41 }
 0x116   : > { %v863_v48 = vpop.f32.mrf.mxu3 }
 0x117   : > { %v1032_v46 = vmax.f32 %v1031_v44, 0.0  ;;  %v1896_v49 = vadd.f32 %v863_v48, %v775_v45 }
 0x118   : > { %v912_v52 = vpop.f32.mrf.mxu2  ;;  %v737_v55 = vpop.f32.mrf.mxu0 }
 0x119   : > { %v1033_v53 = vpack.c.bf16 %v1032_v46, %v1032_v46  ;;  %v913_v54 = vadd.f32 %v912_v52, %v824_v47  ;;  %v738_v57 = vadd.f32 %v1796_v56, %v737_v55  ;;  %v826_v58 = vpop.f32.mrf.mxu1  ;;  %v857_v46 = vadd.f32 %v1882_v13, %v768_v25 }
 0x11b   : > { %1034 = vst.msk [vmem:[%s1858_s22 + $0x8] sm:$0xf] %vm1005_vm1, %v1033_v53  ;;  %v827_v59 = vadd.f32 %v826_v58, %v738_v57  ;;  %v859_v58 = vadd.f32 %v1886_v20, %v770_v35 }
 0x11c   : > { %974 = vst.msk [vmem:[#allocation2 + $0x68] sm:$0xff] %vm960_vm0, %v913_v54 }
 0x11e   : > { %v1902_v60 = vpop.f32.mrf.mxu3 }
 0x120   : > { %v915_v22 = vpop.f32.mrf.mxu2  ;;  %v739_v63 = vpop.f32.mrf.mxu0 }
 0x121   : > { %v916_v61 = vadd.f32 %v915_v22, %v827_v59  ;;  %v828_v0 = vpop.f32.mrf.mxu1  ;;  %v740_v1 = vadd.f32 %v1796_v56, %v739_v63 }
 0x123   : > { %975 = vst.msk [vmem:[#allocation2 + $0x70] sm:$0xff] %vm960_vm0, %v916_v61  ;;  %v829_v2 = vadd.f32 %v828_v0, %v740_v1  ;;  %v1036_v16 = vld [vmem:[#allocation2 + $0x60] ss:$2 sm:$0xff]  ;;  %v1038_v17 = vld [vmem:[#allocation2 + $0x61] ss:$2 sm:$0xff] }
 0x124   : > { %v1043_v28 = vmax.f32 %v1036_v16, %v1038_v17 }
 0x126   : > { %v1906_v3 = vpop.f32.mrf.mxu3 }
 0x128   : > { %v917_v5 = vpop.f32.mrf.mxu2  ;;  %v742_v7 = vpop.f32.mrf.mxu0 }
 0x129   : > { %v918_v6 = vadd.f32 %v917_v5, %v829_v2  ;;  %v743_v8 = vadd.f32 %v1796_v56, %v742_v7  ;;  %v831_v10 = vpop.f32.mrf.mxu1  ;;  %v773_v5 = vadd.f32 %v1796_v56, %v1841_v62 }
 0x12b   : > { %976 = vst.msk [vmem:[#allocation2 + $0x78] sm:$0xff] %vm960_vm0, %v918_v6  ;;  %v832_v12 = vadd.f32 %v831_v10, %v743_v8  ;;  %v862_v50 = vadd.f32 %v1890_v29, %v773_v5 }
 0x12e   : > { %v940_v15 = vpop.f32.mrf.mxu3 }
 0x12f   : > { %v941_v19 = vadd.f32 %v940_v15, %v852_v14 }
 0x130   : > { %v920_v18 = vpop.f32.mrf.mxu2  ;;  %v744_v24 = vpop.f32.mrf.mxu0 }
 0x131   : > { %v921_v21 = vadd.f32 %v920_v18, %v832_v12  ;;  %985 = vst.msk [vmem:[#allocation2 + $0xc0] sm:$0xff] %vm960_vm0, %v941_v19  ;;  %v833_v27 = vpop.f32.mrf.mxu1  ;;  %v745_v9 = vadd.f32 %v1796_v56, %v744_v24 }
 0x132   : > { %v1040_v23 = vld [vmem:[#allocation2 + $0x70] ss:$2 sm:$0xff]  ;;  %v1042_v26 = vld [vmem:[#allocation2 + $0x71] ss:$2 sm:$0xff] }
 0x133   : > { %v1044_v30 = vmax.f32 %v1040_v23, %v1042_v26  ;;  %977 = vst.msk [vmem:[#allocation2 + $0x80] sm:$0xff] %vm960_vm0, %v921_v21  ;;  %v834_v34 = vadd.f32 %v833_v27, %v745_v9 }
 0x135   : > { %v1045_v31 = vmax.f32 %v1043_v28, %v1044_v30 }
 0x136   : > { %v942_v37 = vpop.f32.mrf.mxu3 }
 0x137   : > { %v1046_v33 = vmax.f32 %v1045_v31, 0.0  ;;  %v943_v39 = vadd.f32 %v942_v37, %v854_v32 }
 0x138   : > { %v922_v38 = vpop.f32.mrf.mxu2  ;;  %v747_v42 = vpop.f32.mrf.mxu0 }
 0x139   : > { %v1047_v40 = vpack.c.bf16 %v1046_v33, %v1046_v33  ;;  %v923_v41 = vadd.f32 %v922_v38, %v834_v34  ;;  %986 = vst.msk [vmem:[#allocation2 + $0xc8] sm:$0xff] %vm960_vm0, %v943_v39  ;;  %v748_v44 = vadd.f32 %v1796_v56, %v747_v42  ;;  %v836_v45 = vpop.f32.mrf.mxu1  ;;  %v778_v42 = vadd.f32 %v1796_v56, %v1864_v36 }
 0x13a   : > { %v780_v36 = vadd.f32 %v1796_v56, %v1868_v43 }
 0x13b   : > { %1048 = vst.msk [vmem:[%s1858_s22 + $0xc] sm:$0xf] %vm1005_vm1, %v1047_v40  ;;  %v837_v4 = vadd.f32 %v836_v45, %v748_v44  ;;  %v867_v25 = vadd.f32 %v1902_v60, %v778_v42 }
 0x13c   : > { %978 = vst.msk [vmem:[#allocation2 + $0x88] sm:$0xff] %vm960_vm0, %v923_v41 }
 0x13e   : > { %v945_v47 = vpop.f32.mrf.mxu3 }
 0x13f   : > { %v946_v52 = vadd.f32 %v945_v47, %v857_v46 }
 0x140   : > { %v925_v48 = vpop.f32.mrf.mxu2  ;;  %v749_v54 = vpop.f32.mrf.mxu0  ;;  %v1078_v20 = vld [vmem:[#allocation2 + $0xc0] ss:$2 sm:$0xff]  ;;  %v1080_v7 = vld [vmem:[#allocation2 + $0xc1] ss:$2 sm:$0xff] }
 0x141   : > { %v926_v53 = vadd.f32 %v925_v48, %v837_v4  ;;  %987 = vst.msk [vmem:[#allocation2 + $0xd0] sm:$0xff] %vm960_vm0, %v946_v52  ;;  %v838_v55 = vpop.f32.mrf.mxu1  ;;  %v750_v57 = vadd.f32 %v1796_v56, %v749_v54  ;;  %v1085_v19 = vmax.f32 %v1078_v20, %v1080_v7 }
 0x143   : > { %979 = vst.msk [vmem:[#allocation2 + $0x90] sm:$0xff] %vm960_vm0, %v926_v53  ;;  %v839_v59 = vadd.f32 %v838_v55, %v750_v57  ;;  %v1050_v10 = vld [vmem:[#allocation2 + $0x80] ss:$2 sm:$0xff]  ;;  %v1052_v11 = vld [vmem:[#allocation2 + $0x81] ss:$2 sm:$0xff]  ;;  %v869_v53 = vadd.f32 %v1906_v3, %v780_v36 }
 0x144   : > { %v1057_v26 = vmax.f32 %v1050_v10, %v1052_v11 }
 0x146   : > { %v947_v22 = vpop.f32.mrf.mxu3 }
 0x147   : > { %v948_v61 = vadd.f32 %v947_v22, %v859_v58 }
 0x148   : > { %v927_v13 = vpop.f32.mrf.mxu2  ;;  %v752_v0 = vpop.f32.mrf.mxu0 }
 0x149   : > { %v928_v63 = vadd.f32 %v927_v13, %v839_v59  ;;  %988 = vst.msk [vmem:[#allocation2 + $0xd8] sm:$0xff] %vm960_vm0, %v948_v61  ;;  %v753_v1 = vadd.f32 %v1796_v56, %v752_v0  ;;  %v841_v2 = vpop.f32.mrf.mxu1 }
 0x14b   : > { %980 = vst.msk [vmem:[#allocation2 + $0x98] sm:$0xff] %vm960_vm0, %v928_v63  ;;  %v842_v6 = vadd.f32 %v841_v2, %v753_v1 }
 0x14e   : > { %v950_v8 = vpop.f32.mrf.mxu3 }
 0x14f   : > { %v951_v14 = vadd.f32 %v950_v8, %v862_v50 }
 0x150   : > { %v930_v12 = vpop.f32.mrf.mxu2  ;;  %v1082_v15 = vld [vmem:[#allocation2 + $0xd0] ss:$2 sm:$0xff]  ;;  %v1084_v16 = vld [vmem:[#allocation2 + $0xd1] ss:$2 sm:$0xff]  ;;  %v754_v18 = vpop.f32.mrf.mxu0 }
 0x151   : > { %v931_v17 = vadd.f32 %v930_v12, %v842_v6  ;;  %v1086_v23 = vmax.f32 %v1082_v15, %v1084_v16  ;;  %989 = vst.msk [vmem:[#allocation2 + $0xe0] sm:$0xff] %vm960_vm0, %v951_v14  ;;  %v843_v62 = vpop.f32.mrf.mxu1  ;;  %v755_v27 = vadd.f32 %v1796_v56, %v754_v18 }
 0x152   : > { %v1054_v21 = vld [vmem:[#allocation2 + $0x90] ss:$2 sm:$0xff]  ;;  %v1056_v24 = vld [vmem:[#allocation2 + $0x91] ss:$2 sm:$0xff] }
 0x153   : > { %v1058_v29 = vmax.f32 %v1054_v21, %v1056_v24  ;;  %981 = vst.msk [vmem:[#allocation2 + $0xa0] sm:$0xff] %vm960_vm0, %v931_v17  ;;  %v1087_v28 = vmax.f32 %v1085_v19, %v1086_v23  ;;  %v844_v31 = vadd.f32 %v843_v62, %v755_v27 }
 0x155   : > { %v1059_v30 = vmax.f32 %v1057_v26, %v1058_v29  ;;  %v1088_v9 = vmax.f32 %v1087_v28, 0.0 }
 0x156   : > { %v952_v32 = vpop.f32.mrf.mxu3 }
 0x157   : > { %v1060_v51 = vmax.f32 %v1059_v30, 0.0  ;;  %v1089_v33 = vpack.c.bf16 %v1088_v9, %v1088_v9  ;;  %v953_v39 = vadd.f32 %v952_v32, %v1896_v49 }
 0x158   : > { %v932_v34 = vpop.f32.mrf.mxu2  ;;  %v757_v40 = vpop.f32.mrf.mxu0 }
 0x159   : > { %v1061_v37 = vpack.c.bf16 %v1060_v51, %v1060_v51  ;;  %v933_v38 = vadd.f32 %v932_v34, %v844_v31  ;;  %1090 = vst.msk [vmem:[%s1858_s22 + $0x18] sm:$0xf] %vm1005_vm1, %v1089_v33  ;;  %v758_v41 = vadd.f32 %v1796_v56, %v757_v40  ;;  %v846_v44 = vpop.f32.mrf.mxu1 }
 0x15a   : > { %990 = vst.msk [vmem:[#allocation2 + $0xe8] sm:$0xff] %vm960_vm0, %v953_v39 }
 0x15b   : > { %1062 = vst.msk [vmem:[%s1858_s22 + $0x10] sm:$0xf] %vm1005_vm1, %v1061_v37  ;;  %v847_v45 = vadd.f32 %v846_v44, %v758_v41 }
 0x15c   : > { %982 = vst.msk [vmem:[#allocation2 + $0xa8] sm:$0xff] %vm960_vm0, %v933_v38 }
 0x15e   : > { %v955_v4 = vpop.f32.mrf.mxu3 }
 0x15f   : > { %v956_v46 = vadd.f32 %v955_v4, %v867_v25 }
 0x160   : > { %v935_v49 = vpop.f32.mrf.mxu2  ;;  %v759_v48 = vpop.f32.mrf.mxu0 }
 0x161   : > { %v936_v47 = vadd.f32 %v935_v49, %v847_v45  ;;  %991 = vst.msk [vmem:[#allocation2 + $0xf0] sm:$0xff] %vm960_vm0, %v956_v46  ;;  %v760_v52 = vadd.f32 %v1796_v56, %v759_v48  ;;  %v848_v54 = vpop.f32.mrf.mxu1  ;;  %v1092_v59 = vld [vmem:[#allocation2 + $0xe0] ss:$2 sm:$0xff]  ;;  %v1094_v22 = vld [vmem:[#allocation2 + $0xe1] ss:$2 sm:$0xff] }
 0x162   : > { %v1099_v43 = vmax.f32 %v1092_v59, %v1094_v22 }
 0x163   : > { %983 = vst.msk [vmem:[#allocation2 + $0xb0] sm:$0xff] %vm960_vm0, %v936_v47  ;;  %v849_v55 = vadd.f32 %v848_v54, %v760_v52  ;;  %v1064_v13 = vld [vmem:[#allocation2 + $0xa0] ss:$2 sm:$0xff]  ;;  %v1066_v61 = vld [vmem:[#allocation2 + $0xa1] ss:$2 sm:$0xff] }
 0x164   : > { %v1071_v2 = vmax.f32 %v1064_v13, %v1066_v61 }
 0x166   : > { %v957_v57 = vpop.f32.mrf.mxu3 }
 0x167   : > { %v958_v35 = vadd.f32 %v957_v57, %v869_v53 }
 0x168   : > { %v937_v60 = vpop.f32.mrf.mxu2 }
 0x169   : > { %v938_v58 = vadd.f32 %v937_v60, %v849_v55  ;;  %992 = vst.msk [vmem:[#allocation2 + $0xf8] sm:$0xff] %vm960_vm0, %v958_v35 }
 0x16b   : > { %984 = vst.msk [vmem:[#allocation2 + $0xb8] sm:$0xff] %vm960_vm0, %v938_v58 }
 0x170   : > { %v1096_v63 = vld [vmem:[#allocation2 + $0xf0] ss:$2 sm:$0xff]  ;;  %v1098_v56 = vld [vmem:[#allocation2 + $0xf1] ss:$2 sm:$0xff] }
 0x171   : > { %v1100_v1 = vmax.f32 %v1096_v63, %v1098_v56 }
 0x172   : > { %v1068_v3 = vld [vmem:[#allocation2 + $0xb0] ss:$2 sm:$0xff]  ;;  %v1070_v0 = vld [vmem:[#allocation2 + $0xb1] ss:$2 sm:$0xff] }
 0x173   : > { %v1072_v5 = vmax.f32 %v1068_v3, %v1070_v0  ;;  %v1101_v6 = vmax.f32 %v1099_v43, %v1100_v1 }
 0x175   : > { %v1073_v50 = vmax.f32 %v1071_v2, %v1072_v5  ;;  %v1102_v20 = vmax.f32 %v1101_v6, 0.0 }
 0x177   : > { %v1074_v7 = vmax.f32 %v1073_v50, 0.0  ;;  %v1103_v8 = vpack.c.bf16 %v1102_v20, %v1102_v20 }
 0x179   : > { %v1075_v10 = vpack.c.bf16 %v1074_v7, %v1074_v7  ;;  %1104 = vst.msk [vmem:[%s1858_s22 + $0x1c] sm:$0xf] %vm1005_vm1, %v1103_v8 }
 0x17b   : > { %1076 = vst.msk [vmem:[%s1858_s22 + $0x14] sm:$0xf] %vm1005_vm1, %v1075_v10 }
 0x17c PF: > { %s13_s12 = sadd.s32 1, %s1572_s12  }
 0x17d   : > { %p10_p5 = scmp.ge.s32.totalorder %s13_s12, 4  }
 0x17f   :  { %12 = sbr.rel (!%p10_p5) target bundleno = 1 (0x1), region = 93 }

// kernel: simple_cnn_forward.6
= control target key start
LH: loop header
LB: loop body
LE: loop exit
PB: predicated region body
PF: predicated region fallthrough
CT: control target
= control target key end

     0   :  { %s1264_s12 = smov 0   ;;  %s1478_s0 = inlined_call_operand.vmem [shape: bf16[128,640], index: 0, kind: input, shape index: {}]   ;;  %s1479_s1 = inlined_call_operand.vmem [shape: bf16[640,128], index: 1, kind: input, shape index: {}]   ;;  %s1480_s2 = inlined_call_operand.vmem [shape: f32[1,128], index: 2, kind: input, shape index: {}]   ;;  %s1481_s3 = inlined_call_operand.vmem [shape: bf16[32,128], index: 3, kind: output, shape index: {}]  }
   0x1 LB: > { %s899_s13 = sadd.s32 4294967295, %s1242_s12   ;;  %p903_p0 = scmp.ge.s32.totalorder %s1242_s12, 1  ;;  %s1242_s12 = sphi %s1264_s12, %s13_s12  }
   0x2   : > { %p139_p1 = scmp.lt.s32.totalorder %s1242_s12, 3 }
   0x4   : > { %p140_p2 = pnand %p903_p0, %p139_p1 }
   0x5   : > { %s904_s30 = sshll.u32 (!%p140_p2), %s899_s13, 3  ;;  %s906_s26 = sshll.u32 (!%p140_p2), %s899_s13, 1 }
   0x6   : > { %143 = sbr.rel (%p140_p2) target bundleno = 285 (0x11d), region = 32  ;;  %p165_p3 = scmp.lt.s32.totalorder (!%p140_p2), %s904_s30, 15 }
   0x7   : > { %p172_p4 = scmp.lt.s32.totalorder (!%p140_p2), %s906_s26, 3 }
   0xb   : > { %v1177_v0 = vld [vmem:[%s1479_s1 + $0x38] sm:$0xff]  ;;  %v1176_v2 = vld [vmem:[%s1479_s1 + $0x30] sm:$0xff]  ;;  %v1175_v6 = vld [vmem:[%s1479_s1 + $0x28] sm:$0xff]  ;;  %s1483_s30 = smov (!%p165_p3, %s904_s30), 15  ;;  %s1485_s26 = smov (!%p172_p4, %s906_s26), 3 }
   0xc   : > { %v1193_v1 = vld [vmem:[%s1479_s1 + $0xb8] sm:$0xff]  ;;  %1210 = vmatpush.bf16.msra.mxu1 %v1177_v0  ;;  %629 = vmatpush.bf16.msra.mxu0 %v1177_v0  ;;  %v1192_v3 = vld [vmem:[%s1479_s1 + $0xb0] sm:$0xff]  ;;  %v1191_v7 = vld [vmem:[%s1479_s1 + $0xa8] sm:$0xff]  ;;  %s1226_s22 = smul.u32 20, %s1483_s30  ;;  %s907_s13 = sshll.u32 %s1485_s26, 2 }
   0xd   : > { %687 = vmatpush.bf16.msra.mxu2 %v1193_v1  ;;  %v1201_v4 = vld [vmem:[%s1479_s1 + $0xf8] sm:$0xff]  ;;  %v1200_v5 = vld [vmem:[%s1479_s1 + $0xf0] sm:$0xff]  ;;  %v1199_v8 = vld [vmem:[%s1479_s1 + $0xe8] sm:$0xff]  ;;  %s1461_s29 = scalar_lea.vmem %s1481_s3, %s907_s13 }
   0xe   : > { %716 = vmatpush.bf16.msra.mxu3 %v1201_v4  ;;  %v1174_v9 = vld [vmem:[%s1479_s1 + $0x20] sm:$0xff]  ;;  %v1173_v12 = vld [vmem:[%s1479_s1 + $0x18] sm:$0xff]  ;;  %v1172_v15 = vld [vmem:[%s1479_s1 + $0x10] sm:$0xff]  ;;  %s1334_s30 = scalar_lea.vmem %s1478_s0, %s1226_s22 }
   0xf   : > { %v1190_v10 = vld [vmem:[%s1479_s1 + $0xa0] sm:$0xff]  ;;  %v1189_v13 = vld [vmem:[%s1479_s1 + $0x98] sm:$0xff]  ;;  %v1188_v16 = vld [vmem:[%s1479_s1 + $0x90] sm:$0xff] }
  0x10   : > { %1211 = vmatpush.bf16.msra.mxu1 %v1176_v2  ;;  %630 = vmatpush.bf16.msra.mxu0 %v1176_v2  ;;  %v1198_v11 = vld [vmem:[%s1479_s1 + $0xe0] sm:$0xff]  ;;  %v1197_v14 = vld [vmem:[%s1479_s1 + $0xd8] sm:$0xff]  ;;  %v1196_v17 = vld [vmem:[%s1479_s1 + $0xd0] sm:$0xff] }
  0x11   : > { %688 = vmatpush.bf16.msra.mxu2 %v1192_v3  ;;  %v1171_v18 = vld [vmem:[%s1479_s1 + $0x8] sm:$0xff]  ;;  %v1170_v20 = vld [vmem:[%s1479_s1] sm:$0xff]  ;;  %v950_v21 = vld [vmem:[%s1334_s30 + $0x50] sm:$0xf] }
  0x12   : > { %717 = vmatpush.bf16.msra.mxu3 %v1200_v5  ;;  %v1187_v19 = vld [vmem:[%s1479_s1 + $0x88] sm:$0xff]  ;;  %v1185_v22 = vld [vmem:[%s1479_s1 + $0x78] sm:$0xff]  ;;  %v1162_v24 = vld [vmem:[%s1334_s30 + $0x60] sm:$0xf0] }
  0x13   : > { %v1195_v23 = vld [vmem:[%s1479_s1 + $0xc8] sm:$0xff]  ;;  %v910_v25 = vld [vmem:[%s1334_s30] sm:$0xf]  ;;  %v1152_v26 = vld [vmem:[%s1334_s30 + $0x10] sm:$0xf0]  ;;  %v951_v31 = vor.u32 %v1162_v24, %v950_v21 }
  0x14   : > { %1212 = vmatpush.bf16.msra.mxu1 %v1175_v6  ;;  %631 = vmatpush.bf16.msra.mxu0 %v1175_v6  ;;  %v1186_v27 = vld [vmem:[%s1479_s1 + $0x80] sm:$0xff]  ;;  %v918_v28 = vld [vmem:[%s1334_s30 + $0x8] sm:$0xf]  ;;  %v1153_v29 = vld [vmem:[%s1334_s30 + $0x18] sm:$0xf0]  ;;  %v911_v32 = vor.u32 %v1152_v26, %v910_v25 }
  0x15   : > { %689 = vmatpush.bf16.msra.mxu2 %v1191_v7  ;;  %v1209_v30 = vld [vmem:[%s1479_s1 + $0x138] sm:$0xff]  ;;  %v919_v33 = vor.u32 %v1153_v29, %v918_v28  ;;  %v1194_v34 = vld [vmem:[%s1479_s1 + $0xc0] sm:$0xff]  ;;  %v1151_v35 = vld [vmem:[%s1334_s30 + $0xc] sm:$0xf] }
  0x16   : > { %718 = vmatpush.bf16.msra.mxu3 %v1199_v8  ;;  %v920_v36 = vld [vmem:[%s1334_s30 + $0x1c] sm:$0xf0]  ;;  %v1184_v37 = vld [vmem:[%s1479_s1 + $0x70] sm:$0xff]  ;;  %v1183_v40 = vld [vmem:[%s1479_s1 + $0x68] sm:$0xff] }
  0x17   : > { %v1208_v38 = vld [vmem:[%s1479_s1 + $0x130] sm:$0xff]  ;;  %v923_v39 = vor.u32 %v1151_v35, %v920_v36  ;;  %v1207_v41 = vld [vmem:[%s1479_s1 + $0x128] sm:$0xff]  ;;  %v1182_v42 = vld [vmem:[%s1479_s1 + $0x60] sm:$0xff] }
  0x18   : > { %1213 = vmatpush.bf16.msra.mxu1 %v1174_v9  ;;  %632 = vmatpush.bf16.msra.mxu0 %v1174_v9  ;;  %v1206_v43 = vld [vmem:[%s1479_s1 + $0x120] sm:$0xff]  ;;  %v970_v44 = vld [vmem:[%s1334_s30 + $0x78] sm:$0xf]  ;;  %v1167_v45 = vld [vmem:[%s1334_s30 + $0x88] sm:$0xf0] }
  0x19   : > { %690 = vmatpush.bf16.msra.mxu2 %v1190_v10  ;;  %v930_v46 = vld [vmem:[%s1334_s30 + $0x28] sm:$0xf]  ;;  %v1157_v47 = vld [vmem:[%s1334_s30 + $0x38] sm:$0xf0]  ;;  %v938_v49 = vld [vmem:[%s1334_s30 + $0x30] sm:$0xf]  ;;  %v971_v52 = vor.u32 %v1167_v45, %v970_v44 }
  0x1a   : > { %719 = vmatpush.bf16.msra.mxu3 %v1198_v11  ;;  %v1181_v48 = vld [vmem:[%s1479_s1 + $0x58] sm:$0xff]  ;;  %v1158_v50 = vld [vmem:[%s1334_s30 + $0x40] sm:$0xf0]  ;;  %v931_v53 = vor.u32 %v1157_v47, %v930_v46  ;;  %v1156_v55 = vld [vmem:[%s1334_s30 + $0x34] sm:$0xf] }
  0x1b   : > { %v1205_v51 = vld [vmem:[%s1479_s1 + $0x118] sm:$0xff]  ;;  %v939_v54 = vor.u32 %v1158_v50, %v938_v49  ;;  %v940_v56 = vld [vmem:[%s1334_s30 + $0x44] sm:$0xf0]  ;;  %v1180_v57 = vld [vmem:[%s1479_s1 + $0x50] sm:$0xff] }
  0x1c   : > { %1214 = vmatpush.bf16.msra.mxu1 %v1173_v12  ;;  %633 = vmatpush.bf16.msra.mxu0 %v1173_v12  ;;  %v1204_v58 = vld [vmem:[%s1479_s1 + $0x110] sm:$0xff]  ;;  %v943_v59 = vor.u32 %v1156_v55, %v940_v56  ;;  %v1179_v60 = vld [vmem:[%s1479_s1 + $0x48] sm:$0xff]  ;;  %v1178_v62 = vld [vmem:[%s1479_s1 + $0x40] sm:$0xff] }
  0x1d   : > { %691 = vmatpush.bf16.msra.mxu2 %v1189_v13  ;;  %v1203_v61 = vld [vmem:[%s1479_s1 + $0x108] sm:$0xff]  ;;  %v1202_v63 = vld [vmem:[%s1479_s1 + $0x100] sm:$0xff]  ;;  %v912_v1 = vld [vmem:[%s1334_s30 + $0x14] sm:$0xf0] }
  0x1e   : > { %720 = vmatpush.bf16.msra.mxu3 %v1197_v14  ;;  %v1150_v0 = vld [vmem:[%s1334_s30 + $0x4] sm:$0xf]  ;;  %v926_v2 = vld [vmem:[%s1334_s30 + $0x10] sm:$0xf]  ;;  %v958_v4 = vld [vmem:[%s1334_s30 + $0x58] sm:$0xf] }
  0x1f   : > { %v1154_v3 = vld [vmem:[%s1334_s30 + $0x20] sm:$0xf0]  ;;  %v1163_v5 = vld [vmem:[%s1334_s30 + $0x68] sm:$0xf0]  ;;  %v915_v6 = vor.u32 %v1150_v0, %v912_v1  ;;  %v1161_v9 = vld [vmem:[%s1334_s30 + $0x5c] sm:$0xf] }
  0x20   : > { %1215 = vmatpush.bf16.msra.mxu1 %v1172_v15  ;;  %634 = vmatpush.bf16.msra.mxu0 %v1172_v15  ;;  %v927_v7 = vor.u32 %v1154_v3, %v926_v2  ;;  %v959_v8 = vor.u32 %v1163_v5, %v958_v4  ;;  %v960_v10 = vld [vmem:[%s1334_s30 + $0x6c] sm:$0xf0]  ;;  %v1155_v12 = vld [vmem:[%s1334_s30 + $0x2c] sm:$0xf]  ;;  %v932_v13 = vld [vmem:[%s1334_s30 + $0x3c] sm:$0xf0] }
  0x21   : > { %692 = vmatpush.bf16.msra.mxu2 %v1188_v16  ;;  %v963_v11 = vor.u32 %v1161_v9, %v960_v10  ;;  %v946_v14 = vld [vmem:[%s1334_s30 + $0x38] sm:$0xf]  ;;  %v1159_v15 = vld [vmem:[%s1334_s30 + $0x48] sm:$0xf0]  ;;  %v978_v16 = vld [vmem:[%s1334_s30 + $0x80] sm:$0xf] }
  0x22   : > { %721 = vmatpush.bf16.msra.mxu3 %v1196_v17  ;;  %v1168_v17 = vld [vmem:[%s1334_s30 + $0x90] sm:$0xf0]  ;;  %v1166_v21 = vld [vmem:[%s1334_s30 + $0x84] sm:$0xf]  ;;  %v952_v25 = vld [vmem:[%s1334_s30 + $0x64] sm:$0xf0] }
  0x23   : > { %v1160_v24 = vld [vmem:[%s1334_s30 + $0x54] sm:$0xf]  ;;  %v966_v26 = vld [vmem:[%s1334_s30 + $0x60] sm:$0xf]  ;;  %v986_v28 = vld [vmem:[%s1334_s30 + $0x88] sm:$0xf] }
  0x24   : > { %1216 = vmatpush.bf16.msra.mxu1 %v1171_v18  ;;  %635 = vmatpush.bf16.msra.mxu0 %v1171_v18  ;;  %v935_v18 = vor.u32 %v1155_v12, %v932_v13  ;;  %v1169_v29 = vld [vmem:[%s1334_s30 + $0x98] sm:$0xf0] }
  0x25   : > { %693 = vmatpush.bf16.msra.mxu2 %v1187_v19  ;;  %v947_v19 = vor.u32 %v1159_v15, %v946_v14 }
  0x26   : > { %722 = vmatpush.bf16.msra.mxu3 %v1195_v23 }
  0x28   : > { %1217 = vmatpush.bf16.msra.mxu1 %v1170_v20  ;;  %636 = vmatpush.bf16.msra.mxu0 %v1170_v20  ;;  %v979_v20 = vor.u32 %v1168_v17, %v978_v16 }
  0x29   : > { %694 = vmatpush.bf16.msra.mxu2 %v1186_v27  ;;  %v1164_v27 = vld [vmem:[%s1334_s30 + $0x70] sm:$0xf0] }
  0x2a   : > { %723 = vmatpush.bf16.msra.mxu3 %v1194_v34  ;;  %v972_v34 = vld [vmem:[%s1334_s30 + $0x8c] sm:$0xf0] }
  0x2b   : > { %647 = vmatmul.bf16.vlgmr.msra.gmra.mxu1 %v951_v31  ;;  %637 = vmatmul.bf16.vlgmr.msra.gmra.mxu0 %v911_v32  ;;  %v967_v31 = vor.u32 %v1164_v27, %v966_v26  ;;  %v987_v32 = vor.u32 %v1169_v29, %v986_v28 }
  0x2c   : > { %658 = vmatpush.bf16.msrb.mxu1 %v1185_v22  ;;  %745 = vmatpush.bf16.msrb.mxu0 %v1209_v30  ;;  %v980_v22 = vld [vmem:[%s1334_s30 + $0x94] sm:$0xf0] }
  0x2d   : > { %1218 = vmatpush.bf16.msrb.mxu2 %v1209_v30  ;;  %724 = vmatmul.bf16.vlgmr.msra.gmra.mxu3 %v923_v39  ;;  %v983_v23 = vor.u32 %v1166_v21, %v980_v22  ;;  %v955_v30 = vor.u32 %v1160_v24, %v952_v25 }
  0x2e   : > { %695 = vmatmul.bf16.vlgmr.msra.gmra.mxu2 %v919_v33  ;;  %v1165_v33 = vld [vmem:[%s1334_s30 + $0x7c] sm:$0xf] }
  0x2f   : > { %v975_v35 = vor.u32 %v1165_v33, %v972_v34 }
  0x30   : > { %659 = vmatpush.bf16.msrb.mxu1 %v1184_v37  ;;  %746 = vmatpush.bf16.msrb.mxu0 %v1208_v38 }
  0x31   : > { %1219 = vmatpush.bf16.msrb.mxu2 %v1208_v38 }
  0x34   : > { %660 = vmatpush.bf16.msrb.mxu1 %v1183_v40  ;;  %747 = vmatpush.bf16.msrb.mxu0 %v1207_v41 }
  0x35   : > { %1220 = vmatpush.bf16.msrb.mxu2 %v1207_v41 }
  0x38   : > { %661 = vmatpush.bf16.msrb.mxu1 %v1182_v42  ;;  %748 = vmatpush.bf16.msrb.mxu0 %v1206_v43 }
  0x39   : > { %1221 = vmatpush.bf16.msrb.mxu2 %v1206_v43 }
  0x3b   : > { %652 = vmatmul.bf16.gmra.mxu1 %v971_v52  ;;  %642 = vmatmul.bf16.gmra.mxu0 %v931_v53 }
  0x3c   : > { %662 = vmatpush.bf16.msrb.mxu1 %v1181_v48  ;;  %749 = vmatpush.bf16.msrb.mxu0 %v1205_v51  ;;  %v1450_v48 = vld [vmem:[%s1480_s2] ss:$0 sm:$0xff] }
  0x3d   : > { %1222 = vmatpush.bf16.msrb.mxu2 %v1205_v51  ;;  %729 = vmatmul.bf16.gmra.mxu3 %v943_v59 }
  0x3e   : > { %700 = vmatmul.bf16.gmra.mxu2 %v939_v54 }
  0x40   : > { %663 = vmatpush.bf16.msrb.mxu1 %v1180_v57  ;;  %750 = vmatpush.bf16.msrb.mxu0 %v1204_v58 }
  0x41   : > { %1223 = vmatpush.bf16.msrb.mxu2 %v1204_v58 }
  0x44   : > { %664 = vmatpush.bf16.msrb.mxu1 %v1179_v60  ;;  %751 = vmatpush.bf16.msrb.mxu0 %v1203_v61 }
  0x45   : > { %1224 = vmatpush.bf16.msrb.mxu2 %v1203_v61 }
  0x48   : > { %665 = vmatpush.bf16.msrb.mxu1 %v1178_v62  ;;  %752 = vmatpush.bf16.msrb.mxu0 %v1202_v63 }
  0x49   : > { %1225 = vmatpush.bf16.msrb.mxu2 %v1202_v63 }
  0x4b   : > { %666 = vmatmul.bf16.vlgmr.msrb.gmra.mxu1 %v915_v6  ;;  %753 = vmatmul.bf16.vlgmr.msrb.gmra.mxu0 %v927_v7 }
  0x4d   : > { %734 = vmatmul.bf16.gmra.mxu3 %v963_v11 }
  0x4e   : > { %705 = vmatmul.bf16.gmra.mxu2 %v959_v8 }
  0x5b   : > { %671 = vmatmul.bf16.gmra.mxu1 %v935_v18  ;;  %758 = vmatmul.bf16.gmra.mxu0 %v947_v19 }
  0x5d   : > { %739 = vmatmul.bf16.gmra.mxu3 %v983_v23 }
  0x5e   : > { %710 = vmatmul.bf16.gmra.mxu2 %v979_v20 }
  0x6b   : > { %676 = vmatmul.bf16.gmra.mxu1 %v955_v30  ;;  %763 = vmatmul.bf16.gmra.mxu0 %v967_v31 }
  0x6e   : > { %768 = vmatmul.bf16.vlgmr.msrb.gmra.mxu2 %v987_v32 }
  0x7b   : > { %681 = vmatmul.bf16.gmra.mxu1 %v975_v35 }
  0xa8   : > { %v1439_v36 = vpop.f32.mrf.mxu1  ;;  %v638_v37 = vpop.f32.mrf.mxu0 }
  0xa9   : > { %v639_v49 = vadd.f32 %v1450_v48, %v638_v37  ;;  %v649_v27 = vadd.f32 %v1450_v48, %v1439_v36 }
  0xb0   : > { %v1441_v39 = vpop.f32.mrf.mxu1  ;;  %v640_v40 = vpop.f32.mrf.mxu0 }
  0xb1   : > { %v696_v38 = vpop.f32.mrf.mxu2  ;;  %v725_v44 = vpop.f32.mrf.mxu3  ;;  %v641_v57 = vadd.f32 %v1450_v48, %v640_v40  ;;  %v651_v37 = vadd.f32 %v1450_v48, %v1441_v39 }
  0xb8   : > { %v1443_v42 = vpop.f32.mrf.mxu1  ;;  %v643_v43 = vpop.f32.mrf.mxu0 }
  0xb9   : > { %v698_v41 = vpop.f32.mrf.mxu2  ;;  %v727_v50 = vpop.f32.mrf.mxu3  ;;  %v644_v2 = vadd.f32 %v1450_v48, %v643_v43  ;;  %v654_v39 = vadd.f32 %v1450_v48, %v1443_v42 }
  0xc0   : > { %v1445_v46 = vpop.f32.mrf.mxu1  ;;  %v645_v47 = vpop.f32.mrf.mxu0 }
  0xc1   : > { %v701_v45 = vpop.f32.mrf.mxu2  ;;  %v730_v62 = vpop.f32.mrf.mxu3  ;;  %v646_v13 = vadd.f32 %v1450_v48, %v645_v47 }
  0xc8   : > { %v667_v51 = vpop.f32.mrf.mxu1  ;;  %v754_v52 = vpop.f32.mrf.mxu0 }
  0xc9   : > { %v668_v53 = vadd.f32 %v667_v51, %v639_v49  ;;  %v703_v54 = vpop.f32.mrf.mxu2  ;;  %v732_v8 = vpop.f32.mrf.mxu3 }
  0xcb   : > { %v697_v55 = vadd.f32 %v696_v38, %v668_v53 }
  0xcd   : > { %v726_v56 = vadd.f32 %v725_v44, %v697_v55 }
  0xcf   : > { %v755_v58 = vadd.f32 %v754_v52, %v726_v56 }
  0xd0   : > { %v669_v59 = vpop.f32.mrf.mxu1  ;;  %v756_v60 = vpop.f32.mrf.mxu0 }
  0xd1   : > { %774 = vst [vmem:[#allocation2] sm:$0xff] %v755_v58  ;;  %v670_v61 = vadd.f32 %v669_v59, %v641_v57  ;;  %v706_v0 = vpop.f32.mrf.mxu2  ;;  %v735_v26 = vpop.f32.mrf.mxu3 }
  0xd3   : > { %v699_v63 = vadd.f32 %v698_v41, %v670_v61 }
  0xd5   : > { %v728_v1 = vadd.f32 %v727_v50, %v699_v63 }
  0xd7   : > { %v757_v3 = vadd.f32 %v756_v60, %v728_v1 }
  0xd8   : > { %v672_v4 = vpop.f32.mrf.mxu1  ;;  %v759_v5 = vpop.f32.mrf.mxu0  ;;  %v782_v10 = vld [vmem:[#allocation2] ss:$2 sm:$0xf]  ;;  %v784_v11 = vld [vmem:[#allocation2 + $0x1] ss:$2 sm:$0xf] }
  0xd9   : > { %775 = vst [vmem:[#allocation2 + $0x8] sm:$0xff] %v757_v3  ;;  %v673_v6 = vadd.f32 %v672_v4, %v644_v2  ;;  %v708_v12 = vpop.f32.mrf.mxu2  ;;  %v789_v19 = vmax.f32 %v782_v10, %v784_v11  ;;  %v737_v43 = vpop.f32.mrf.mxu3  ;;  %v656_v2 = vadd.f32 %v1450_v48, %v1445_v46 }
  0xdb   : > { %v702_v7 = vadd.f32 %v701_v45, %v673_v6 }
  0xdd   : > { %v731_v9 = vadd.f32 %v730_v62, %v702_v7 }
  0xdf   : > { %v760_v14 = vadd.f32 %v759_v5, %v731_v9 }
  0xe0   : > { %v786_v15 = vld [vmem:[#allocation2 + $0x8] ss:$2 sm:$0xf]  ;;  %v788_v16 = vld [vmem:[#allocation2 + $0x9] ss:$2 sm:$0xf]  ;;  %v674_v17 = vpop.f32.mrf.mxu1  ;;  %v761_v18 = vpop.f32.mrf.mxu0 }
  0xe1   : > { %v790_v20 = vmax.f32 %v786_v15, %v788_v16  ;;  %776 = vst [vmem:[#allocation2 + $0x10] sm:$0xff] %v760_v14  ;;  %v675_v21 = vadd.f32 %v674_v17, %v646_v13  ;;  %v711_v30 = vpop.f32.mrf.mxu2  ;;  %v740_v62 = vpop.f32.mrf.mxu3 }
  0xe3   : > { %v791_v22 = vmax.f32 %v789_v19, %v790_v20  ;;  %v704_v23 = vadd.f32 %v703_v54, %v675_v21 }
  0xe5   : > { %v792_v24 = vmax.f32 %v791_v22, 0.0  ;;  %v733_v25 = vadd.f32 %v732_v8, %v704_v23 }
  0xe7   : > { %v793_v28 = vpack.c.bf16 %v792_v24, %v792_v24  ;;  %v762_v29 = vadd.f32 %v761_v18, %v733_v25 }
  0xe8   : > { %v677_v31 = vpop.f32.mrf.mxu1  ;;  %v764_v33 = vpop.f32.mrf.mxu0  ;;  %v796_v38 = vld [vmem:[#allocation2 + $0x10] ss:$2 sm:$0xf]  ;;  %v798_v40 = vld [vmem:[#allocation2 + $0x11] ss:$2 sm:$0xf] }
  0xe9   : > { %794 = vst [vmem:[%s1461_s29] sm:$0x3] %v793_v28  ;;  %v678_v32 = vadd.f32 %v677_v31, %v649_v27  ;;  %v803_v49 = vmax.f32 %v796_v38, %v798_v40  ;;  %v713_v51 = vpop.f32.mrf.mxu2  ;;  %v742_v13 = vpop.f32.mrf.mxu3 }
  0xea   : > { %777 = vst [vmem:[#allocation2 + $0x18] sm:$0xff] %v762_v29 }
  0xeb   : > { %v707_v34 = vadd.f32 %v706_v0, %v678_v32 }
  0xed   : > { %v736_v35 = vadd.f32 %v735_v26, %v707_v34 }
  0xef   : > { %v765_v41 = vadd.f32 %v764_v33, %v736_v35 }
  0xf0   : > { %v679_v44 = vpop.f32.mrf.mxu1  ;;  %v766_v54 = vpop.f32.mrf.mxu0 }
  0xf1   : > { %v800_v45 = vld [vmem:[#allocation2 + $0x18] ss:$2 sm:$0xf]  ;;  %v802_v36 = vld [vmem:[#allocation2 + $0x19] ss:$2 sm:$0xf]  ;;  %v680_v47 = vadd.f32 %v679_v44, %v651_v37  ;;  %v769_v0 = vpop.f32.mrf.mxu2 }
  0xf2   : > { %v804_v50 = vmax.f32 %v800_v45, %v802_v36  ;;  %778 = vst [vmem:[#allocation2 + $0x20] sm:$0xff] %v765_v41 }
  0xf3   : > { %v709_v52 = vadd.f32 %v708_v12, %v680_v47 }
  0xf4   : > { %v805_v53 = vmax.f32 %v803_v49, %v804_v50 }
  0xf5   : > { %v738_v55 = vadd.f32 %v737_v43, %v709_v52 }
  0xf6   : > { %v806_v56 = vmax.f32 %v805_v53, 0.0 }
  0xf7   : > { %v767_v57 = vadd.f32 %v766_v54, %v738_v55 }
  0xf8   : > { %v807_v58 = vpack.c.bf16 %v806_v56, %v806_v56  ;;  %v682_v59 = vpop.f32.mrf.mxu1 }
  0xf9   : > { %v683_v60 = vadd.f32 %v682_v59, %v654_v39  ;;  %779 = vst [vmem:[#allocation2 + $0x28] sm:$0xff] %v767_v57  ;;  %v813_v3 = vld [vmem:[#allocation2 + $0x20] ss:$2 sm:$0xf]  ;;  %v771_v16 = vpop.f32.mrf.mxu2 }
  0xfa   : > { %v809_v61 = vrot.slane %v807_v58, 6  ;;  %v815_v4 = vld [vmem:[#allocation2 + $0x21] ss:$2 sm:$0xf] }
  0xfb   : > { %v712_v63 = vadd.f32 %v711_v30, %v683_v60  ;;  %v820_v9 = vmax.f32 %v813_v3, %v815_v4 }
  0xfc   : > { %811 = vst [vmem:[%s1461_s29] sm:$0xc] %v809_v61 }
  0xfd   : > { %v741_v1 = vadd.f32 %v740_v62, %v712_v63 }
  0xff   : > { %v770_v5 = vadd.f32 %v769_v0, %v741_v1 }
 0x100   : > { %v684_v6 = vpop.f32.mrf.mxu1  ;;  %v817_v42 = vld [vmem:[#allocation2 + $0x28] ss:$2 sm:$0xf]  ;;  %v819_v7 = vld [vmem:[#allocation2 + $0x29] ss:$2 sm:$0xf] }
 0x101   : > { %v685_v8 = vadd.f32 %v684_v6, %v656_v2  ;;  %v821_v10 = vmax.f32 %v817_v42, %v819_v7  ;;  %780 = vst [vmem:[#allocation2 + $0x30] sm:$0xff] %v770_v5 }
 0x103   : > { %v714_v11 = vadd.f32 %v713_v51, %v685_v8  ;;  %v822_v12 = vmax.f32 %v820_v9, %v821_v10 }
 0x105   : > { %v743_v14 = vadd.f32 %v742_v13, %v714_v11  ;;  %v823_v15 = vmax.f32 %v822_v12, 0.0 }
 0x107   : > { %v772_v17 = vadd.f32 %v771_v16, %v743_v14  ;;  %v824_v46 = vpack.c.bf16 %v823_v15, %v823_v15 }
 0x108   : > { %v827_v48 = vld [vmem:[#allocation2 + $0x30] ss:$2 sm:$0xf]  ;;  %v829_v18 = vld [vmem:[#allocation2 + $0x31] ss:$2 sm:$0xf] }
 0x109   : > { %825 = vst [vmem:[%s1461_s29 + $0x4] sm:$0x3] %v824_v46  ;;  %v834_v21 = vmax.f32 %v827_v48, %v829_v18 }
 0x10a   : > { %781 = vst [vmem:[#allocation2 + $0x38] sm:$0xff] %v772_v17 }
 0x111   : > { %v831_v19 = vld [vmem:[#allocation2 + $0x38] ss:$2 sm:$0xf]  ;;  %v833_v20 = vld [vmem:[#allocation2 + $0x39] ss:$2 sm:$0xf] }
 0x112   : > { %v835_v22 = vmax.f32 %v831_v19, %v833_v20 }
 0x114   : > { %v836_v23 = vmax.f32 %v834_v21, %v835_v22 }
 0x116   : > { %v837_v24 = vmax.f32 %v836_v23, 0.0 }
 0x118   : > { %v838_v25 = vpack.c.bf16 %v837_v24, %v837_v24 }
 0x11a   : > { %v840_v26 = vrot.slane %v838_v25, 6 }
 0x11c   : > { %842 = vst [vmem:[%s1461_s29 + $0x4] sm:$0xc] %v840_v26 }
 0x11d PF: > { %s13_s12 = sadd.s32 1, %s1242_s12  }
 0x11e   : > { %p10_p5 = scmp.ge.s32.totalorder %s13_s12, 4  }
 0x120   :  { %12 = sbr.rel (!%p10_p5) target bundleno = 1 (0x1), region = 77 }

// kernel: simple_cnn_forward.7
= control target key start
LH: loop header
LB: loop body
LE: loop exit
PB: predicated region body
PF: predicated region fallthrough
CT: control target
= control target key end

     0   :  { %s5452_s0 = inlined_call_operand.vmem [shape: bf16[2,2048], index: 0, kind: input, shape index: {}]   ;;  %s5453_s1 = inlined_call_operand.vmem [shape: bf16[2048,256], index: 1, kind: input, shape index: {}]   ;;  %s5454_s2 = inlined_call_operand.vmem [shape: f32[1,256], index: 2, kind: input, shape index: {}]   ;;  %s5455_s3 = inlined_call_operand.vmem [shape: bf16[256,128], index: 3, kind: input, shape index: {}]   ;;  %s5456_s4 = inlined_call_operand.vmem [shape: f32[1,128], index: 4, kind: input, shape index: {}]   ;;  %s5457_s5 = inlined_call_operand.vmem [shape: bf16[128,128], index: 5, kind: input, shape index: {}]   ;;  %s5458_s6 = inlined_call_operand.vmem [shape: f32[1,128], index: 6, kind: input, shape index: {}]   ;;  %s5459_s7 = inlined_call_operand.hbm [shape: f32[2,128], index: 7, kind: output, shape index: {}]  }
   0x1   :  { %v2343_v0 = vld [vmem:[%s5453_s1 + $0x70] sm:$0xf]  ;;  %v3420_v1 = vld [vmem:[%s5453_s1 + $0x74] sm:$0xf0]  ;;  %v2335_v11 = vld [vmem:[%s5453_s1 + $0x60] sm:$0xf] }
   0x2   :  { %v2407_v2 = vld [vmem:[%s5453_s1 + $0xf0] sm:$0xf]  ;;  %v2344_v3 = vor.u32 %v3420_v1, %v2343_v0  ;;  %v3436_v4 = vld [vmem:[%s5453_s1 + $0xf4] sm:$0xf0]  ;;  %v3418_v13 = vld [vmem:[%s5453_s1 + $0x64] sm:$0xf0] }
   0x3   :  { %v2471_v5 = vld [vmem:[%s5453_s1 + $0x170] sm:$0xf]  ;;  %v3452_v6 = vld [vmem:[%s5453_s1 + $0x174] sm:$0xf0]  ;;  %v2408_v7 = vor.u32 %v3436_v4, %v2407_v2  ;;  %v2399_v14 = vld [vmem:[%s5453_s1 + $0xe0] sm:$0xf]  ;;  %v2336_v16 = vor.u32 %v3418_v13, %v2335_v11 }
   0x4   :  { %v2472_v8 = vor.u32 %v3452_v6, %v2471_v5  ;;  %v2535_v9 = vld [vmem:[%s5453_s1 + $0x1f0] sm:$0xf]  ;;  %v3468_v10 = vld [vmem:[%s5453_s1 + $0x1f4] sm:$0xf0]  ;;  %1607 = vmatpush.bf16.msra.mxu0 %v2344_v3  ;;  %v3434_v15 = vld [vmem:[%s5453_s1 + $0xe4] sm:$0xf0] }
   0x5   :  { %v2536_v12 = vor.u32 %v3468_v10, %v2535_v9  ;;  %1620 = vmatpush.bf16.msra.mxu1 %v2408_v7  ;;  %v2400_v17 = vor.u32 %v3434_v15, %v2399_v14  ;;  %v2463_v18 = vld [vmem:[%s5453_s1 + $0x160] sm:$0xf]  ;;  %v3450_v19 = vld [vmem:[%s5453_s1 + $0x164] sm:$0xf0]  ;;  %v2327_v23 = vld [vmem:[%s5453_s1 + $0x50] sm:$0xf] }
   0x6   :  { %1633 = vmatpush.bf16.msra.mxu2 %v2472_v8  ;;  %v2527_v20 = vld [vmem:[%s5453_s1 + $0x1e0] sm:$0xf]  ;;  %v2464_v21 = vor.u32 %v3450_v19, %v2463_v18  ;;  %v3466_v22 = vld [vmem:[%s5453_s1 + $0x1e4] sm:$0xf0]  ;;  %v3416_v24 = vld [vmem:[%s5453_s1 + $0x54] sm:$0xf0] }
   0x7   :  { %1646 = vmatpush.bf16.msra.mxu3 %v2536_v12  ;;  %v2528_v25 = vor.u32 %v3466_v22, %v2527_v20  ;;  %v2391_v26 = vld [vmem:[%s5453_s1 + $0xd0] sm:$0xf]  ;;  %v3432_v27 = vld [vmem:[%s5453_s1 + $0xd4] sm:$0xf0]  ;;  %v2328_v29 = vor.u32 %v3416_v24, %v2327_v23  ;;  %v2319_v35 = vld [vmem:[%s5453_s1 + $0x40] sm:$0xf] }
   0x8   :  { %v2455_v28 = vld [vmem:[%s5453_s1 + $0x150] sm:$0xf]  ;;  %1608 = vmatpush.bf16.msra.mxu0 %v2336_v16  ;;  %v3448_v30 = vld [vmem:[%s5453_s1 + $0x154] sm:$0xf0]  ;;  %v2392_v33 = vor.u32 %v3432_v27, %v2391_v26  ;;  %v3414_v36 = vld [vmem:[%s5453_s1 + $0x44] sm:$0xf0] }
   0x9   :  { %v2519_v31 = vld [vmem:[%s5453_s1 + $0x1d0] sm:$0xf]  ;;  %v3464_v32 = vld [vmem:[%s5453_s1 + $0x1d4] sm:$0xf0]  ;;  %1621 = vmatpush.bf16.msra.mxu1 %v2400_v17  ;;  %v2456_v34 = vor.u32 %v3448_v30, %v2455_v28  ;;  %v2383_v37 = vld [vmem:[%s5453_s1 + $0xc0] sm:$0xf]  ;;  %v2320_v44 = vor.u32 %v3414_v36, %v2319_v35 }
   0xa   :  { %1634 = vmatpush.bf16.msra.mxu2 %v2464_v21  ;;  %v2520_v38 = vor.u32 %v3464_v32, %v2519_v31  ;;  %v3430_v39 = vld [vmem:[%s5453_s1 + $0xc4] sm:$0xf0]  ;;  %v2447_v40 = vld [vmem:[%s5453_s1 + $0x140] sm:$0xf]  ;;  %v2311_v47 = vld [vmem:[%s5453_s1 + $0x30] sm:$0xf] }
   0xb   :  { %1647 = vmatpush.bf16.msra.mxu3 %v2528_v25  ;;  %v3446_v41 = vld [vmem:[%s5453_s1 + $0x144] sm:$0xf0]  ;;  %v2511_v42 = vld [vmem:[%s5453_s1 + $0x1c0] sm:$0xf]  ;;  %v2384_v45 = vor.u32 %v3430_v39, %v2383_v37  ;;  %v3412_v48 = vld [vmem:[%s5453_s1 + $0x34] sm:$0xf0] }
   0xc   :  { %v3462_v43 = vld [vmem:[%s5453_s1 + $0x1c4] sm:$0xf0]  ;;  %1609 = vmatpush.bf16.msra.mxu0 %v2328_v29  ;;  %v2448_v46 = vor.u32 %v3446_v41, %v2447_v40  ;;  %v2375_v49 = vld [vmem:[%s5453_s1 + $0xb0] sm:$0xf]  ;;  %v3428_v51 = vld [vmem:[%s5453_s1 + $0xb4] sm:$0xf0]  ;;  %v2312_v56 = vor.u32 %v3412_v48, %v2311_v47 }
   0xd   :  { %1622 = vmatpush.bf16.msra.mxu1 %v2392_v33  ;;  %v2512_v50 = vor.u32 %v3462_v43, %v2511_v42  ;;  %v2439_v52 = vld [vmem:[%s5453_s1 + $0x130] sm:$0xf]  ;;  %v3444_v53 = vld [vmem:[%s5453_s1 + $0x134] sm:$0xf0]  ;;  %v2376_v57 = vor.u32 %v3428_v51, %v2375_v49  ;;  %v2303_v59 = vld [vmem:[%s5453_s1 + $0x20] sm:$0xf] }
   0xe   :  { %1635 = vmatpush.bf16.msra.mxu2 %v2456_v34  ;;  %v2503_v54 = vld [vmem:[%s5453_s1 + $0x1b0] sm:$0xf]  ;;  %v3460_v55 = vld [vmem:[%s5453_s1 + $0x1b4] sm:$0xf0]  ;;  %v2440_v58 = vor.u32 %v3444_v53, %v2439_v52  ;;  %v3410_v60 = vld [vmem:[%s5453_s1 + $0x24] sm:$0xf0] }
   0xf   :  { %1648 = vmatpush.bf16.msra.mxu3 %v2520_v38  ;;  %v2367_v61 = vld [vmem:[%s5453_s1 + $0xa0] sm:$0xf]  ;;  %v2504_v62 = vor.u32 %v3460_v55, %v2503_v54  ;;  %v3426_v63 = vld [vmem:[%s5453_s1 + $0xa4] sm:$0xf0]  ;;  %v2304_v4 = vor.u32 %v3410_v60, %v2303_v59  ;;  %v2295_v7 = vld [vmem:[%s5453_s1 + $0x10] sm:$0xf] }
  0x10   :  { %1610 = vmatpush.bf16.msra.mxu0 %v2320_v44  ;;  %v2431_v0 = vld [vmem:[%s5453_s1 + $0x120] sm:$0xf]  ;;  %v3442_v1 = vld [vmem:[%s5453_s1 + $0x124] sm:$0xf0]  ;;  %v2368_v5 = vor.u32 %v3426_v63, %v2367_v61  ;;  %v3408_v8 = vld [vmem:[%s5453_s1 + $0x14] sm:$0xf0] }
  0x11   :  { %1623 = vmatpush.bf16.msra.mxu1 %v2384_v45  ;;  %v2495_v2 = vld [vmem:[%s5453_s1 + $0x1a0] sm:$0xf]  ;;  %v3458_v3 = vld [vmem:[%s5453_s1 + $0x1a4] sm:$0xf0]  ;;  %v2432_v6 = vor.u32 %v3442_v1, %v2431_v0  ;;  %v2359_v9 = vld [vmem:[%s5453_s1 + $0x90] sm:$0xf]  ;;  %v2296_v16 = vor.u32 %v3408_v8, %v2295_v7 }
  0x12   :  { %1636 = vmatpush.bf16.msra.mxu2 %v2448_v46  ;;  %v2496_v10 = vor.u32 %v3458_v3, %v2495_v2  ;;  %v3424_v11 = vld [vmem:[%s5453_s1 + $0x94] sm:$0xf0]  ;;  %v2423_v12 = vld [vmem:[%s5453_s1 + $0x110] sm:$0xf]  ;;  %v2287_v17 = vld [vmem:[%s5453_s1] sm:$0xf] }
  0x13   :  { %1649 = vmatpush.bf16.msra.mxu3 %v2512_v50  ;;  %v3440_v13 = vld [vmem:[%s5453_s1 + $0x114] sm:$0xf0]  ;;  %v2487_v14 = vld [vmem:[%s5453_s1 + $0x190] sm:$0xf]  ;;  %v3406_v18 = vld [vmem:[%s5453_s1 + $0x4] sm:$0xf0]  ;;  %v2360_v19 = vor.u32 %v3424_v11, %v2359_v9 }
  0x14   :  { %1611 = vmatpush.bf16.msra.mxu0 %v2312_v56  ;;  %v3456_v15 = vld [vmem:[%s5453_s1 + $0x194] sm:$0xf0]  ;;  %v2424_v20 = vor.u32 %v3440_v13, %v2423_v12  ;;  %v2351_v21 = vld [vmem:[%s5453_s1 + $0x80] sm:$0xf]  ;;  %v3422_v22 = vld [vmem:[%s5453_s1 + $0x84] sm:$0xf0]  ;;  %v2288_v31 = vor.u32 %v3406_v18, %v2287_v17 }
  0x15   :  { %1624 = vmatpush.bf16.msra.mxu1 %v2376_v57  ;;  %v2415_v23 = vld [vmem:[%s5453_s1 + $0x100] sm:$0xf]  ;;  %v2488_v24 = vor.u32 %v3456_v15, %v2487_v14  ;;  %v3438_v25 = vld [vmem:[%s5453_s1 + $0x104] sm:$0xf0]  ;;  %v2599_v28 = vld [vmem:[%s5453_s1 + $0x270] sm:$0xf]  ;;  %v2352_v35 = vor.u32 %v3422_v22, %v2351_v21 }
  0x16   :  { %1637 = vmatpush.bf16.msra.mxu2 %v2440_v58  ;;  %v2479_v26 = vld [vmem:[%s5453_s1 + $0x180] sm:$0xf]  ;;  %v3454_v27 = vld [vmem:[%s5453_s1 + $0x184] sm:$0xf0]  ;;  %v3484_v29 = vld [vmem:[%s5453_s1 + $0x274] sm:$0xf0]  ;;  %v2416_v36 = vor.u32 %v3438_v25, %v2415_v23 }
  0x17   :  { %1650 = vmatpush.bf16.msra.mxu3 %v2504_v62  ;;  %v2663_v30 = vld [vmem:[%s5453_s1 + $0x2f0] sm:$0xf]  ;;  %v3500_v32 = vld [vmem:[%s5453_s1 + $0x2f4] sm:$0xf0]  ;;  %v2480_v39 = vor.u32 %v3454_v27, %v2479_v26  ;;  %v2600_v40 = vor.u32 %v3484_v29, %v2599_v28  ;;  %v2591_v43 = vld [vmem:[%s5453_s1 + $0x260] sm:$0xf] }
  0x18   :  { %1612 = vmatpush.bf16.msra.mxu0 %v2304_v4  ;;  %v2727_v33 = vld [vmem:[%s5453_s1 + $0x370] sm:$0xf]  ;;  %v3516_v34 = vld [vmem:[%s5453_s1 + $0x374] sm:$0xf0]  ;;  %v2664_v41 = vor.u32 %v3500_v32, %v2663_v30  ;;  %v3482_v44 = vld [vmem:[%s5453_s1 + $0x264] sm:$0xf0] }
  0x19   :  { %1625 = vmatpush.bf16.msra.mxu1 %v2368_v5  ;;  %v2791_v37 = vld [vmem:[%s5453_s1 + $0x3f0] sm:$0xf]  ;;  %v3532_v38 = vld [vmem:[%s5453_s1 + $0x3f4] sm:$0xf0]  ;;  %v2728_v42 = vor.u32 %v3516_v34, %v2727_v33  ;;  %v2655_v45 = vld [vmem:[%s5453_s1 + $0x2e0] sm:$0xf]  ;;  %v2592_v52 = vor.u32 %v3482_v44, %v2591_v43 }
  0x1a   :  { %1638 = vmatpush.bf16.msra.mxu2 %v2432_v6  ;;  %v2792_v46 = vor.u32 %v3532_v38, %v2791_v37  ;;  %v3498_v47 = vld [vmem:[%s5453_s1 + $0x2e4] sm:$0xf0]  ;;  %v2719_v48 = vld [vmem:[%s5453_s1 + $0x360] sm:$0xf]  ;;  %v2583_v55 = vld [vmem:[%s5453_s1 + $0x250] sm:$0xf] }
  0x1b   :  { %1651 = vmatpush.bf16.msra.mxu3 %v2496_v10  ;;  %v3514_v49 = vld [vmem:[%s5453_s1 + $0x364] sm:$0xf0]  ;;  %v2783_v50 = vld [vmem:[%s5453_s1 + $0x3e0] sm:$0xf]  ;;  %v2656_v53 = vor.u32 %v3498_v47, %v2655_v45  ;;  %v3480_v56 = vld [vmem:[%s5453_s1 + $0x254] sm:$0xf0] }
  0x1c   :  { %1613 = vmatpush.bf16.msra.mxu0 %v2296_v16  ;;  %v3530_v51 = vld [vmem:[%s5453_s1 + $0x3e4] sm:$0xf0]  ;;  %v2720_v54 = vor.u32 %v3514_v49, %v2719_v48  ;;  %v2647_v57 = vld [vmem:[%s5453_s1 + $0x2d0] sm:$0xf]  ;;  %v3496_v59 = vld [vmem:[%s5453_s1 + $0x2d4] sm:$0xf0]  ;;  %v2584_v0 = vor.u32 %v3480_v56, %v2583_v55 }
  0x1d   :  { %1626 = vmatpush.bf16.msra.mxu1 %v2360_v19  ;;  %v2784_v58 = vor.u32 %v3530_v51, %v2783_v50  ;;  %v2711_v60 = vld [vmem:[%s5453_s1 + $0x350] sm:$0xf]  ;;  %v3512_v61 = vld [vmem:[%s5453_s1 + $0x354] sm:$0xf0]  ;;  %v2575_v1 = vld [vmem:[%s5453_s1 + $0x240] sm:$0xf]  ;;  %v2648_v3 = vor.u32 %v3496_v59, %v2647_v57 }
  0x1e   :  { %1639 = vmatpush.bf16.msra.mxu2 %v2424_v20  ;;  %v2775_v62 = vld [vmem:[%s5453_s1 + $0x3d0] sm:$0xf]  ;;  %v3528_v63 = vld [vmem:[%s5453_s1 + $0x3d4] sm:$0xf0]  ;;  %v27_v2 = vld [vmem:[%s5452_s0] sm:$0xff]  ;;  %v2712_v4 = vor.u32 %v3512_v61, %v2711_v60 }
  0x1f   :  { %1652 = vmatpush.bf16.msra.mxu3 %v2488_v24  ;;  %v3478_v5 = vld [vmem:[%s5453_s1 + $0x244] sm:$0xf0]  ;;  %v2639_v6 = vld [vmem:[%s5453_s1 + $0x2c0] sm:$0xf]  ;;  %292 = vst [vmem:[#allocation1] ss:$9 sm:$0xff] %v27_v2  ;;  %v2776_v7 = vor.u32 %v3528_v63, %v2775_v62 }
  0x20   :  { %1614 = vmatpush.bf16.msra.mxu0 %v2288_v31  ;;  %v3494_v8 = vld [vmem:[%s5453_s1 + $0x2c4] sm:$0xf0]  ;;  %v2703_v9 = vld [vmem:[%s5453_s1 + $0x340] sm:$0xf]  ;;  %v2576_v13 = vor.u32 %v3478_v5, %v2575_v1  ;;  %v2567_v16 = vld [vmem:[%s5453_s1 + $0x230] sm:$0xf] }
  0x21   :  { %1627 = vmatpush.bf16.msra.mxu1 %v2352_v35  ;;  %v3510_v10 = vld [vmem:[%s5453_s1 + $0x344] sm:$0xf0]  ;;  %v2767_v11 = vld [vmem:[%s5453_s1 + $0x3c0] sm:$0xf]  ;;  %v2640_v14 = vor.u32 %v3494_v8, %v2639_v6  ;;  %v3476_v17 = vld [vmem:[%s5453_s1 + $0x234] sm:$0xf0] }
  0x22   :  { %1640 = vmatpush.bf16.msra.mxu2 %v2416_v36  ;;  %v3526_v12 = vld [vmem:[%s5453_s1 + $0x3c4] sm:$0xf0]  ;;  %v2704_v15 = vor.u32 %v3510_v10, %v2703_v9  ;;  %v2631_v18 = vld [vmem:[%s5453_s1 + $0x2b0] sm:$0xf]  ;;  %v3492_v20 = vld [vmem:[%s5453_s1 + $0x2b4] sm:$0xf0]  ;;  %v2568_v26 = vor.u32 %v3476_v17, %v2567_v16 }
  0x23   :  { %1653 = vmatpush.bf16.msra.mxu3 %v2480_v39  ;;  %v2768_v19 = vor.u32 %v3526_v12, %v2767_v11  ;;  %v2695_v21 = vld [vmem:[%s5453_s1 + $0x330] sm:$0xf]  ;;  %v3508_v22 = vld [vmem:[%s5453_s1 + $0x334] sm:$0xf0]  ;;  %v2559_v25 = vld [vmem:[%s5453_s1 + $0x220] sm:$0xf]  ;;  %v2632_v30 = vor.u32 %v3492_v20, %v2631_v18 }
  0x24   :  { %1659 = vmatpush.bf16.msrb.mxu0 %v2600_v40  ;;  %v2759_v23 = vld [vmem:[%s5453_s1 + $0x3b0] sm:$0xf]  ;;  %v3524_v24 = vld [vmem:[%s5453_s1 + $0x3b4] sm:$0xf0]  ;;  %v2696_v31 = vor.u32 %v3508_v22, %v2695_v21  ;;  %v3474_v32 = vld [vmem:[%s5453_s1 + $0x224] sm:$0xf0] }
  0x25   :  { %1672 = vmatpush.bf16.msrb.mxu1 %v2664_v41  ;;  %v2623_v33 = vld [vmem:[%s5453_s1 + $0x2a0] sm:$0xf]  ;;  %v2760_v35 = vor.u32 %v3524_v24, %v2759_v23  ;;  %v3490_v36 = vld [vmem:[%s5453_s1 + $0x2a4] sm:$0xf0]  ;;  %v2560_v41 = vor.u32 %v3474_v32, %v2559_v25  ;;  %v3472_v45 = vld [vmem:[%s5453_s1 + $0x214] sm:$0xf0] }
  0x26   :  { %1685 = vmatpush.bf16.msrb.mxu2 %v2728_v42  ;;  %v4081_v27 = vld [vmem:[#allocation1 + $0x12] sm:$0xff]  ;;  %v4083_v28 = vld [vmem:[#allocation1] sm:$0xff]  ;;  %v4093_v34 = vld [vmem:[#allocation1 + $0x9] sm:$0xff]  ;;  %v2624_v43 = vor.u32 %v3490_v36, %v2623_v33 }
  0x27   :  { %1698 = vmatpush.bf16.msrb.mxu3 %v2792_v46  ;;  %v4085_v29 = vld [vmem:[#allocation1 + $0x1b] sm:$0xff]  ;;  %v3506_v38 = vld [vmem:[%s5453_s1 + $0x324] sm:$0xf0]  ;;  %1641 = vmatmul.bf16.vlgmr.msra.gmra.mxu2 %v4081_v27  ;;  %v2551_v42 = vld [vmem:[%s5453_s1 + $0x210] sm:$0xf] }
  0x28   :  { %1660 = vmatpush.bf16.msrb.mxu0 %v2592_v52  ;;  %v2687_v37 = vld [vmem:[%s5453_s1 + $0x320] sm:$0xf]  ;;  %v3522_v40 = vld [vmem:[%s5453_s1 + $0x3a4] sm:$0xf0]  ;;  %1654 = vmatmul.bf16.vlgmr.msra.gmra.mxu3 %v4085_v29  ;;  %v2615_v46 = vld [vmem:[%s5453_s1 + $0x290] sm:$0xf]  ;;  %v2552_v55 = vor.u32 %v3472_v45, %v2551_v42 }
  0x29   :  { %1673 = vmatpush.bf16.msrb.mxu1 %v2656_v53  ;;  %v2751_v39 = vld [vmem:[%s5453_s1 + $0x3a0] sm:$0xf]  ;;  %1615 = vmatmul.bf16.vlgmr.msra.gmra.mxu0 %v4083_v28  ;;  %v2688_v44 = vor.u32 %v3506_v38, %v2687_v37  ;;  %v3488_v47 = vld [vmem:[%s5453_s1 + $0x294] sm:$0xf0]  ;;  %v2679_v49 = vld [vmem:[%s5453_s1 + $0x310] sm:$0xf] }
  0x2a   :  { %1686 = vmatpush.bf16.msrb.mxu2 %v2720_v54  ;;  %1628 = vmatmul.bf16.vlgmr.msra.gmra.mxu1 %v4093_v34  ;;  %v2752_v48 = vor.u32 %v3522_v40, %v2751_v39  ;;  %v3504_v50 = vld [vmem:[%s5453_s1 + $0x314] sm:$0xf0]  ;;  %v2743_v51 = vld [vmem:[%s5453_s1 + $0x390] sm:$0xf]  ;;  %v2543_v53 = vld [vmem:[%s5453_s1 + $0x200] sm:$0xf]  ;;  %v2616_v62 = vor.u32 %v3488_v47, %v2615_v46 }
  0x2b   :  { %1699 = vmatpush.bf16.msrb.mxu3 %v2784_v58  ;;  %v3520_v52 = vld [vmem:[%s5453_s1 + $0x394] sm:$0xf0]  ;;  %v3470_v54 = vld [vmem:[%s5453_s1 + $0x204] sm:$0xf0]  ;;  %v2607_v56 = vld [vmem:[%s5453_s1 + $0x280] sm:$0xf]  ;;  %v2680_v63 = vor.u32 %v3504_v50, %v2679_v49 }
  0x2c   :  { %1661 = vmatpush.bf16.msrb.mxu0 %v2584_v0  ;;  %v3486_v57 = vld [vmem:[%s5453_s1 + $0x284] sm:$0xf0]  ;;  %v2671_v58 = vld [vmem:[%s5453_s1 + $0x300] sm:$0xf]  ;;  %v4156_v60 = vld [vmem:[#allocation1 + $0x36] sm:$0xff]  ;;  %v2544_v9 = vor.u32 %v3470_v54, %v2543_v53 }
  0x2d   :  { %1674 = vmatpush.bf16.msrb.mxu1 %v2648_v3  ;;  %v3502_v59 = vld [vmem:[%s5453_s1 + $0x304] sm:$0xf0]  ;;  %v4163_v1 = vld [vmem:[#allocation1 + $0x3f] sm:$0xff]  ;;  %v4165_v2 = vld [vmem:[#allocation1 + $0x2d] sm:$0xff]  ;;  %v2744_v3 = vor.u32 %v3520_v52, %v2743_v51 }
  0x2e   :  { %1687 = vmatpush.bf16.msrb.mxu2 %v2712_v4  ;;  %v28_v61 = vld [vmem:[%s5452_s0 + $0x8] sm:$0xff]  ;;  %v2735_v4 = vld [vmem:[%s5453_s1 + $0x380] sm:$0xf]  ;;  %v2855_v6 = vld [vmem:[%s5453_s1 + $0x470] sm:$0xf] }
  0x2f   :  { %1700 = vmatpush.bf16.msrb.mxu3 %v2776_v7  ;;  %v4161_v0 = vld [vmem:[#allocation1 + $0x24] sm:$0xff]  ;;  %v3548_v7 = vld [vmem:[%s5453_s1 + $0x474] sm:$0xf0]  ;;  %v2919_v8 = vld [vmem:[%s5453_s1 + $0x4f0] sm:$0xf] }
  0x30   :  { %1662 = vmatpush.bf16.msrb.mxu0 %v2576_v13  ;;  %v3518_v5 = vld [vmem:[%s5453_s1 + $0x384] sm:$0xf0]  ;;  %302 = vst [vmem:[#allocation1] ss:$9 sm:$0xff] %v28_v61  ;;  %v3564_v10 = vld [vmem:[%s5453_s1 + $0x4f4] sm:$0xf0]  ;;  %v2608_v13 = vor.u32 %v3486_v57, %v2607_v56  ;;  %v2856_v18 = vor.u32 %v3548_v7, %v2855_v6 }
  0x31   :  { %1675 = vmatpush.bf16.msrb.mxu1 %v2640_v14  ;;  %v2983_v11 = vld [vmem:[%s5453_s1 + $0x570] sm:$0xf]  ;;  %v3580_v12 = vld [vmem:[%s5453_s1 + $0x574] sm:$0xf0]  ;;  %v2672_v14 = vor.u32 %v3502_v59, %v2671_v58  ;;  %v2736_v17 = vor.u32 %v3518_v5, %v2735_v4  ;;  %v2847_v21 = vld [vmem:[%s5453_s1 + $0x460] sm:$0xf] }
  0x32   :  { %1688 = vmatpush.bf16.msrb.mxu2 %v2704_v15  ;;  %v3047_v15 = vld [vmem:[%s5453_s1 + $0x5f0] sm:$0xf]  ;;  %v3596_v16 = vld [vmem:[%s5453_s1 + $0x5f4] sm:$0xf0]  ;;  %v2984_v20 = vor.u32 %v3580_v12, %v2983_v11  ;;  %v3546_v22 = vld [vmem:[%s5453_s1 + $0x464] sm:$0xf0] }
  0x33   :  { %1701 = vmatpush.bf16.msrb.mxu3 %v2768_v19  ;;  %v2920_v19 = vor.u32 %v3564_v10, %v2919_v8  ;;  %v2911_v23 = vld [vmem:[%s5453_s1 + $0x4e0] sm:$0xf]  ;;  %v3048_v24 = vor.u32 %v3596_v16, %v3047_v15  ;;  %v3562_v25 = vld [vmem:[%s5453_s1 + $0x4e4] sm:$0xf0]  ;;  %v2848_v33 = vor.u32 %v3546_v22, %v2847_v21  ;;  %v2839_v37 = vld [vmem:[%s5453_s1 + $0x450] sm:$0xf] }
  0x34   :  { %1663 = vmatpush.bf16.msrb.mxu0 %v2568_v26  ;;  %v2975_v26 = vld [vmem:[%s5453_s1 + $0x560] sm:$0xf]  ;;  %v3594_v32 = vld [vmem:[%s5453_s1 + $0x5e4] sm:$0xf0]  ;;  %v3544_v38 = vld [vmem:[%s5453_s1 + $0x454] sm:$0xf0] }
  0x35   :  { %1676 = vmatpush.bf16.msrb.mxu1 %v2632_v30  ;;  %v3578_v30 = vld [vmem:[%s5453_s1 + $0x564] sm:$0xf0]  ;;  %v2903_v39 = vld [vmem:[%s5453_s1 + $0x4d0] sm:$0xf]  ;;  %v3592_v45 = vld [vmem:[%s5453_s1 + $0x5d4] sm:$0xf0]  ;;  %v2840_v46 = vor.u32 %v3544_v38, %v2839_v37 }
  0x36   :  { %1689 = vmatpush.bf16.msrb.mxu2 %v2696_v31  ;;  %v3039_v31 = vld [vmem:[%s5453_s1 + $0x5e0] sm:$0xf]  ;;  %v2976_v36 = vor.u32 %v3578_v30, %v2975_v26  ;;  %v2967_v42 = vld [vmem:[%s5453_s1 + $0x550] sm:$0xf]  ;;  %v3542_v50 = vld [vmem:[%s5453_s1 + $0x444] sm:$0xf0] }
  0x37   :  { %1702 = vmatpush.bf16.msrb.mxu3 %v2760_v35  ;;  %v2912_v35 = vor.u32 %v3562_v25, %v2911_v23  ;;  %v3040_v40 = vor.u32 %v3594_v32, %v3039_v31  ;;  %v2831_v49 = vld [vmem:[%s5453_s1 + $0x440] sm:$0xf]  ;;  %v3558_v53 = vld [vmem:[%s5453_s1 + $0x4c4] sm:$0xf0]  ;;  %v3556_v5 = vld [vmem:[%s5453_s1 + $0x4b4] sm:$0xf0] }
  0x38   :  { %1664 = vmatpush.bf16.msrb.mxu0 %v2560_v41  ;;  %v3560_v41 = vld [vmem:[%s5453_s1 + $0x4d4] sm:$0xf0]  ;;  %v2895_v51 = vld [vmem:[%s5453_s1 + $0x4c0] sm:$0xf]  ;;  %v3590_v57 = vld [vmem:[%s5453_s1 + $0x5c4] sm:$0xf0]  ;;  %v2832_v58 = vor.u32 %v3542_v50, %v2831_v49 }
  0x39   :  { %1677 = vmatpush.bf16.msrb.mxu1 %v2624_v43  ;;  %v3576_v43 = vld [vmem:[%s5453_s1 + $0x554] sm:$0xf0]  ;;  %v2904_v47 = vor.u32 %v3560_v41, %v2903_v39  ;;  %v2959_v54 = vld [vmem:[%s5453_s1 + $0x540] sm:$0xf]  ;;  %v2896_v59 = vor.u32 %v3558_v53, %v2895_v51  ;;  %v2951_v6 = vld [vmem:[%s5453_s1 + $0x530] sm:$0xf] }
  0x3a   :  { %1690 = vmatpush.bf16.msrb.mxu2 %v2688_v44  ;;  %v3031_v44 = vld [vmem:[%s5453_s1 + $0x5d0] sm:$0xf]  ;;  %v3023_v56 = vld [vmem:[%s5453_s1 + $0x5c0] sm:$0xf]  ;;  %v3572_v7 = vld [vmem:[%s5453_s1 + $0x534] sm:$0xf0] }
  0x3b   :  { %1703 = vmatpush.bf16.msrb.mxu3 %v2752_v48  ;;  %v2968_v48 = vor.u32 %v3576_v43, %v2967_v42  ;;  %v3032_v52 = vor.u32 %v3592_v45, %v3031_v44  ;;  %v3024_v4 = vor.u32 %v3590_v57, %v3023_v56  ;;  %v3015_v8 = vld [vmem:[%s5453_s1 + $0x5b0] sm:$0xf]  ;;  %v2952_v12 = vor.u32 %v3572_v7, %v2951_v6  ;;  %v2879_v15 = vld [vmem:[%s5453_s1 + $0x4a0] sm:$0xf]  ;;  %v3586_v21 = vld [vmem:[%s5453_s1 + $0x5a4] sm:$0xf0] }
  0x3c   :  { %1665 = vmatpush.bf16.msrb.mxu0 %v2552_v55  ;;  %v3574_v55 = vld [vmem:[%s5453_s1 + $0x544] sm:$0xf0]  ;;  %v2807_v25 = vld [vmem:[%s5453_s1 + $0x410] sm:$0xf]  ;;  %v3536_v26 = vld [vmem:[%s5453_s1 + $0x414] sm:$0xf0] }
  0x3d   :  { %1678 = vmatpush.bf16.msrb.mxu1 %v2616_v62  ;;  %v2960_v61 = vor.u32 %v3574_v55, %v2959_v54  ;;  %v2823_v62 = vld [vmem:[%s5453_s1 + $0x430] sm:$0xf]  ;;  %v3552_v32 = vld [vmem:[%s5453_s1 + $0x494] sm:$0xf0]  ;;  %v2808_v38 = vor.u32 %v3536_v26, %v2807_v25  ;;  %v2799_v39 = vld [vmem:[%s5453_s1 + $0x400] sm:$0xf] }
  0x3e   :  { %1691 = vmatpush.bf16.msrb.mxu2 %v2680_v63  ;;  %v3540_v63 = vld [vmem:[%s5453_s1 + $0x434] sm:$0xf0]  ;;  %v2871_v30 = vld [vmem:[%s5453_s1 + $0x490] sm:$0xf]  ;;  %v2863_v43 = vld [vmem:[%s5453_s1 + $0x480] sm:$0xf] }
  0x3f   :  { %1704 = vmatpush.bf16.msrb.mxu3 %v2744_v3  ;;  %v2887_v3 = vld [vmem:[%s5453_s1 + $0x4b0] sm:$0xf]  ;;  %v2824_v10 = vor.u32 %v3540_v63, %v2823_v62  ;;  %v3584_v37 = vld [vmem:[%s5453_s1 + $0x594] sm:$0xf0]  ;;  %v2872_v41 = vor.u32 %v3552_v32, %v2871_v30  ;;  %v3550_v44 = vld [vmem:[%s5453_s1 + $0x484] sm:$0xf0] }
  0x40   :  { %1666 = vmatpush.bf16.msrb.mxu0 %v2544_v9  ;;  %v3588_v9 = vld [vmem:[%s5453_s1 + $0x5b4] sm:$0xf0]  ;;  %v2888_v11 = vor.u32 %v3556_v5, %v2887_v3  ;;  %v2927_v45 = vld [vmem:[%s5453_s1 + $0x500] sm:$0xf]  ;;  %v3582_v49 = vld [vmem:[%s5453_s1 + $0x584] sm:$0xf0]  ;;  %v2864_v57 = vor.u32 %v3550_v44, %v2863_v43 }
  0x41   :  { %1679 = vmatpush.bf16.msrb.mxu1 %v2608_v13  ;;  %v2815_v13 = vld [vmem:[%s5453_s1 + $0x420] sm:$0xf]  ;;  %v3016_v16 = vor.u32 %v3588_v9, %v3015_v8  ;;  %v3111_v50 = vld [vmem:[%s5453_s1 + $0x670] sm:$0xf]  ;;  %v3612_v51 = vld [vmem:[%s5453_s1 + $0x674] sm:$0xf0] }
  0x42   :  { %1692 = vmatpush.bf16.msrb.mxu2 %v2672_v14  ;;  %v3538_v14 = vld [vmem:[%s5453_s1 + $0x424] sm:$0xf0]  ;;  %v3628_v54 = vld [vmem:[%s5453_s1 + $0x6f4] sm:$0xf0]  ;;  %v3239_v55 = vld [vmem:[%s5453_s1 + $0x770] sm:$0xf]  ;;  %v3112_v63 = vor.u32 %v3612_v51, %v3111_v50 }
  0x43   :  { %1705 = vmatpush.bf16.msrb.mxu3 %v2736_v17  ;;  %1667 = vmatmul.bf16.vlgmr.msrb.gmra.mxu0 %v4161_v0  ;;  %v3554_v17 = vld [vmem:[%s5453_s1 + $0x4a4] sm:$0xf0]  ;;  %v2816_v22 = vor.u32 %v3538_v14, %v2815_v13  ;;  %v3644_v56 = vld [vmem:[%s5453_s1 + $0x774] sm:$0xf0]  ;;  %v3103_v5 = vld [vmem:[%s5453_s1 + $0x660] sm:$0xf] }
  0x44   :  { %1711 = vmatpush.bf16.msra.mxu0 %v2856_v18  ;;  %1680 = vmatmul.bf16.vlgmr.msrb.gmra.mxu1 %v4165_v2  ;;  %v2943_v18 = vld [vmem:[%s5453_s1 + $0x520] sm:$0xf]  ;;  %v2880_v23 = vor.u32 %v3554_v17, %v2879_v15  ;;  %v3610_v6 = vld [vmem:[%s5453_s1 + $0x664] sm:$0xf0]  ;;  %v305_v15 = vld [vmem:[#allocation1 + $0x12] sm:$0xff] }
  0x45   :  { %1724 = vmatpush.bf16.msra.mxu1 %v2920_v19  ;;  %1693 = vmatmul.bf16.vlgmr.msrb.gmra.mxu2 %v4156_v60  ;;  %v3570_v19 = vld [vmem:[%s5453_s1 + $0x524] sm:$0xf0]  ;;  %v3167_v7 = vld [vmem:[%s5453_s1 + $0x6e0] sm:$0xf]  ;;  %v3624_v25 = vld [vmem:[%s5453_s1 + $0x6d4] sm:$0xf0] }
  0x46   :  { %1737 = vmatpush.bf16.msra.mxu2 %v2984_v20  ;;  %1706 = vmatmul.bf16.vlgmr.msrb.gmra.mxu3 %v4163_v1  ;;  %v3007_v20 = vld [vmem:[%s5453_s1 + $0x5a0] sm:$0xf]  ;;  %v3626_v9 = vld [vmem:[%s5453_s1 + $0x6e4] sm:$0xf0]  ;;  %v3223_v26 = vld [vmem:[%s5453_s1 + $0x750] sm:$0xf] }
  0x47   :  { %1750 = vmatpush.bf16.msra.mxu3 %v3048_v24  ;;  %v2944_v24 = vor.u32 %v3570_v19, %v2943_v18  ;;  %v3008_v31 = vor.u32 %v3586_v21, %v3007_v20  ;;  %v3295_v13 = vld [vmem:[%s5453_s1 + $0x7e0] sm:$0xf]  ;;  %v3658_v14 = vld [vmem:[%s5453_s1 + $0x7e4] sm:$0xf0]  ;;  %v3104_v18 = vor.u32 %v3610_v6, %v3103_v5  ;;  %v3168_v19 = vor.u32 %v3626_v9, %v3167_v7  ;;  %v3095_v21 = vld [vmem:[%s5453_s1 + $0x650] sm:$0xf] }
  0x48   :  { %1712 = vmatpush.bf16.msra.mxu0 %v2848_v33  ;;  %v2935_v33 = vld [vmem:[%s5453_s1 + $0x510] sm:$0xf]  ;;  %v306_v17 = vld [vmem:[#allocation1 + $0x1b] sm:$0xff]  ;;  %v3638_v43 = vld [vmem:[%s5453_s1 + $0x744] sm:$0xf0] }
  0x49   :  { %1725 = vmatpush.bf16.msra.mxu1 %v2912_v35  ;;  %v3568_v35 = vld [vmem:[%s5453_s1 + $0x514] sm:$0xf0]  ;;  %v3279_v44 = vld [vmem:[%s5453_s1 + $0x7c0] sm:$0xf] }
  0x4a   :  { %1738 = vmatpush.bf16.msra.mxu2 %v2976_v36  ;;  %v2999_v36 = vld [vmem:[%s5453_s1 + $0x590] sm:$0xf]  ;;  %v2936_v42 = vor.u32 %v3568_v35, %v2935_v33  ;;  %v3640_v30 = vld [vmem:[%s5453_s1 + $0x754] sm:$0xf0]  ;;  %v3087_v35 = vld [vmem:[%s5453_s1 + $0x640] sm:$0xf] }
  0x4b   :  { %1751 = vmatpush.bf16.msra.mxu3 %v3040_v40  ;;  %v3534_v40 = vld [vmem:[%s5453_s1 + $0x404] sm:$0xf0]  ;;  %v3656_v32 = vld [vmem:[%s5453_s1 + $0x7d4] sm:$0xf0] }
  0x4c   :  { %1713 = vmatpush.bf16.msra.mxu0 %v2840_v46  ;;  %v3000_v46 = vor.u32 %v3584_v37, %v2999_v36  ;;  %v2800_v53 = vor.u32 %v3534_v40, %v2799_v39  ;;  %v3606_v36 = vld [vmem:[%s5453_s1 + $0x644] sm:$0xf0]  ;;  %v3151_v39 = vld [vmem:[%s5453_s1 + $0x6c0] sm:$0xf] }
  0x4d   :  { %1726 = vmatpush.bf16.msra.mxu1 %v2904_v47  ;;  %v3566_v47 = vld [vmem:[%s5453_s1 + $0x504] sm:$0xf0] }
  0x4e   :  { %1739 = vmatpush.bf16.msra.mxu2 %v2968_v48  ;;  %v2991_v48 = vld [vmem:[%s5453_s1 + $0x580] sm:$0xf]  ;;  %v3622_v40 = vld [vmem:[%s5453_s1 + $0x6c4] sm:$0xf0] }
  0x4f   :  { %1752 = vmatpush.bf16.msra.mxu3 %v3032_v52  ;;  %v3175_v52 = vld [vmem:[%s5453_s1 + $0x6f0] sm:$0xf]  ;;  %v2992_v62 = vor.u32 %v3582_v49, %v2991_v48 }
  0x50   :  { %1714 = vmatpush.bf16.msra.mxu0 %v2832_v58  ;;  %v2928_v58 = vor.u32 %v3566_v47, %v2927_v45  ;;  %v3176_v3 = vor.u32 %v3628_v54, %v3175_v52  ;;  %v3654_v45 = vld [vmem:[%s5453_s1 + $0x7c4] sm:$0xf0] }
  0x51   :  { %1727 = vmatpush.bf16.msra.mxu1 %v2896_v59  ;;  %v3303_v59 = vld [vmem:[%s5453_s1 + $0x7f0] sm:$0xf] }
  0x52   :  { %1740 = vmatpush.bf16.msra.mxu2 %v2960_v61  ;;  %v3660_v61 = vld [vmem:[%s5453_s1 + $0x7f4] sm:$0xf0] }
  0x53   :  { %1753 = vmatpush.bf16.msra.mxu3 %v3024_v4  ;;  %v3240_v4 = vor.u32 %v3644_v56, %v3239_v55  ;;  %v3304_v8 = vor.u32 %v3660_v61, %v3303_v59 }
  0x54   :  { %1715 = vmatpush.bf16.msra.mxu0 %v2824_v10  ;;  %v3231_v10 = vld [vmem:[%s5453_s1 + $0x760] sm:$0xf] }
  0x55   :  { %1728 = vmatpush.bf16.msra.mxu1 %v2888_v11  ;;  %v3642_v11 = vld [vmem:[%s5453_s1 + $0x764] sm:$0xf0] }
  0x56   :  { %1741 = vmatpush.bf16.msra.mxu2 %v2952_v12  ;;  %v303_v12 = vld [vmem:[#allocation1] sm:$0xff]  ;;  %v3232_v20 = vor.u32 %v3642_v11, %v3231_v10 }
  0x57   :  { %1754 = vmatpush.bf16.msra.mxu3 %v3016_v16  ;;  %v304_v16 = vld [vmem:[#allocation1 + $0x9] sm:$0xff] }
  0x58   :  { %1716 = vmatpush.bf16.msra.mxu0 %v2816_v22  ;;  %v3608_v22 = vld [vmem:[%s5453_s1 + $0x654] sm:$0xf0] }
  0x59   :  { %1729 = vmatpush.bf16.msra.mxu1 %v2880_v23  ;;  %v3159_v23 = vld [vmem:[%s5453_s1 + $0x6d0] sm:$0xf]  ;;  %v3096_v33 = vor.u32 %v3608_v22, %v3095_v21 }
  0x5a   :  { %1742 = vmatpush.bf16.msra.mxu2 %v2944_v24  ;;  %v3296_v24 = vor.u32 %v3658_v14, %v3295_v13  ;;  %v3160_v37 = vor.u32 %v3624_v25, %v3159_v23 }
  0x5b   :  { %1755 = vmatpush.bf16.msra.mxu3 %v3008_v31  ;;  %v3287_v31 = vld [vmem:[%s5453_s1 + $0x7d0] sm:$0xf] }
  0x5c   :  { %1717 = vmatpush.bf16.msra.mxu0 %v2808_v38  ;;  %v3224_v38 = vor.u32 %v3640_v30, %v3223_v26 }
  0x5d   :  { %1730 = vmatpush.bf16.msra.mxu1 %v2872_v41  ;;  %v3215_v41 = vld [vmem:[%s5453_s1 + $0x740] sm:$0xf] }
  0x5e   :  { %1743 = vmatpush.bf16.msra.mxu2 %v2936_v42  ;;  %v3288_v42 = vor.u32 %v3656_v32, %v3287_v31 }
  0x5f   :  { %1756 = vmatpush.bf16.msra.mxu3 %v3000_v46 }
  0x60   :  { %1718 = vmatpush.bf16.msra.mxu0 %v2800_v53 }
  0x61   :  { %1731 = vmatpush.bf16.msra.mxu1 %v2864_v57 }
  0x62   :  { %1744 = vmatpush.bf16.msra.mxu2 %v2928_v58 }
  0x63   :  { %1757 = vmatpush.bf16.msra.mxu3 %v2992_v62  ;;  %1719 = vmatmul.bf16.vlgmr.msra.gmra.mxu0 %v303_v12 }
  0x64   :  { %1763 = vmatpush.bf16.msrb.mxu0 %v3112_v63  ;;  %1732 = vmatmul.bf16.vlgmr.msra.gmra.mxu1 %v304_v16 }
  0x65   :  { %1776 = vmatpush.bf16.msrb.mxu1 %v3176_v3  ;;  %1745 = vmatmul.bf16.vlgmr.msra.gmra.mxu2 %v305_v15 }
  0x66   :  { %1789 = vmatpush.bf16.msrb.mxu2 %v3240_v4  ;;  %1758 = vmatmul.bf16.vlgmr.msra.gmra.mxu3 %v306_v17 }
  0x67   :  { %1802 = vmatpush.bf16.msrb.mxu3 %v3304_v8 }
  0x68   :  { %1764 = vmatpush.bf16.msrb.mxu0 %v3104_v18 }
  0x69   :  { %1777 = vmatpush.bf16.msrb.mxu1 %v3168_v19 }
  0x6a   :  { %1790 = vmatpush.bf16.msrb.mxu2 %v3232_v20 }
  0x6b   :  { %1803 = vmatpush.bf16.msrb.mxu3 %v3296_v24 }
  0x6c   :  { %12 = vsyncpa [#allocation3], 0  ;;  %1765 = vmatpush.bf16.msrb.mxu0 %v3096_v33  ;;  %v3088_v46 = vor.u32 %v3606_v36, %v3087_v35  ;;  %v3152_v47 = vor.u32 %v3622_v40, %v3151_v39  ;;  %v3216_v48 = vor.u32 %v3638_v43, %v3215_v41  ;;  %v3079_v49 = vld [vmem:[%s5453_s1 + $0x630] sm:$0xf]  ;;  %v3604_v50 = vld [vmem:[%s5453_s1 + $0x634] sm:$0xf0]  ;;  %v3280_v52 = vor.u32 %v3654_v45, %v3279_v44 }
  0x6d   :  { %1778 = vmatpush.bf16.msrb.mxu1 %v3160_v37  ;;  %v3143_v51 = vld [vmem:[%s5453_s1 + $0x6b0] sm:$0xf]  ;;  %v3620_v53 = vld [vmem:[%s5453_s1 + $0x6b4] sm:$0xf0]  ;;  %v3080_v58 = vor.u32 %v3604_v50, %v3079_v49  ;;  %v3071_v62 = vld [vmem:[%s5453_s1 + $0x620] sm:$0xf] }
  0x6e   :  { %1791 = vmatpush.bf16.msrb.mxu2 %v3224_v38  ;;  %v3207_v54 = vld [vmem:[%s5453_s1 + $0x730] sm:$0xf]  ;;  %v3636_v55 = vld [vmem:[%s5453_s1 + $0x734] sm:$0xf0]  ;;  %v3144_v59 = vor.u32 %v3620_v53, %v3143_v51  ;;  %v3602_v63 = vld [vmem:[%s5453_s1 + $0x624] sm:$0xf0] }
  0x6f   :  { %1804 = vmatpush.bf16.msrb.mxu3 %v3288_v42  ;;  %v3271_v56 = vld [vmem:[%s5453_s1 + $0x7b0] sm:$0xf]  ;;  %v3652_v57 = vld [vmem:[%s5453_s1 + $0x7b4] sm:$0xf0]  ;;  %v3208_v61 = vor.u32 %v3636_v55, %v3207_v54  ;;  %v3135_v3 = vld [vmem:[%s5453_s1 + $0x6a0] sm:$0xf]  ;;  %v3072_v10 = vor.u32 %v3602_v63, %v3071_v62 }
  0x70   :  { %1766 = vmatpush.bf16.msrb.mxu0 %v3088_v46  ;;  %v3272_v4 = vor.u32 %v3652_v57, %v3271_v56  ;;  %v3618_v5 = vld [vmem:[%s5453_s1 + $0x6a4] sm:$0xf0]  ;;  %v3199_v6 = vld [vmem:[%s5453_s1 + $0x720] sm:$0xf]  ;;  %v3063_v13 = vld [vmem:[%s5453_s1 + $0x610] sm:$0xf] }
  0x71   :  { %1779 = vmatpush.bf16.msrb.mxu1 %v3152_v47  ;;  %v3634_v7 = vld [vmem:[%s5453_s1 + $0x724] sm:$0xf0]  ;;  %v3263_v8 = vld [vmem:[%s5453_s1 + $0x7a0] sm:$0xf]  ;;  %v3136_v11 = vor.u32 %v3618_v5, %v3135_v3  ;;  %v3600_v14 = vld [vmem:[%s5453_s1 + $0x614] sm:$0xf0] }
  0x72   :  { %1792 = vmatpush.bf16.msrb.mxu2 %v3216_v48  ;;  %v3650_v9 = vld [vmem:[%s5453_s1 + $0x7a4] sm:$0xf0]  ;;  %v3200_v12 = vor.u32 %v3634_v7, %v3199_v6  ;;  %v3127_v15 = vld [vmem:[%s5453_s1 + $0x690] sm:$0xf]  ;;  %v3616_v17 = vld [vmem:[%s5453_s1 + $0x694] sm:$0xf0]  ;;  %v3064_v22 = vor.u32 %v3600_v14, %v3063_v13 }
  0x73   :  { %1805 = vmatpush.bf16.msrb.mxu3 %v3280_v52  ;;  %v3264_v16 = vor.u32 %v3650_v9, %v3263_v8  ;;  %v3191_v18 = vld [vmem:[%s5453_s1 + $0x710] sm:$0xf]  ;;  %v3632_v19 = vld [vmem:[%s5453_s1 + $0x714] sm:$0xf0]  ;;  %v3055_v23 = vld [vmem:[%s5453_s1 + $0x600] sm:$0xf]  ;;  %v3128_v25 = vor.u32 %v3616_v17, %v3127_v15 }
  0x74   :  { %1767 = vmatpush.bf16.msrb.mxu0 %v3080_v58  ;;  %v3255_v20 = vld [vmem:[%s5453_s1 + $0x790] sm:$0xf]  ;;  %v3648_v21 = vld [vmem:[%s5453_s1 + $0x794] sm:$0xf0]  ;;  %v3598_v24 = vld [vmem:[%s5453_s1 + $0x604] sm:$0xf0]  ;;  %v3192_v26 = vor.u32 %v3632_v19, %v3191_v18 }
  0x75   :  { %1780 = vmatpush.bf16.msrb.mxu1 %v3144_v59  ;;  %v3119_v30 = vld [vmem:[%s5453_s1 + $0x680] sm:$0xf]  ;;  %v3614_v31 = vld [vmem:[%s5453_s1 + $0x684] sm:$0xf0]  ;;  %v3256_v33 = vor.u32 %v3648_v21, %v3255_v20  ;;  %v3419_v38 = vld [vmem:[%s5453_s1 + $0x74] sm:$0xf]  ;;  %v3056_v41 = vor.u32 %v3598_v24, %v3055_v23 }
  0x76   :  { %1793 = vmatpush.bf16.msrb.mxu2 %v3208_v61  ;;  %v3183_v32 = vld [vmem:[%s5453_s1 + $0x700] sm:$0xf]  ;;  %v3630_v35 = vld [vmem:[%s5453_s1 + $0x704] sm:$0xf0]  ;;  %v2345_v39 = vld [vmem:[%s5453_s1 + $0x78] sm:$0xf0]  ;;  %v3120_v45 = vor.u32 %v3614_v31, %v3119_v30 }
  0x77   :  { %1806 = vmatpush.bf16.msrb.mxu3 %v3272_v4  ;;  %v3247_v36 = vld [vmem:[%s5453_s1 + $0x780] sm:$0xf]  ;;  %v3646_v37 = vld [vmem:[%s5453_s1 + $0x784] sm:$0xf0]  ;;  %v3435_v40 = vld [vmem:[%s5453_s1 + $0xf4] sm:$0xf]  ;;  %v3184_v46 = vor.u32 %v3630_v35, %v3183_v32  ;;  %v2348_v50 = vor.u32 %v3419_v38, %v2345_v39 }
  0x78   :  { %1768 = vmatpush.bf16.msrb.mxu0 %v3072_v10  ;;  %v2409_v42 = vld [vmem:[%s5453_s1 + $0xf8] sm:$0xf0]  ;;  %v3451_v43 = vld [vmem:[%s5453_s1 + $0x174] sm:$0xf]  ;;  %v3248_v49 = vor.u32 %v3646_v37, %v3247_v36  ;;  %v3417_v53 = vld [vmem:[%s5453_s1 + $0x64] sm:$0xf] }
  0x79   :  { %1781 = vmatpush.bf16.msrb.mxu1 %v3136_v11  ;;  %v2473_v44 = vld [vmem:[%s5453_s1 + $0x178] sm:$0xf0]  ;;  %v3467_v47 = vld [vmem:[%s5453_s1 + $0x1f4] sm:$0xf]  ;;  %v2412_v51 = vor.u32 %v3435_v40, %v2409_v42  ;;  %v2337_v54 = vld [vmem:[%s5453_s1 + $0x68] sm:$0xf0] }
  0x7a   :  { %1794 = vmatpush.bf16.msrb.mxu2 %v3200_v12  ;;  %v2537_v48 = vld [vmem:[%s5453_s1 + $0x1f8] sm:$0xf0]  ;;  %v2476_v52 = vor.u32 %v3451_v43, %v2473_v44  ;;  %v3433_v55 = vld [vmem:[%s5453_s1 + $0xe4] sm:$0xf]  ;;  %v2401_v57 = vld [vmem:[%s5453_s1 + $0xe8] sm:$0xf0]  ;;  %v2340_v6 = vor.u32 %v3417_v53, %v2337_v54 }
  0x7b   :  { %1807 = vmatpush.bf16.msrb.mxu3 %v3264_v16  ;;  %v2540_v56 = vor.u32 %v3467_v47, %v2537_v48  ;;  %v3449_v58 = vld [vmem:[%s5453_s1 + $0x164] sm:$0xf]  ;;  %v2465_v59 = vld [vmem:[%s5453_s1 + $0x168] sm:$0xf0]  ;;  %v309_v3 = vld [vmem:[#allocation1 + $0x36] sm:$0xff]  ;;  %v2404_v7 = vor.u32 %v3433_v55, %v2401_v57  ;;  %s3722_s20 = smov [#allocation2]  }
  0x7c   :  { %1769 = vmatpush.bf16.msrb.mxu0 %v3064_v22  ;;  %v307_v61 = vld [vmem:[#allocation1 + $0x24] sm:$0xff]  ;;  %v2529_v63 = vld [vmem:[%s5453_s1 + $0x1e8] sm:$0xf0]  ;;  %v2468_v8 = vor.u32 %v3449_v58, %v2465_v59  ;;  %v3415_v9 = vld [vmem:[%s5453_s1 + $0x54] sm:$0xf]  ;;  %s2274_s21 = sshll.u32 %s3722_s20, 4  ;;  %s2275_s21 = int_to_ptr.vmem [resolvable:$true] %s2274_s21 }
  0x7d   :  { %1782 = vmatpush.bf16.msrb.mxu1 %v3128_v25  ;;  %v3465_v62 = vld [vmem:[%s5453_s1 + $0x1e4] sm:$0xf]  ;;  %v308_v4 = vld [vmem:[#allocation1 + $0x2d] sm:$0xff]  ;;  %v2329_v10 = vld [vmem:[%s5453_s1 + $0x58] sm:$0xf0] }
  0x7e   :  { %1795 = vmatpush.bf16.msrb.mxu2 %v3192_v26  ;;  %v310_v5 = vld [vmem:[#allocation1 + $0x3f] sm:$0xff]  ;;  %v3431_v11 = vld [vmem:[%s5453_s1 + $0xd4] sm:$0xf]  ;;  %v2532_v12 = vor.u32 %v3465_v62, %v2529_v63  ;;  %v2332_v18 = vor.u32 %v3415_v9, %v2329_v10  ;;  %v2321_v22 = vld [vmem:[%s5453_s1 + $0x48] sm:$0xf0] }
  0x7f   :  { %1808 = vmatpush.bf16.msrb.mxu3 %v3256_v33  ;;  %v2393_v13 = vld [vmem:[%s5453_s1 + $0xd8] sm:$0xf0]  ;;  %v3447_v14 = vld [vmem:[%s5453_s1 + $0x154] sm:$0xf]  ;;  %v3413_v21 = vld [vmem:[%s5453_s1 + $0x44] sm:$0xf] }
  0x80   :  { %1770 = vmatpush.bf16.msrb.mxu0 %v3056_v41  ;;  %v2457_v15 = vld [vmem:[%s5453_s1 + $0x158] sm:$0xf0]  ;;  %v3463_v16 = vld [vmem:[%s5453_s1 + $0x1d4] sm:$0xf]  ;;  %v2396_v19 = vor.u32 %v3431_v11, %v2393_v13  ;;  %v3429_v23 = vld [vmem:[%s5453_s1 + $0xc4] sm:$0xf]  ;;  %v2324_v33 = vor.u32 %v3413_v21, %v2321_v22 }
  0x81   :  { %1783 = vmatpush.bf16.msrb.mxu1 %v3120_v45  ;;  %v2521_v17 = vld [vmem:[%s5453_s1 + $0x1d8] sm:$0xf0]  ;;  %v2460_v20 = vor.u32 %v3447_v14, %v2457_v15  ;;  %v2385_v25 = vld [vmem:[%s5453_s1 + $0xc8] sm:$0xf0]  ;;  %v3445_v26 = vld [vmem:[%s5453_s1 + $0x144] sm:$0xf] }
  0x82   :  { %1796 = vmatpush.bf16.msrb.mxu2 %v3184_v46  ;;  %v2524_v24 = vor.u32 %v3463_v16, %v2521_v17  ;;  %v2449_v30 = vld [vmem:[%s5453_s1 + $0x148] sm:$0xf0]  ;;  %v3461_v31 = vld [vmem:[%s5453_s1 + $0x1c4] sm:$0xf]  ;;  %v2388_v35 = vor.u32 %v3429_v23, %v2385_v25  ;;  %v3411_v37 = vld [vmem:[%s5453_s1 + $0x34] sm:$0xf] }
  0x83   :  { %1809 = vmatpush.bf16.msrb.mxu3 %v3248_v49  ;;  %1771 = vmatmul.bf16.vlgmr.msrb.gmra.mxu0 %v307_v61  ;;  %v2513_v32 = vld [vmem:[%s5453_s1 + $0x1c8] sm:$0xf0]  ;;  %v2452_v36 = vor.u32 %v3445_v26, %v2449_v30  ;;  %v2313_v38 = vld [vmem:[%s5453_s1 + $0x38] sm:$0xf0]  ;;  %v3427_v39 = vld [vmem:[%s5453_s1 + $0xb4] sm:$0xf] }
  0x84   :  { %1815 = vmatpush.bf16.msra.mxu0 %v2348_v50  ;;  %1784 = vmatmul.bf16.vlgmr.msrb.gmra.mxu1 %v308_v4  ;;  %v2516_v40 = vor.u32 %v3461_v31, %v2513_v32  ;;  %v2377_v41 = vld [vmem:[%s5453_s1 + $0xb8] sm:$0xf0]  ;;  %v3443_v42 = vld [vmem:[%s5453_s1 + $0x134] sm:$0xf]  ;;  %v2316_v46 = vor.u32 %v3411_v37, %v2313_v38  ;;  %v3409_v49 = vld [vmem:[%s5453_s1 + $0x24] sm:$0xf] }
  0x85   :  { %1828 = vmatpush.bf16.msra.mxu1 %v2412_v51  ;;  %1797 = vmatmul.bf16.vlgmr.msrb.gmra.mxu2 %v309_v3  ;;  %v2441_v43 = vld [vmem:[%s5453_s1 + $0x138] sm:$0xf0]  ;;  %v3459_v44 = vld [vmem:[%s5453_s1 + $0x1b4] sm:$0xf]  ;;  %v2380_v47 = vor.u32 %v3427_v39, %v2377_v41  ;;  %v2305_v50 = vld [vmem:[%s5453_s1 + $0x28] sm:$0xf0] }
  0x86   :  { %1841 = vmatpush.bf16.msra.mxu2 %v2476_v52  ;;  %1810 = vmatmul.bf16.vlgmr.msrb.gmra.mxu3 %v310_v5  ;;  %v2505_v45 = vld [vmem:[%s5453_s1 + $0x1b8] sm:$0xf0]  ;;  %v2444_v48 = vor.u32 %v3443_v42, %v2441_v43  ;;  %v3425_v51 = vld [vmem:[%s5453_s1 + $0xa4] sm:$0xf]  ;;  %v2369_v53 = vld [vmem:[%s5453_s1 + $0xa8] sm:$0xf0]  ;;  %v2308_v58 = vor.u32 %v3409_v49, %v2305_v50 }
  0x87   :  { %1854 = vmatpush.bf16.msra.mxu3 %v2540_v56  ;;  %v2508_v52 = vor.u32 %v3459_v44, %v2505_v45  ;;  %v3441_v54 = vld [vmem:[%s5453_s1 + $0x124] sm:$0xf]  ;;  %v2433_v55 = vld [vmem:[%s5453_s1 + $0x128] sm:$0xf0]  ;;  %v2372_v59 = vor.u32 %v3425_v51, %v2369_v53  ;;  %v3407_v62 = vld [vmem:[%s5453_s1 + $0x14] sm:$0xf] }
  0x88   :  { %1816 = vmatpush.bf16.msra.mxu0 %v2340_v6  ;;  %v3457_v56 = vld [vmem:[%s5453_s1 + $0x1a4] sm:$0xf]  ;;  %v2497_v57 = vld [vmem:[%s5453_s1 + $0x1a8] sm:$0xf0]  ;;  %v2436_v61 = vor.u32 %v3441_v54, %v2433_v55  ;;  %v2297_v63 = vld [vmem:[%s5453_s1 + $0x18] sm:$0xf0] }
  0x89   :  { %1829 = vmatpush.bf16.msra.mxu1 %v2404_v7  ;;  %v3423_v3 = vld [vmem:[%s5453_s1 + $0x94] sm:$0xf]  ;;  %v2500_v4 = vor.u32 %v3457_v56, %v2497_v57  ;;  %v2361_v5 = vld [vmem:[%s5453_s1 + $0x98] sm:$0xf0]  ;;  %v2300_v10 = vor.u32 %v3407_v62, %v2297_v63  ;;  %v3405_v11 = vld [vmem:[%s5453_s1 + $0x4] sm:$0xf] }
  0x8a   :  { %1842 = vmatpush.bf16.msra.mxu2 %v2468_v8  ;;  %v3439_v6 = vld [vmem:[%s5453_s1 + $0x114] sm:$0xf]  ;;  %v2425_v7 = vld [vmem:[%s5453_s1 + $0x118] sm:$0xf0]  ;;  %v2364_v13 = vor.u32 %v3423_v3, %v2361_v5  ;;  %v3421_v15 = vld [vmem:[%s5453_s1 + $0x84] sm:$0xf] }
  0x8b   :  { %1855 = vmatpush.bf16.msra.mxu3 %v2532_v12  ;;  %v3455_v8 = vld [vmem:[%s5453_s1 + $0x194] sm:$0xf]  ;;  %v2489_v9 = vld [vmem:[%s5453_s1 + $0x198] sm:$0xf0]  ;;  %v2289_v12 = vld [vmem:[%s5453_s1 + $0x8] sm:$0xf0]  ;;  %v2428_v14 = vor.u32 %v3439_v6, %v2425_v7 }
  0x8c   :  { %1817 = vmatpush.bf16.msra.mxu0 %v2332_v18  ;;  %v2353_v16 = vld [vmem:[%s5453_s1 + $0x88] sm:$0xf0]  ;;  %v3437_v17 = vld [vmem:[%s5453_s1 + $0x104] sm:$0xf]  ;;  %v2492_v18 = vor.u32 %v3455_v8, %v2489_v9  ;;  %v3483_v22 = vld [vmem:[%s5453_s1 + $0x274] sm:$0xf]  ;;  %v2292_v25 = vor.u32 %v3405_v11, %v2289_v12 }
  0x8d   :  { %1830 = vmatpush.bf16.msra.mxu1 %v2396_v19  ;;  %v2417_v19 = vld [vmem:[%s5453_s1 + $0x108] sm:$0xf0]  ;;  %v2601_v23 = vld [vmem:[%s5453_s1 + $0x278] sm:$0xf0]  ;;  %v3515_v30 = vld [vmem:[%s5453_s1 + $0x374] sm:$0xf]  ;;  %v2356_v32 = vor.u32 %v3421_v15, %v2353_v16 }
  0x8e   :  { %1843 = vmatpush.bf16.msra.mxu2 %v2460_v20  ;;  %v3453_v20 = vld [vmem:[%s5453_s1 + $0x184] sm:$0xf]  ;;  %v2481_v21 = vld [vmem:[%s5453_s1 + $0x188] sm:$0xf0]  ;;  %v2665_v26 = vld [vmem:[%s5453_s1 + $0x2f8] sm:$0xf0]  ;;  %v2604_v38 = vor.u32 %v3483_v22, %v2601_v23 }
  0x8f   :  { %1856 = vmatpush.bf16.msra.mxu3 %v2524_v24  ;;  %v3499_v24 = vld [vmem:[%s5453_s1 + $0x2f4] sm:$0xf]  ;;  %v2729_v31 = vld [vmem:[%s5453_s1 + $0x378] sm:$0xf0]  ;;  %v2484_v37 = vor.u32 %v3453_v20, %v2481_v21  ;;  %v3481_v41 = vld [vmem:[%s5453_s1 + $0x264] sm:$0xf] }
  0x90   :  { %1818 = vmatpush.bf16.msra.mxu0 %v2324_v33  ;;  %v2420_v33 = vor.u32 %v3437_v17, %v2417_v19  ;;  %v2668_v39 = vor.u32 %v3499_v24, %v2665_v26  ;;  %v2593_v42 = vld [vmem:[%s5453_s1 + $0x268] sm:$0xf0]  ;;  %v3497_v43 = vld [vmem:[%s5453_s1 + $0x2e4] sm:$0xf]  ;;  %v3479_v53 = vld [vmem:[%s5453_s1 + $0x254] sm:$0xf] }
  0x91   :  { %1831 = vmatpush.bf16.msra.mxu1 %v2388_v35  ;;  %v3531_v35 = vld [vmem:[%s5453_s1 + $0x3f4] sm:$0xf]  ;;  %v2657_v45 = vld [vmem:[%s5453_s1 + $0x2e8] sm:$0xf0]  ;;  %v2596_v50 = vor.u32 %v3481_v41, %v2593_v42  ;;  %v2585_v54 = vld [vmem:[%s5453_s1 + $0x258] sm:$0xf0] }
  0x92   :  { %1844 = vmatpush.bf16.msra.mxu2 %v2452_v36  ;;  %v2793_v36 = vld [vmem:[%s5453_s1 + $0x3f8] sm:$0xf0]  ;;  %v2785_v49 = vld [vmem:[%s5453_s1 + $0x3e8] sm:$0xf0]  ;;  %v2660_v51 = vor.u32 %v3497_v43, %v2657_v45  ;;  %v3495_v55 = vld [vmem:[%s5453_s1 + $0x2d4] sm:$0xf]  ;;  %v2588_v63 = vor.u32 %v3479_v53, %v2585_v54 }
  0x93   :  { %1857 = vmatpush.bf16.msra.mxu3 %v2516_v40  ;;  %v2732_v40 = vor.u32 %v3515_v30, %v2729_v31  ;;  %v2796_v44 = vor.u32 %v3531_v35, %v2793_v36  ;;  %v2649_v57 = vld [vmem:[%s5453_s1 + $0x2d8] sm:$0xf0]  ;;  %v2577_v5 = vld [vmem:[%s5453_s1 + $0x248] sm:$0xf0]  ;;  %v3509_v6 = vld [vmem:[%s5453_s1 + $0x344] sm:$0xf] }
  0x94   :  { %1819 = vmatpush.bf16.msra.mxu0 %v2316_v46  ;;  %v3513_v46 = vld [vmem:[%s5453_s1 + $0x364] sm:$0xf]  ;;  %v2777_v62 = vld [vmem:[%s5453_s1 + $0x3d8] sm:$0xf0]  ;;  %v2652_v3 = vor.u32 %v3495_v55, %v2649_v57  ;;  %v2705_v7 = vld [vmem:[%s5453_s1 + $0x348] sm:$0xf0] }
  0x95   :  { %1832 = vmatpush.bf16.msra.mxu1 %v2380_v47  ;;  %v2721_v47 = vld [vmem:[%s5453_s1 + $0x368] sm:$0xf0]  ;;  %v3525_v8 = vld [vmem:[%s5453_s1 + $0x3c4] sm:$0xf]  ;;  %v2708_v12 = vor.u32 %v3509_v6, %v2705_v7  ;;  %v3491_v15 = vld [vmem:[%s5453_s1 + $0x2b4] sm:$0xf] }
  0x96   :  { %1845 = vmatpush.bf16.msra.mxu2 %v2444_v48  ;;  %v3529_v48 = vld [vmem:[%s5453_s1 + $0x3e4] sm:$0xf]  ;;  %v2769_v9 = vld [vmem:[%s5453_s1 + $0x3c8] sm:$0xf0]  ;;  %v2633_v17 = vld [vmem:[%s5453_s1 + $0x2b8] sm:$0xf0] }
  0x97   :  { %1858 = vmatpush.bf16.msra.mxu3 %v2508_v52  ;;  %v2724_v52 = vor.u32 %v3513_v46, %v2721_v47  ;;  %v2788_v56 = vor.u32 %v3529_v48, %v2785_v49  ;;  %v2772_v16 = vor.u32 %v3525_v8, %v2769_v9  ;;  %v2697_v19 = vld [vmem:[%s5453_s1 + $0x338] sm:$0xf0]  ;;  %v3523_v20 = vld [vmem:[%s5453_s1 + $0x3b4] sm:$0xf]  ;;  %v3473_v23 = vld [vmem:[%s5453_s1 + $0x224] sm:$0xf]  ;;  %v2636_v24 = vor.u32 %v3491_v15, %v2633_v17 }
  0x98   :  { %1820 = vmatpush.bf16.msra.mxu0 %v2308_v58  ;;  %v3511_v58 = vld [vmem:[%s5453_s1 + $0x354] sm:$0xf]  ;;  %v2761_v21 = vld [vmem:[%s5453_s1 + $0x3b8] sm:$0xf0]  ;;  %v2561_v26 = vld [vmem:[%s5453_s1 + $0x228] sm:$0xf0] }
  0x99   :  { %1833 = vmatpush.bf16.msra.mxu1 %v2372_v59  ;;  %v2713_v59 = vld [vmem:[%s5453_s1 + $0x358] sm:$0xf0]  ;;  %v3489_v30 = vld [vmem:[%s5453_s1 + $0x2a4] sm:$0xf]  ;;  %v2625_v31 = vld [vmem:[%s5453_s1 + $0x2a8] sm:$0xf0] }
  0x9a   :  { %1846 = vmatpush.bf16.msra.mxu2 %v2436_v61  ;;  %v3527_v61 = vld [vmem:[%s5453_s1 + $0x3d4] sm:$0xf]  ;;  %v2689_v35 = vld [vmem:[%s5453_s1 + $0x328] sm:$0xf0]  ;;  %v4898_v36 = vld [vmem:[%s5454_s2] sm:$0x3]  ;;  %v2628_v41 = vor.u32 %v3489_v30, %v2625_v31 }
  0x9b   :  { %1859 = vmatpush.bf16.msra.mxu3 %v2500_v4  ;;  %v3477_v4 = vld [vmem:[%s5453_s1 + $0x244] sm:$0xf]  ;;  %v2553_v43 = vld [vmem:[%s5453_s1 + $0x218] sm:$0xf0]  ;;  %v287_v45 = vperm.slane %v4898_v36, 0 }
  0x9c   :  { %1821 = vmatpush.bf16.msra.mxu0 %v2300_v10  ;;  %v2580_v10 = vor.u32 %v3477_v4, %v2577_v5  ;;  %v2617_v47 = vld [vmem:[%s5453_s1 + $0x298] sm:$0xf0]  ;;  %v3503_v48 = vld [vmem:[%s5453_s1 + $0x314] sm:$0xf]  ;;  %v3469_v53 = vld [vmem:[%s5453_s1 + $0x204] sm:$0xf] }
  0x9d   :  { %1834 = vmatpush.bf16.msra.mxu1 %v2364_v13  ;;  %v3475_v13 = vld [vmem:[%s5453_s1 + $0x234] sm:$0xf]  ;;  %v2681_v49 = vld [vmem:[%s5453_s1 + $0x318] sm:$0xf0]  ;;  %v2545_v54 = vld [vmem:[%s5453_s1 + $0x208] sm:$0xf0] }
  0x9e   :  { %1847 = vmatpush.bf16.msra.mxu2 %v2428_v14  ;;  %v2569_v14 = vld [vmem:[%s5453_s1 + $0x238] sm:$0xf0]  ;;  %v2684_v57 = vor.u32 %v3503_v48, %v2681_v49  ;;  %v3517_v4 = vld [vmem:[%s5453_s1 + $0x384] sm:$0xf]  ;;  %v2737_v5 = vld [vmem:[%s5453_s1 + $0x388] sm:$0xf0]  ;;  %v2548_v7 = vor.u32 %v3469_v53, %v2545_v54 }
  0x9f   :  { %1860 = vmatpush.bf16.msra.mxu3 %v2492_v18  ;;  %v3507_v18 = vld [vmem:[%s5453_s1 + $0x334] sm:$0xf]  ;;  %v2572_v22 = vor.u32 %v3475_v13, %v2569_v14  ;;  %v2921_v8 = vld [vmem:[%s5453_s1 + $0x4f8] sm:$0xf0]  ;;  %v3577_v30 = vld [vmem:[%s5453_s1 + $0x564] sm:$0xf] }
  0xa0   :  { %1822 = vmatpush.bf16.msra.mxu0 %v2292_v25  ;;  %v2700_v25 = vor.u32 %v3507_v18, %v2697_v19  ;;  %v3579_v9 = vld [vmem:[%s5453_s1 + $0x574] sm:$0xf]  ;;  %v3049_v14 = vld [vmem:[%s5453_s1 + $0x5f8] sm:$0xf0]  ;;  %v2977_v31 = vld [vmem:[%s5453_s1 + $0x568] sm:$0xf0] }
  0xa1   :  { %1835 = vmatpush.bf16.msra.mxu1 %v2356_v32  ;;  %v2764_v32 = vor.u32 %v3523_v20, %v2761_v21  ;;  %v3595_v13 = vld [vmem:[%s5453_s1 + $0x5f4] sm:$0xf]  ;;  %v2969_v48 = vld [vmem:[%s5453_s1 + $0x558] sm:$0xf0] }
  0xa2   :  { %1848 = vmatpush.bf16.msra.mxu2 %v2420_v33  ;;  %v3505_v33 = vld [vmem:[%s5453_s1 + $0x324] sm:$0xf]  ;;  %v3591_v49 = vld [vmem:[%s5453_s1 + $0x5d4] sm:$0xf] }
  0xa3   :  { %1861 = vmatpush.bf16.msra.mxu3 %v2484_v37  ;;  %1823 = vmatmul.bf16.vlgmr.msra.gmra.mxu0 %v4083_v28  ;;  %v3493_v28 = vld [vmem:[%s5453_s1 + $0x2c4] sm:$0xf]  ;;  %v2692_v42 = vor.u32 %v3505_v33, %v2689_v35 }
  0xa4   :  { %1867 = vmatpush.bf16.msrb.mxu0 %v2604_v38  ;;  %1836 = vmatmul.bf16.vlgmr.msra.gmra.mxu1 %v4093_v34  ;;  %v2641_v34 = vld [vmem:[%s5453_s1 + $0x2c8] sm:$0xf0]  ;;  %v3521_v37 = vld [vmem:[%s5453_s1 + $0x3a4] sm:$0xf] }
  0xa5   :  { %1880 = vmatpush.bf16.msrb.mxu1 %v2668_v39  ;;  %1849 = vmatmul.bf16.vlgmr.msra.gmra.mxu2 %v4081_v27  ;;  %v2716_v27 = vor.u32 %v3511_v58, %v2713_v59  ;;  %v2644_v11 = vor.u32 %v3493_v28, %v2641_v34  ;;  %v2753_v38 = vld [vmem:[%s5453_s1 + $0x3a8] sm:$0xf0]  ;;  %v2564_v39 = vor.u32 %v3473_v23, %v2561_v26  ;;  %v3485_v58 = vld [vmem:[%s5453_s1 + $0x284] sm:$0xf]  ;;  %v3547_v28 = vld [vmem:[%s5453_s1 + $0x474] sm:$0xf] }
  0xa6   :  { %1893 = vmatpush.bf16.msrb.mxu2 %v2732_v40  ;;  %1862 = vmatmul.bf16.vlgmr.msra.gmra.mxu3 %v4085_v29  ;;  %v2780_v29 = vor.u32 %v3527_v61, %v2777_v62  ;;  %v3471_v40 = vld [vmem:[%s5453_s1 + $0x214] sm:$0xf]  ;;  %v2756_v46 = vor.u32 %v3521_v37, %v2753_v38  ;;  %v1616_v55 = vpop.f32.mrf.mxu0  ;;  %v2609_v59 = vld [vmem:[%s5453_s1 + $0x288] sm:$0xf0]  ;;  %v3501_v61 = vld [vmem:[%s5453_s1 + $0x304] sm:$0xf] }
  0xa7   :  { %1906 = vmatpush.bf16.msrb.mxu3 %v2796_v44  ;;  %v3487_v44 = vld [vmem:[%s5453_s1 + $0x294] sm:$0xf]  ;;  %v1617_v62 = vadd.f32 %v1616_v55, %v287_v45  ;;  %v2849_v23 = vld [vmem:[%s5453_s1 + $0x468] sm:$0xf0]  ;;  %v3593_v35 = vld [vmem:[%s5453_s1 + $0x5e4] sm:$0xf] }
  0xa8   :  { %1868 = vmatpush.bf16.msrb.mxu0 %v2596_v50  ;;  %v3519_v50 = vld [vmem:[%s5453_s1 + $0x394] sm:$0xf]  ;;  %v2913_v26 = vld [vmem:[%s5453_s1 + $0x4e8] sm:$0xf0]  ;;  %v3541_v55 = vld [vmem:[%s5453_s1 + $0x444] sm:$0xf] }
  0xa9   :  { %1881 = vmatpush.bf16.msrb.mxu1 %v2660_v51  ;;  %v2745_v51 = vld [vmem:[%s5453_s1 + $0x398] sm:$0xf0]  ;;  %v3563_v34 = vld [vmem:[%s5453_s1 + $0x4f4] sm:$0xf]  ;;  %v3041_v37 = vld [vmem:[%s5453_s1 + $0x5e8] sm:$0xf0] }
  0xaa   :  { %1894 = vmatpush.bf16.msrb.mxu2 %v2724_v52  ;;  %v2556_v52 = vor.u32 %v3471_v40, %v2553_v43  ;;  %v1642_v15 = vpop.f32.mrf.mxu2  ;;  %v2924_v20 = vor.u32 %v3563_v34, %v2921_v8  ;;  %v2841_v43 = vld [vmem:[%s5453_s1 + $0x458] sm:$0xf0]  ;;  %v3044_v45 = vor.u32 %v3593_v35, %v3041_v37  ;;  %v3551_v37 = vld [vmem:[%s5453_s1 + $0x494] sm:$0xf] }
  0xab   :  { %1907 = vmatpush.bf16.msrb.mxu3 %v2788_v56  ;;  %v2620_v56 = vor.u32 %v3487_v44, %v2617_v47  ;;  %v1655_v19 = vpop.f32.mrf.mxu3  ;;  %v3559_v44 = vld [vmem:[%s5453_s1 + $0x4d4] sm:$0xf]  ;;  %v2953_v8 = vld [vmem:[%s5453_s1 + $0x538] sm:$0xf0] }
  0xac   :  { %1869 = vmatpush.bf16.msrb.mxu0 %v2588_v63  ;;  %v1629_v63 = vpop.f32.mrf.mxu1  ;;  %v3575_v47 = vld [vmem:[%s5453_s1 + $0x554] sm:$0xf]  ;;  %v2809_v35 = vld [vmem:[%s5453_s1 + $0x418] sm:$0xf0] }
  0xad   :  { %1882 = vmatpush.bf16.msrb.mxu1 %v2652_v3  ;;  %v2748_v3 = vor.u32 %v3519_v50, %v2745_v51  ;;  %v1630_v6 = vadd.f32 %v1629_v63, %v1617_v62  ;;  %v2972_v54 = vor.u32 %v3575_v47, %v2969_v48  ;;  %v2801_v47 = vld [vmem:[%s5453_s1 + $0x408] sm:$0xf0] }
  0xae   :  { %1895 = vmatpush.bf16.msrb.mxu2 %v2716_v27  ;;  %v2673_v27 = vld [vmem:[%s5453_s1 + $0x308] sm:$0xf0]  ;;  %v1618_v33 = vpop.f32.mrf.mxu0 }
  0xaf   :  { %1908 = vmatpush.bf16.msrb.mxu3 %v2780_v29  ;;  %v2857_v29 = vld [vmem:[%s5453_s1 + $0x478] sm:$0xf0]  ;;  %v1643_v18 = vadd.f32 %v1642_v15, %v1630_v6  ;;  %v2817_v15 = vld [vmem:[%s5453_s1 + $0x428] sm:$0xf0]  ;;  %v3535_v33 = vld [vmem:[%s5453_s1 + $0x414] sm:$0xf] }
  0xb0   :  { %1870 = vmatpush.bf16.msrb.mxu0 %v2580_v10  ;;  %v2985_v10 = vld [vmem:[%s5453_s1 + $0x578] sm:$0xf0]  ;;  %v2860_v17 = vor.u32 %v3547_v28, %v2857_v29  ;;  %v3555_v28 = vld [vmem:[%s5453_s1 + $0x4b4] sm:$0xf] }
  0xb1   :  { %1883 = vmatpush.bf16.msrb.mxu1 %v2644_v11  ;;  %v2612_v11 = vor.u32 %v3485_v58, %v2609_v59  ;;  %v2988_v21 = vor.u32 %v3579_v9, %v2985_v10  ;;  %v2961_v58 = vld [vmem:[%s5453_s1 + $0x548] sm:$0xf0]  ;;  %v3589_v59 = vld [vmem:[%s5453_s1 + $0x5c4] sm:$0xf]  ;;  %v2889_v6 = vld [vmem:[%s5453_s1 + $0x4b8] sm:$0xf0] }
  0xb2   :  { %1896 = vmatpush.bf16.msrb.mxu2 %v2708_v12  ;;  %v2676_v12 = vor.u32 %v3501_v61, %v2673_v27  ;;  %v1644_v50 = vpop.f32.mrf.mxu2  ;;  %v3025_v61 = vld [vmem:[%s5453_s1 + $0x5c8] sm:$0xf0]  ;;  %v3587_v9 = vld [vmem:[%s5453_s1 + $0x5b4] sm:$0xf]  ;;  %v3017_v10 = vld [vmem:[%s5453_s1 + $0x5b8] sm:$0xf0] }
  0xb3   :  { %1909 = vmatpush.bf16.msrb.mxu3 %v2772_v16  ;;  %v2740_v16 = vor.u32 %v3517_v4, %v2737_v5  ;;  %v3539_v4 = vld [vmem:[%s5453_s1 + $0x434] sm:$0xf]  ;;  %v2825_v5 = vld [vmem:[%s5453_s1 + $0x438] sm:$0xf0]  ;;  %v3028_v34 = vor.u32 %v3589_v59, %v3025_v61  ;;  %v2865_v50 = vld [vmem:[%s5453_s1 + $0x488] sm:$0xf0] }
  0xb4   :  { %1871 = vmatpush.bf16.msrb.mxu0 %v2572_v22  ;;  %v3545_v22 = vld [vmem:[%s5453_s1 + $0x464] sm:$0xf]  ;;  %v1631_v38 = vpop.f32.mrf.mxu1  ;;  %v3177_v59 = vld [vmem:[%s5453_s1 + $0x6f8] sm:$0xf0]  ;;  %v3643_v61 = vld [vmem:[%s5453_s1 + $0x774] sm:$0xf] }
  0xb5   :  { %1884 = vmatpush.bf16.msrb.mxu1 %v2636_v24  ;;  %v3561_v24 = vld [vmem:[%s5453_s1 + $0x4e4] sm:$0xf] }
  0xb6   :  { %1897 = vmatpush.bf16.msrb.mxu2 %v2700_v25  ;;  %v3052_v25 = vor.u32 %v3595_v13, %v3049_v14  ;;  %v2916_v40 = vor.u32 %v3561_v24, %v2913_v26  ;;  %v3537_v14 = vld [vmem:[%s5453_s1 + $0x424] sm:$0xf]  ;;  %v3009_v24 = vld [vmem:[%s5453_s1 + $0x5a8] sm:$0xf0] }
  0xb7   :  { %1910 = vmatpush.bf16.msrb.mxu3 %v2764_v32  ;;  %v4997_v32 = vadd.f32 %v1655_v19, %v1643_v18  ;;  %v3020_v18 = vor.u32 %v3587_v9, %v3017_v10  ;;  %v2881_v19 = vld [vmem:[%s5453_s1 + $0x4a8] sm:$0xf0]  ;;  %v3625_v10 = vld [vmem:[%s5453_s1 + $0x6e4] sm:$0xf] }
  0xb8   :  { %1872 = vmatpush.bf16.msrb.mxu0 %v2564_v39  ;;  %v2852_v39 = vor.u32 %v3545_v22, %v2849_v23  ;;  %v3585_v23 = vld [vmem:[%s5453_s1 + $0x5a4] sm:$0xf]  ;;  %v3105_v9 = vld [vmem:[%s5453_s1 + $0x668] sm:$0xf0] }
  0xb9   :  { %1885 = vmatpush.bf16.msrb.mxu1 %v2628_v41  ;;  %v2980_v41 = vor.u32 %v3577_v30, %v2977_v31 }
  0xba   :  { %1898 = vmatpush.bf16.msrb.mxu2 %v2692_v42  ;;  %v3543_v42 = vld [vmem:[%s5453_s1 + $0x454] sm:$0xf] }
  0xbb   :  { %1911 = vmatpush.bf16.msrb.mxu3 %v2756_v46  ;;  %v2905_v46 = vld [vmem:[%s5453_s1 + $0x4d8] sm:$0xf0]  ;;  %v2844_v51 = vor.u32 %v3543_v42, %v2841_v43  ;;  %v3583_v43 = vld [vmem:[%s5453_s1 + $0x594] sm:$0xf] }
  0xbc   :  { %1873 = vmatpush.bf16.msrb.mxu0 %v2556_v52  ;;  %v1657_v52 = vpop.f32.mrf.mxu3  ;;  %v2908_v53 = vor.u32 %v3559_v44, %v2905_v46  ;;  %v2937_v42 = vld [vmem:[%s5453_s1 + $0x518] sm:$0xf0]  ;;  %v3533_v46 = vld [vmem:[%s5453_s1 + $0x404] sm:$0xf] }
  0xbd   :  { %1886 = vmatpush.bf16.msrb.mxu1 %v2620_v56  ;;  %v3001_v44 = vld [vmem:[%s5453_s1 + $0x598] sm:$0xf0] }
  0xbe   :  { %1899 = vmatpush.bf16.msrb.mxu2 %v2684_v57  ;;  %v3573_v57 = vld [vmem:[%s5453_s1 + $0x544] sm:$0xf] }
  0xbf   :  { %1912 = vmatpush.bf16.msrb.mxu3 %v2748_v3  ;;  %v2964_v27 = vor.u32 %v3573_v57, %v2961_v58  ;;  %v3627_v57 = vld [vmem:[%s5453_s1 + $0x6f4] sm:$0xf]  ;;  %v2804_v58 = vor.u32 %v3533_v46, %v2801_v47  ;;  %v3621_v46 = vld [vmem:[%s5453_s1 + $0x6c4] sm:$0xf] }
  0xc0   :  { %1874 = vmatpush.bf16.msrb.mxu0 %v2548_v7  ;;  %v5057_v63 = vpop.f32.mrf.mxu0  ;;  %v3571_v7 = vld [vmem:[%s5453_s1 + $0x534] sm:$0xf] }
  0xc1   :  { %1887 = vmatpush.bf16.msrb.mxu1 %v2612_v11  ;;  %v5068_v29 = vpop.f32.mrf.mxu1  ;;  %v2828_v11 = vor.u32 %v3539_v4, %v2825_v5  ;;  %v2956_v13 = vor.u32 %v3571_v7, %v2953_v8  ;;  %v3659_v4 = vld [vmem:[%s5453_s1 + $0x7f4] sm:$0xf]  ;;  %v3305_v5 = vld [vmem:[%s5453_s1 + $0x7f8] sm:$0xf0]  ;;  %v3609_v8 = vld [vmem:[%s5453_s1 + $0x664] sm:$0xf] }
  0xc2   :  { %1900 = vmatpush.bf16.msrb.mxu2 %v2676_v12  ;;  %v2892_v12 = vor.u32 %v3555_v28, %v2889_v6  ;;  %v3180_v6 = vor.u32 %v3627_v57, %v3177_v59  ;;  %v3635_v59 = vld [vmem:[%s5453_s1 + $0x734] sm:$0xf] }
  0xc3   :  { %1913 = vmatpush.bf16.msrb.mxu3 %v2740_v16  ;;  %1875 = vmatmul.bf16.vlgmr.msrb.gmra.mxu0 %v4161_v0  ;;  %v2833_v0 = vld [vmem:[%s5453_s1 + $0x448] sm:$0xf0]  ;;  %v3553_v16 = vld [vmem:[%s5453_s1 + $0x4a4] sm:$0xf] }
  0xc4   :  { %1919 = vmatpush.bf16.msra.mxu0 %v2860_v17  ;;  %1888 = vmatmul.bf16.vlgmr.msrb.gmra.mxu1 %v4165_v2  ;;  %v2897_v2 = vld [vmem:[%s5453_s1 + $0x4c8] sm:$0xf0]  ;;  %v2836_v62 = vor.u32 %v3541_v55, %v2833_v0  ;;  %v2884_v30 = vor.u32 %v3553_v16, %v2881_v19  ;;  %v3581_v55 = vld [vmem:[%s5453_s1 + $0x584] sm:$0xf] }
  0xc5   :  { %1932 = vmatpush.bf16.msra.mxu1 %v2924_v20  ;;  %1901 = vmatmul.bf16.vlgmr.msrb.gmra.mxu2 %v4156_v60  ;;  %v3033_v60 = vld [vmem:[%s5453_s1 + $0x5d8] sm:$0xf0]  ;;  %v3569_v20 = vld [vmem:[%s5453_s1 + $0x524] sm:$0xf]  ;;  %v2993_v0 = vld [vmem:[%s5453_s1 + $0x588] sm:$0xf0] }
  0xc6   :  { %1945 = vmatpush.bf16.msra.mxu2 %v2988_v21  ;;  %1914 = vmatmul.bf16.vlgmr.msrb.gmra.mxu3 %v4163_v1  ;;  %v3557_v1 = vld [vmem:[%s5453_s1 + $0x4c4] sm:$0xf]  ;;  %v3036_v56 = vor.u32 %v3591_v49, %v3033_v60  ;;  %v2945_v21 = vld [vmem:[%s5453_s1 + $0x528] sm:$0xf0]  ;;  %v2996_v28 = vor.u32 %v3581_v55, %v2993_v0 }
  0xc7   :  { %1958 = vmatpush.bf16.msra.mxu3 %v3052_v25  ;;  %v2900_v3 = vor.u32 %v3557_v1, %v2897_v2  ;;  %v2820_v25 = vor.u32 %v3537_v14, %v2817_v15  ;;  %v2948_v31 = vor.u32 %v3569_v20, %v2945_v21  ;;  %v3549_v60 = vld [vmem:[%s5453_s1 + $0x484] sm:$0xf]  ;;  %v3113_v2 = vld [vmem:[%s5453_s1 + $0x678] sm:$0xf0]  ;;  %v3233_v14 = vld [vmem:[%s5453_s1 + $0x768] sm:$0xf0] }
  0xc8   :  { %1920 = vmatpush.bf16.msra.mxu0 %v2852_v39  ;;  %v5094_v17 = vpop.f32.mrf.mxu2  ;;  %v1670_v26 = vpop.f32.mrf.mxu0  ;;  %v3012_v39 = vor.u32 %v3585_v23, %v3009_v24  ;;  %v3657_v15 = vld [vmem:[%s5453_s1 + $0x7e4] sm:$0xf]  ;;  %v3297_v16 = vld [vmem:[%s5453_s1 + $0x7e8] sm:$0xf0]  ;;  %v3607_v21 = vld [vmem:[%s5453_s1 + $0x654] sm:$0xf] }
  0xc9   :  { %1933 = vmatpush.bf16.msra.mxu1 %v2916_v40  ;;  %v5105_v22 = vpop.f32.mrf.mxu3  ;;  %v1683_v38 = vpop.f32.mrf.mxu1  ;;  %v2873_v40 = vld [vmem:[%s5453_s1 + $0x498] sm:$0xf0]  ;;  %v3623_v24 = vld [vmem:[%s5453_s1 + $0x6d4] sm:$0xf]  ;;  %v3300_v26 = vor.u32 %v3657_v15, %v3297_v16  ;;  %v3265_v15 = vld [vmem:[%s5453_s1 + $0x7a8] sm:$0xf0] }
  0xca   :  { %1946 = vmatpush.bf16.msra.mxu2 %v2980_v41  ;;  %v3567_v41 = vld [vmem:[%s5453_s1 + $0x514] sm:$0xf]  ;;  %v2876_v48 = vor.u32 %v3551_v37, %v2873_v40  ;;  %v3097_v23 = vld [vmem:[%s5453_s1 + $0x658] sm:$0xf0]  ;;  %v3690_v37 = vld [vmem:[#allocation1 + $0x9] sm:$0xff] }
  0xcb   :  { %1959 = vmatpush.bf16.msra.mxu3 %v3044_v45  ;;  %v2812_v45 = vor.u32 %v3535_v33, %v2809_v35  ;;  %v2940_v49 = vor.u32 %v3567_v41, %v2937_v42  ;;  %v3225_v33 = vld [vmem:[%s5453_s1 + $0x758] sm:$0xf0]  ;;  %v3689_v35 = vld [vmem:[#allocation1 + $0x12] sm:$0xff]  ;;  %v3100_v41 = vor.u32 %v3607_v21, %v3097_v23 }
  0xcc   :  { %1921 = vmatpush.bf16.msra.mxu0 %v2844_v51  ;;  %v3565_v51 = vld [vmem:[%s5453_s1 + $0x504] sm:$0xf]  ;;  %v3655_v38 = vld [vmem:[%s5453_s1 + $0x7d4] sm:$0xf]  ;;  %v3691_v40 = vld [vmem:[#allocation1 + $0x1b] sm:$0xff] }
  0xcd   :  { %1934 = vmatpush.bf16.msra.mxu1 %v2908_v53  ;;  %v3004_v53 = vor.u32 %v3583_v43, %v3001_v44  ;;  %v3605_v44 = vld [vmem:[%s5453_s1 + $0x644] sm:$0xf]  ;;  %v3615_v23 = vld [vmem:[%s5453_s1 + $0x694] sm:$0xf] }
  0xce   :  { %1947 = vmatpush.bf16.msra.mxu2 %v2972_v54  ;;  %v2929_v54 = vld [vmem:[%s5453_s1 + $0x508] sm:$0xf0] }
  0xcf   :  { %1960 = vmatpush.bf16.msra.mxu3 %v3036_v56  ;;  %v3611_v56 = vld [vmem:[%s5453_s1 + $0x674] sm:$0xf] }
  0xd0   :  { %1922 = vmatpush.bf16.msra.mxu0 %v2836_v62  ;;  %v1696_v52 = vpop.f32.mrf.mxu2  ;;  %v3241_v62 = vld [vmem:[%s5453_s1 + $0x778] sm:$0xf0] }
  0xd1   :  { %1935 = vmatpush.bf16.msra.mxu1 %v2900_v3  ;;  %v1709_v1 = vpop.f32.mrf.mxu3  ;;  %v2868_v3 = vor.u32 %v3549_v60, %v2865_v50  ;;  %v3244_v7 = vor.u32 %v3643_v61, %v3241_v62  ;;  %v3217_v60 = vld [vmem:[%s5453_s1 + $0x748] sm:$0xf0]  ;;  %v3209_v61 = vld [vmem:[%s5453_s1 + $0x738] sm:$0xf0]  ;;  %v3651_v62 = vld [vmem:[%s5453_s1 + $0x7b4] sm:$0xf] }
  0xd2   :  { %1948 = vmatpush.bf16.msra.mxu2 %v2964_v27  ;;  %v2932_v27 = vor.u32 %v3565_v51, %v2929_v54  ;;  %v3653_v51 = vld [vmem:[%s5453_s1 + $0x7c4] sm:$0xf]  ;;  %v3281_v52 = vld [vmem:[%s5453_s1 + $0x7c8] sm:$0xf0]  ;;  %v3603_v1 = vld [vmem:[%s5453_s1 + $0x634] sm:$0xf] }
  0xd3   :  { %1961 = vmatpush.bf16.msra.mxu3 %v3028_v34  ;;  %v3116_v34 = vor.u32 %v3611_v56, %v3113_v2  ;;  %v3081_v56 = vld [vmem:[%s5453_s1 + $0x638] sm:$0xf0]  ;;  %v3619_v2 = vld [vmem:[%s5453_s1 + $0x6b4] sm:$0xf]  ;;  %v3284_v57 = vor.u32 %v3653_v51, %v3281_v52 }
  0xd4   :  { %1923 = vmatpush.bf16.msra.mxu0 %v2828_v11  ;;  %v3308_v11 = vor.u32 %v3659_v4, %v3305_v5  ;;  %v3212_v5 = vor.u32 %v3635_v59, %v3209_v61 }
  0xd5   :  { %1936 = vmatpush.bf16.msra.mxu1 %v2892_v12  ;;  %v3169_v12 = vld [vmem:[%s5453_s1 + $0x6e8] sm:$0xf0] }
  0xd6   :  { %1949 = vmatpush.bf16.msra.mxu2 %v2956_v13  ;;  %v3641_v13 = vld [vmem:[%s5453_s1 + $0x764] sm:$0xf]  ;;  %v3172_v19 = vor.u32 %v3625_v10, %v3169_v12  ;;  %v1669_v12 = vadd.f32 %v5057_v63, %v4997_v32  ;;  %v3599_v32 = vld [vmem:[%s5453_s1 + $0x614] sm:$0xf]  ;;  %v3065_v63 = vld [vmem:[%s5453_s1 + $0x618] sm:$0xf0] }
  0xd7   :  { %1962 = vmatpush.bf16.msra.mxu3 %v3020_v18  ;;  %v3108_v18 = vor.u32 %v3609_v8, %v3105_v9  ;;  %v3236_v20 = vor.u32 %v3641_v13, %v3233_v14  ;;  %v3137_v9 = vld [vmem:[%s5453_s1 + $0x6a8] sm:$0xf0]  ;;  %v3633_v10 = vld [vmem:[%s5453_s1 + $0x724] sm:$0xf] }
  0xd8   :  { %1924 = vmatpush.bf16.msra.mxu0 %v2820_v25  ;;  %v3688_v25 = vld [vmem:[#allocation1] sm:$0xff] }
  0xd9   :  { %1937 = vmatpush.bf16.msra.mxu1 %v2884_v30  ;;  %v3161_v30 = vld [vmem:[%s5453_s1 + $0x6d8] sm:$0xf0]  ;;  %v3649_v14 = vld [vmem:[%s5453_s1 + $0x7a4] sm:$0xf] }
  0xda   :  { %1950 = vmatpush.bf16.msra.mxu2 %v2948_v31  ;;  %v3639_v31 = vld [vmem:[%s5453_s1 + $0x754] sm:$0xf]  ;;  %v3164_v42 = vor.u32 %v3623_v24, %v3161_v30  ;;  %v3268_v24 = vor.u32 %v3649_v14, %v3265_v15  ;;  %v3193_v30 = vld [vmem:[%s5453_s1 + $0x718] sm:$0xf0]  ;;  %v3661_v15 = vld [vmem:[%s5455_s3] sm:$0xff] }
  0xdb   :  { %1963 = vmatpush.bf16.msra.mxu3 %v3012_v39  ;;  %v3289_v39 = vld [vmem:[%s5453_s1 + $0x7d8] sm:$0xf0]  ;;  %v3228_v43 = vor.u32 %v3639_v31, %v3225_v33  ;;  %v1682_v31 = vadd.f32 %v5068_v29, %v1669_v12  ;;  %v3647_v33 = vld [vmem:[%s5453_s1 + $0x794] sm:$0xf]  ;;  %v3057_v29 = vld [vmem:[%s5453_s1 + $0x608] sm:$0xf0] }
  0xdc   :  { %1925 = vmatpush.bf16.msra.mxu0 %v2812_v45  ;;  %v3089_v45 = vld [vmem:[%s5453_s1 + $0x648] sm:$0xf0]  ;;  %v3292_v47 = vor.u32 %v3655_v38, %v3289_v39 }
  0xdd   :  { %1938 = vmatpush.bf16.msra.mxu1 %v2876_v48  ;;  %v3153_v48 = vld [vmem:[%s5453_s1 + $0x6c8] sm:$0xf0] }
  0xde   :  { %1951 = vmatpush.bf16.msra.mxu2 %v2940_v49  ;;  %v3637_v49 = vld [vmem:[%s5453_s1 + $0x744] sm:$0xf]  ;;  %v3156_v55 = vor.u32 %v3621_v46, %v3153_v48 }
  0xdf   :  { %1964 = vmatpush.bf16.msra.mxu3 %v3004_v53  ;;  %v3092_v53 = vor.u32 %v3605_v44, %v3089_v45  ;;  %v3220_v0 = vor.u32 %v3637_v49, %v3217_v60  ;;  %v3629_v44 = vld [vmem:[%s5453_s1 + $0x704] sm:$0xf]  ;;  %v3185_v45 = vld [vmem:[%s5453_s1 + $0x708] sm:$0xf0] }
  0xe0   :  { %1926 = vmatpush.bf16.msra.mxu0 %v2804_v58  ;;  %v5251_v50 = vpop.f32.mrf.mxu0  ;;  %v3145_v58 = vld [vmem:[%s5453_s1 + $0x6b8] sm:$0xf0]  ;;  %v3645_v48 = vld [vmem:[%s5453_s1 + $0x784] sm:$0xf]  ;;  %v3249_v49 = vld [vmem:[%s5453_s1 + $0x788] sm:$0xf0] }
  0xe1   :  { %1939 = vmatpush.bf16.msra.mxu1 %v2868_v3  ;;  %v5259_v54 = vpop.f32.mrf.mxu1  ;;  %v3273_v3 = vld [vmem:[%s5453_s1 + $0x7b8] sm:$0xf0]  ;;  %v3148_v4 = vor.u32 %v3619_v2, %v3145_v58  ;;  %v3692_v2 = vld [vmem:[#allocation1 + $0x24] sm:$0xff] }
  0xe2   :  { %1952 = vmatpush.bf16.msra.mxu2 %v2932_v27  ;;  %v3084_v27 = vor.u32 %v3603_v1, %v3081_v56  ;;  %v3667_v56 = vld [vmem:[%s5455_s3 + $0x30] sm:$0xff] }
  0xe3   :  { %1965 = vmatpush.bf16.msra.mxu3 %v2996_v28  ;;  %1927 = vmatmul.bf16.vlgmr.msra.gmra.mxu0 %v3688_v25  ;;  %v3601_v28 = vld [vmem:[%s5453_s1 + $0x624] sm:$0xf]  ;;  %v3129_v25 = vld [vmem:[%s5453_s1 + $0x698] sm:$0xf0] }
  0xe4   :  { %1971 = vmatpush.bf16.msrb.mxu0 %v3116_v34  ;;  %1940 = vmatmul.bf16.vlgmr.msra.gmra.mxu1 %v3690_v37  ;;  %v3073_v34 = vld [vmem:[%s5453_s1 + $0x628] sm:$0xf0]  ;;  %v3068_v37 = vor.u32 %v3599_v32, %v3065_v63  ;;  %v3132_v38 = vor.u32 %v3615_v23, %v3129_v25  ;;  %v3694_v58 = vld [vmem:[#allocation1 + $0x36] sm:$0xff] }
  0xe5   :  { %1984 = vmatpush.bf16.msrb.mxu1 %v3180_v6  ;;  %1953 = vmatmul.bf16.vlgmr.msra.gmra.mxu2 %v3689_v35  ;;  %v3617_v6 = vld [vmem:[%s5453_s1 + $0x6a4] sm:$0xf]  ;;  %v3257_v35 = vld [vmem:[%s5453_s1 + $0x798] sm:$0xf0] }
  0xe6   :  { %1997 = vmatpush.bf16.msrb.mxu2 %v3244_v7  ;;  %1966 = vmatmul.bf16.vlgmr.msra.gmra.mxu3 %v3691_v40  ;;  %v3276_v7 = vor.u32 %v3651_v62, %v3273_v3  ;;  %v3597_v40 = vld [vmem:[%s5453_s1 + $0x604] sm:$0xf] }
  0xe7   :  { %2010 = vmatpush.bf16.msrb.mxu3 %v3308_v11  ;;  %v3201_v11 = vld [vmem:[%s5453_s1 + $0x728] sm:$0xf0]  ;;  %v3060_v51 = vor.u32 %v3597_v40, %v3057_v29  ;;  %v3665_v3 = vld [vmem:[%s5455_s3 + $0x20] sm:$0xff] }
  0xe8   :  { %1972 = vmatpush.bf16.msrb.mxu0 %v3108_v18  ;;  %v5294_v8 = vpop.f32.mrf.mxu2  ;;  %v1722_v16 = vpop.f32.mrf.mxu0  ;;  %v3076_v18 = vor.u32 %v3601_v28, %v3073_v34  ;;  %v3204_v21 = vor.u32 %v3633_v10, %v3201_v11  ;;  %v3662_v11 = vld [vmem:[%s5455_s3 + $0x8] sm:$0xff] }
  0xe9   :  { %1985 = vmatpush.bf16.msrb.mxu1 %v3172_v19  ;;  %v5307_v13 = vpop.f32.mrf.mxu3  ;;  %v1735_v19 = vpop.f32.mrf.mxu1 }
  0xea   :  { %1998 = vmatpush.bf16.msrb.mxu2 %v3236_v20  ;;  %v3140_v20 = vor.u32 %v3617_v6, %v3137_v9  ;;  %v288_v19 = vperm.slane %v4898_v36, 1  ;;  %v3676_v36 = vld [vmem:[%s5455_s3 + $0x78] sm:$0xff] }
  0xeb   :  { %2011 = vmatpush.bf16.msrb.mxu3 %v3300_v26  ;;  %v3631_v26 = vld [vmem:[%s5453_s1 + $0x714] sm:$0xf] }
  0xec   :  { %1973 = vmatpush.bf16.msrb.mxu0 %v3100_v41  ;;  %v3196_v39 = vor.u32 %v3631_v26, %v3193_v30  ;;  %v3613_v41 = vld [vmem:[%s5453_s1 + $0x684] sm:$0xf] }
  0xed   :  { %1986 = vmatpush.bf16.msrb.mxu1 %v3164_v42  ;;  %v3260_v42 = vor.u32 %v3647_v33, %v3257_v35 }
  0xee   :  { %1999 = vmatpush.bf16.msrb.mxu2 %v3228_v43  ;;  %v3121_v43 = vld [vmem:[%s5453_s1 + $0x688] sm:$0xf0]  ;;  %s2276_s1 = sshll.u32 %s5459_s7, 4  ;;  %s2277_s1 = int_to_ptr.hbm [resolvable:$true] %s2276_s1 }
  0xef   :  { %2012 = vmatpush.bf16.msrb.mxu3 %v3292_v47  ;;  %v1695_v47 = vadd.f32 %v5094_v17, %v1682_v31  ;;  %v3124_v52 = vor.u32 %v3613_v41, %v3121_v43  ;;  %v3668_v17 = vld [vmem:[%s5455_s3 + $0x38] sm:$0xff] }
  0xf0   :  { %1974 = vmatpush.bf16.msrb.mxu0 %v3092_v53  ;;  %v1748_v46 = vpop.f32.mrf.mxu2  ;;  %v3188_v53 = vor.u32 %v3629_v44, %v3185_v45  ;;  %v3674_v44 = vld [vmem:[%s5455_s3 + $0x68] sm:$0xff] }
  0xf1   :  { %1987 = vmatpush.bf16.msrb.mxu1 %v3156_v55  ;;  %v1761_v60 = vpop.f32.mrf.mxu3  ;;  %v3252_v55 = vor.u32 %v3645_v48, %v3249_v49  ;;  %v3673_v46 = vld [vmem:[%s5455_s3 + $0x60] sm:$0xff]  ;;  %v3671_v49 = vld [vmem:[%s5455_s3 + $0x50] sm:$0xff] }
  0xf2   :  { %2000 = vmatpush.bf16.msrb.mxu2 %v3220_v0  ;;  %v1708_v0 = vadd.f32 %v5105_v22, %v1695_v47  ;;  %v3695_v22 = vld [vmem:[#allocation1 + $0x3f] sm:$0xff] }
  0xf3   :  { %2013 = vmatpush.bf16.msrb.mxu3 %v3284_v57  ;;  %v3693_v57 = vld [vmem:[#allocation1 + $0x2d] sm:$0xff]  ;;  %v3672_v47 = vld [vmem:[%s5455_s3 + $0x58] sm:$0xff] }
  0xf4   :  { %1975 = vmatpush.bf16.msrb.mxu0 %v3084_v27  ;;  %v1721_v1 = vadd.f32 %v5251_v50, %v1708_v0  ;;  %v3666_v50 = vld [vmem:[%s5455_s3 + $0x28] sm:$0xff] }
  0xf5   :  { %1988 = vmatpush.bf16.msrb.mxu1 %v3148_v4 }
  0xf6   :  { %2001 = vmatpush.bf16.msrb.mxu2 %v3212_v5  ;;  %v1734_v59 = vadd.f32 %v5259_v54, %v1721_v1  ;;  %v3664_v54 = vld [vmem:[%s5455_s3 + $0x18] sm:$0xff] }
  0xf7   :  { %2014 = vmatpush.bf16.msrb.mxu3 %v3276_v7 }
  0xf8   :  { %1976 = vmatpush.bf16.msrb.mxu0 %v3076_v18  ;;  %v1747_v61 = vadd.f32 %v5294_v8, %v1734_v59  ;;  %v3663_v8 = vld [vmem:[%s5455_s3 + $0x10] sm:$0xff] }
  0xf9   :  { %1989 = vmatpush.bf16.msrb.mxu1 %v3140_v20 }
  0xfa   :  { %2002 = vmatpush.bf16.msrb.mxu2 %v3204_v21  ;;  %v1760_v4 = vadd.f32 %v5307_v13, %v1747_v61 }
  0xfb   :  { %2015 = vmatpush.bf16.msrb.mxu3 %v3268_v24 }
  0xfc   :  { %1977 = vmatpush.bf16.msrb.mxu0 %v3068_v37 }
  0xfd   :  { %1990 = vmatpush.bf16.msrb.mxu1 %v3132_v38 }
  0xfe   :  { %2003 = vmatpush.bf16.msrb.mxu2 %v3196_v39 }
  0xff   :  { %2016 = vmatpush.bf16.msrb.mxu3 %v3260_v42  ;;  %v3675_v42 = vld [vmem:[%s5455_s3 + $0x70] sm:$0xff] }
 0x100   :  { %1978 = vmatpush.bf16.msrb.mxu0 %v3060_v51  ;;  %v1772_v62 = vpop.f32.mrf.mxu0 }
 0x101   :  { %1991 = vmatpush.bf16.msrb.mxu1 %v3124_v52  ;;  %v1785_v27 = vpop.f32.mrf.mxu1  ;;  %v1773_v5 = vadd.f32 %v1772_v62, %v1760_v4  ;;  %v3670_v52 = vld [vmem:[%s5455_s3 + $0x48] sm:$0xff] }
 0x102   :  { %2004 = vmatpush.bf16.msrb.mxu2 %v3188_v53 }
 0x103   :  { %2017 = vmatpush.bf16.msrb.mxu3 %v3252_v55  ;;  %1979 = vmatmul.bf16.vlgmr.msrb.gmra.mxu0 %v3692_v2  ;;  %v1786_v34 = vadd.f32 %v1785_v27, %v1773_v5 }
 0x104   :  { %2159 = vmatpush.bf16.msra.mxu0 %v3668_v17  ;;  %1992 = vmatmul.bf16.vlgmr.msrb.gmra.mxu1 %v3693_v57 }
 0x105   :  { %2005 = vmatmul.bf16.vlgmr.msrb.gmra.mxu2 %v3694_v58  ;;  %2172 = vmatpush.bf16.msra.mxu1 %v3676_v36 }
 0x106   :  { %2018 = vmatmul.bf16.vlgmr.msrb.gmra.mxu3 %v3695_v22 }
 0x108   :  { %2160 = vmatpush.bf16.msra.mxu0 %v3667_v56  ;;  %v1798_v28 = vpop.f32.mrf.mxu2  ;;  %v1774_v7 = vpop.f32.mrf.mxu0  ;;  %v3669_v56 = vld [vmem:[%s5455_s3 + $0x40] sm:$0xff] }
 0x109   :  { %v1811_v6 = vpop.f32.mrf.mxu3  ;;  %v1787_v9 = vpop.f32.mrf.mxu1  ;;  %v1799_v10 = vadd.f32 %v1798_v28, %v1786_v34  ;;  %2173 = vmatpush.bf16.msra.mxu1 %v3675_v42 }
 0x10b   :  { %v1812_v12 = vadd.f32 %v1811_v6, %v1799_v10 }
 0x10c   :  { %2161 = vmatpush.bf16.msra.mxu0 %v3666_v50 }
 0x10d   :  { %v2023_v16 = vmax.f32 %v1812_v12, 0.0  ;;  %2174 = vmatpush.bf16.msra.mxu1 %v3674_v44  ;;  %v3682_v12 = vld [vmem:[%s5457_s5 + $0x28] sm:$0xff] }
 0x10f   :  { %v2025_v18 = vpack.c.bf16 %v2023_v16, %v2023_v16  ;;  %v3681_v16 = vld [vmem:[%s5457_s5 + $0x20] sm:$0xff] }
 0x110   :  { %2162 = vmatpush.bf16.msra.mxu0 %v3665_v3  ;;  %v1800_v13 = vpop.f32.mrf.mxu2 }
 0x111   :  { %v1813_v14 = vpop.f32.mrf.mxu3  ;;  %2175 = vmatpush.bf16.msra.mxu1 %v3673_v46 }
 0x114   :  { %2163 = vmatpush.bf16.msra.mxu0 %v3664_v54  ;;  %v3684_v54 = vld [vmem:[%s5457_s5 + $0x38] sm:$0xff] }
 0x115   :  { %2176 = vmatpush.bf16.msra.mxu1 %v3672_v47  ;;  %2255 = vmatpush.bf16.msra.mxu2 %v3684_v54 }
 0x118   :  { %2164 = vmatpush.bf16.msra.mxu0 %v3663_v8  ;;  %v3683_v8 = vld [vmem:[%s5457_s5 + $0x30] sm:$0xff] }
 0x119   :  { %2177 = vmatpush.bf16.msra.mxu1 %v3671_v49  ;;  %2256 = vmatpush.bf16.msra.mxu2 %v3683_v8 }
 0x11c   :  { %2165 = vmatpush.bf16.msra.mxu0 %v3662_v11 }
 0x11d   :  { %2178 = vmatpush.bf16.msra.mxu1 %v3670_v52  ;;  %2257 = vmatpush.bf16.msra.mxu2 %v3682_v12 }
 0x120   :  { %2166 = vmatpush.bf16.msra.mxu0 %v3661_v15  ;;  %v1824_v20 = vpop.f32.mrf.mxu0 }
 0x121   :  { %v1825_v21 = vadd.f32 %v1824_v20, %v288_v19  ;;  %v1837_v32 = vpop.f32.mrf.mxu1  ;;  %2179 = vmatpush.bf16.msra.mxu1 %v3669_v56  ;;  %2258 = vmatpush.bf16.msra.mxu2 %v3681_v16  ;;  %v3679_v19 = vld [vmem:[%s5457_s5 + $0x10] sm:$0xff] }
 0x123   :  { %2167 = vmatmul.bf16.vlgmr.msra.gmra.mxu0 %v2025_v18  ;;  %v1838_v63 = vadd.f32 %v1837_v32, %v1825_v21  ;;  %v3680_v18 = vld [vmem:[%s5457_s5 + $0x18] sm:$0xff]  ;;  %v3678_v32 = vld [vmem:[%s5457_s5 + $0x8] sm:$0xff] }
 0x125   :  { %2259 = vmatpush.bf16.msra.mxu2 %v3680_v18 }
 0x128   :  { %v1850_v23 = vpop.f32.mrf.mxu2  ;;  %v1826_v30 = vpop.f32.mrf.mxu0 }
 0x129   :  { %v1851_v24 = vadd.f32 %v1850_v23, %v1838_v63  ;;  %v1863_v25 = vpop.f32.mrf.mxu3  ;;  %v1839_v31 = vpop.f32.mrf.mxu1  ;;  %2260 = vmatpush.bf16.msra.mxu2 %v3679_v19  ;;  %v3677_v63 = vld [vmem:[%s5457_s5] sm:$0xff] }
 0x12a   :  { %v3686_v23 = vld [vmem:[%s5456_s4] ss:$0 sm:$0xff] }
 0x12b   :  { %v1864_v26 = vadd.f32 %v1863_v25, %v1851_v24 }
 0x12d   :  { %2261 = vmatpush.bf16.msra.mxu2 %v3678_v32 }
 0x130   :  { %v1852_v33 = vpop.f32.mrf.mxu2 }
 0x131   :  { %v1865_v35 = vpop.f32.mrf.mxu3  ;;  %2262 = vmatpush.bf16.msra.mxu2 %v3677_v63 }
 0x132   :  { %v3687_v35 = vld [vmem:[%s5458_s6] ss:$0 sm:$0xff] }
 0x140   :  { %v1876_v37 = vpop.f32.mrf.mxu0 }
 0x141   :  { %v1889_v38 = vpop.f32.mrf.mxu1  ;;  %v1877_v51 = vadd.f32 %v1876_v37, %v1864_v26 }
 0x143   :  { %v1890_v0 = vadd.f32 %v1889_v38, %v1877_v51 }
 0x148   :  { %v1902_v39 = vpop.f32.mrf.mxu2  ;;  %v1878_v29 = vpop.f32.mrf.mxu0 }
 0x149   :  { %v1915_v40 = vpop.f32.mrf.mxu3  ;;  %v1891_v41 = vpop.f32.mrf.mxu1  ;;  %v1903_v2 = vadd.f32 %v1902_v39, %v1890_v0 }
 0x14b   :  { %v1916_v59 = vadd.f32 %v1915_v40, %v1903_v2 }
 0x150   :  { %v1904_v43 = vpop.f32.mrf.mxu2 }
 0x151   :  { %v1917_v45 = vpop.f32.mrf.mxu3 }
 0x160   :  { %v1928_v48 = vpop.f32.mrf.mxu0 }
 0x161   :  { %v1941_v60 = vpop.f32.mrf.mxu1  ;;  %v1929_v22 = vadd.f32 %v1928_v48, %v1916_v59 }
 0x163   :  { %v1942_v50 = vadd.f32 %v1941_v60, %v1929_v22 }
 0x168   :  { %v1954_v53 = vpop.f32.mrf.mxu2  ;;  %v1930_v17 = vpop.f32.mrf.mxu0 }
 0x169   :  { %v1967_v55 = vpop.f32.mrf.mxu3  ;;  %v1943_v1 = vpop.f32.mrf.mxu1  ;;  %v1955_v61 = vadd.f32 %v1954_v53, %v1942_v50 }
 0x16b   :  { %v1968_v62 = vadd.f32 %v1967_v55, %v1955_v61 }
 0x170   :  { %v1956_v57 = vpop.f32.mrf.mxu2 }
 0x171   :  { %v1969_v58 = vpop.f32.mrf.mxu3 }
 0x180   :  { %v1980_v3 = vpop.f32.mrf.mxu0 }
 0x181   :  { %v1993_v27 = vpop.f32.mrf.mxu1  ;;  %v1981_v4 = vadd.f32 %v1980_v3, %v1968_v62 }
 0x183   :  { %v1994_v5 = vadd.f32 %v1993_v27, %v1981_v4 }
 0x188   :  { %v2006_v28 = vpop.f32.mrf.mxu2  ;;  %v1982_v7 = vpop.f32.mrf.mxu0 }
 0x189   :  { %v2007_v34 = vadd.f32 %v2006_v28, %v1994_v5  ;;  %v2019_v6 = vpop.f32.mrf.mxu3  ;;  %v1995_v9 = vpop.f32.mrf.mxu1 }
 0x18b   :  { %v2020_v10 = vadd.f32 %v2019_v6, %v2007_v34 }
 0x18d   :  { %v2024_v11 = vmax.f32 %v2020_v10, 0.0 }
 0x18f   :  { %v2026_v13 = vpack.c.bf16 %v2024_v11, %v2024_v11 }
 0x190   :  { %v2008_v14 = vpop.f32.mrf.mxu2 }
 0x191   :  { %v2021_v15 = vpop.f32.mrf.mxu3  ;;  %2180 = vmatmul.bf16.vlgmr.msra.gmra.mxu1 %v2026_v13 }
 0x1a0   :  { %v2168_v20 = vpop.f32.mrf.mxu0 }
 0x1a1   :  { %v2169_v24 = vadd.f32 %v3686_v23, %v2168_v20 }
 0x1a8   :  { %v2170_v21 = vpop.f32.mrf.mxu0 }
 0x20e   :  { %v2181_v25 = vpop.f32.mrf.mxu1 }
 0x20f   :  { %v2182_v26 = vadd.f32 %v2181_v25, %v2169_v24 }
 0x211   :  { %v2185_v30 = vmax.f32 %v2182_v26, 0.0 }
 0x213   :  { %v2186_v31 = vpack.c.bf16 %v2185_v30, %v2185_v30 }
 0x215   :  { %2263 = vmatmul.bf16.vlgmr.msra.gmra.mxu2 %v2186_v31 }
 0x216   :  { %v2183_v33 = vpop.f32.mrf.mxu1 }
 0x298   :  { %v2264_v37 = vpop.f32.mrf.mxu2 }
 0x299   :  { %v2265_v38 = vadd.f32 %v3687_v35, %v2264_v37 }
 0x29b   :  { %2268 = vst [vmem:[#allocation2] sm:$0x3] %v2265_v38 }
 0x29c   :  { %2279 = dma.vmem_to_hbm [thread:$0]  %s2275_s21, 32, %s2277_s1, [#allocation3]  }
 0x2a0   :  { %v2266_v39 = vpop.f32.mrf.mxu2 }
 0x2a1   :  { %3720 = dma.done.wait [#allocation3], 32  }
 0x2a2   :  { %3721 = vsyncadd [#allocation3], 4294967264 }
 0x2a3   :  { %2284 = vsyncpa [#allocation3], 1 }

</bundles_post_ra>
